<compile_context>
chip_gen: v7x
topology: tpu7x:2x2x1
jax: 0.10.0
libtpu: 0.0.40
codegen_flags: <defaults>
</compile_context>

<pallas_src>
from functools import partial

import jax
import jax.numpy as jnp
from jax.experimental import pallas as pl
from jax.experimental.pallas import tpu as pltpu


# ----------------------------------------------------------------------------
# Fused kernel: q-sample + surrogate denoiser (3x3 conv on cat([cond, x_noisy]))
#               + sum-squared-error against the target, per batch element.
#
#   alpha_ref : SMEM (B, 1)           per-batch sqrt_alpha
#   cond_ref  : VMEM (1, C, HP, WP)   zero-padded condition image (NCHW)
#   x_ref     : VMEM (1, C, HP, WP)   zero-padded clean image to be noised
#   noise_ref : VMEM (1, C, HP, WP)   zero-padded gaussian noise
#   tgt_ref   : VMEM (1, C, H, W)     loss target (NCHW, unpadded)
#   wc_ref    : SMEM (9*C*Cout,)      conv taps acting on the cond channels (flat [dy,dx,cin,cout])
#   wx_ref    : SMEM (9*C*Cout,)      conv taps acting on the x_noisy channels
#   b_ref     : SMEM (Cout,)          bias
#   temb_ref  : SMEM (Cout,)          timestep embedding (scaled by sqrt_alpha)
#   loss_ref  : VMEM (1, 1, 128)      per-batch loss contribution, broadcast over lanes
#   xno_ref   : VMEM scratch (C, HP, WP)  fused q-sample result (never written to HBM)
# ----------------------------------------------------------------------------
def fused_denoise_loss_kernel(alpha_ref, cond_ref, x_ref, noise_ref, tgt_ref,
                              wc_ref, wx_ref, b_ref, temb_ref,
                              loss_ref, xno_ref, *, inv_n):
    bidx = pl.program_id(0)
    a = alpha_ref[bidx, 0]
    # clip guard: sqrt_alpha can hit exactly 1.0 (sqrt_acp_prev[0] == 1.0)
    na = jnp.sqrt(jnp.maximum(1.0 - a * a, 0.0))

    # fused q-sample on the whole padded slab (zero border stays zero, matching
    # the implicit zero-padding of the 3x3 conv on cat([cond, x_noisy]))
    xno_ref[...] = a * x_ref[0] + na * noise_ref[0]

    C, HP, WP = xno_ref.shape
    H, W = HP - 2, WP - 2
    Cout = b_ref.shape[0]

    # 3x3 conv (2C -> Cout) as unrolled VPU multiply-adds over (H, W) planes.
    # Scalar weights come from SMEM; no window reshapes, no under-fed MXU pushes.
    acc = [jnp.zeros((H, W), jnp.float32) for _ in range(Cout)]
    for dy in range(3):
        for dx in range(3):
            for cin in range(C):
                cw = cond_ref[0, cin, dy:dy + H, dx:dx + W]   # cond window  (H, W)
                xw = xno_ref[cin, dy:dy + H, dx:dx + W]       # noisy window (H, W)
                base = ((dy * 3 + dx) * C + cin) * Cout
                for cout in range(Cout):
                    acc[cout] = (acc[cout]
                                 + wc_ref[base + cout] * cw
                                 + wx_ref[base + cout] * xw)

    # bias + a * temb, then fused MSE-sum against the target (pred never leaves VMEM)
    total = jnp.float32(0.0)
    for cout in range(Cout):
        pred = acc[cout] + b_ref[cout] + a * temb_ref[cout]
        d = tgt_ref[0, cout] - pred
        total = total + jnp.sum(d * d)

    # lane-dense scalar writeback (128 lanes of the same value; wrapper reads lane 0)
    loss_ref[...] = jnp.zeros((1, 1, 128), jnp.float32) + total * inv_n


def fused_denoiser_loss(cond_pad, x_pad, noise_pad, target, sqrt_alpha, w, bias, temb):
    """One direction: loss = MSE_sum(target, denoiser(cat([cond, q_sample(x)]))) / (B*C*H*W)."""
    B, C, HP, WP = cond_pad.shape
    H, W = HP - 2, WP - 2
    Cout = bias.shape[0]

    # split the (3,3,2C,Cout) conv weight into the cond-half and the x_noisy-half
    # (conv over concatenated channels == sum of the two half-convs), flattened for SMEM.
    wc = w[:, :, :C, :].reshape(-1).astype(jnp.float32)
    wx = w[:, :, C:, :].reshape(-1).astype(jnp.float32)
    alpha = sqrt_alpha.reshape(B, 1).astype(jnp.float32)
    inv_n = 1.0 / float(B * Cout * H * W)

    # explicit VMEM budget (tile = one batch element): 2x double-buffered blocks + scratch,
    # capped well under v7x's 64 MiB physical VMEM.
    block_bytes = (3 * C * HP * WP + Cout * H * W + 128) * 4
    scratch_bytes = C * HP * WP * 4
    vmem_limit = min(32 * 1024 * 1024,
                     max(2 * 1024 * 1024, 4 * block_bytes + scratch_bytes))

    out = pl.pallas_call(
        partial(fused_denoise_loss_kernel, inv_n=inv_n),
        out_shape=jax.ShapeDtypeStruct((B, 1, 128), jnp.float32),
        grid=(B,),
        in_specs=[
            pl.BlockSpec(memory_space=pltpu.MemorySpace.SMEM),            # alpha (B,1)
            pl.BlockSpec((1, C, HP, WP), lambda b: (b, 0, 0, 0)),         # cond (padded)
            pl.BlockSpec((1, C, HP, WP), lambda b: (b, 0, 0, 0)),         # x    (padded)
            pl.BlockSpec((1, C, HP, WP), lambda b: (b, 0, 0, 0)),         # noise(padded)
            pl.BlockSpec((1, Cout, H, W), lambda b: (b, 0, 0, 0)),        # target
            pl.BlockSpec(memory_space=pltpu.MemorySpace.SMEM),            # wc flat
            pl.BlockSpec(memory_space=pltpu.MemorySpace.SMEM),            # wx flat
            pl.BlockSpec(memory_space=pltpu.MemorySpace.SMEM),            # bias
            pl.BlockSpec(memory_space=pltpu.MemorySpace.SMEM),            # temb
        ],
        out_specs=pl.BlockSpec((1, 1, 128), lambda b: (b, 0, 0)),
        scratch_shapes=[pltpu.VMEM((C, HP, WP), jnp.float32)],
        compiler_params=pltpu.CompilerParams(
            dimension_semantics=("parallel",),       # batch axis -> both TCs on v7x
            vmem_limit_bytes=vmem_limit,
        ),
    )(alpha, cond_pad, x_pad, noise_pad, target, wc, wx, bias, temb)

    return jnp.sum(out[:, 0, 0])


# ----------------------------------------------------------------------------
# Glue: schedule, surrogate params, forward (== Diffusion.net), fully jittable
# ----------------------------------------------------------------------------
def make_noise_schedule(n_timestep=32, linear_start=1e-4, linear_end=2e-2):
    betas = jnp.linspace(linear_start, linear_end, n_timestep, dtype=jnp.float32)
    alphas_cumprod = jnp.cumprod(1.0 - betas)
    sqrt_alphas_cumprod_prev = jnp.sqrt(
        jnp.concatenate([jnp.ones((1,), jnp.float32), alphas_cumprod]))
    return sqrt_alphas_cumprod_prev           # length n_timestep + 1


def init_surrogate_params(key, cin, cout):
    kw, kb, kt = jax.random.split(key, 3)
    w = jax.random.normal(kw, (3, 3, cin, cout), jnp.float32) * 0.1
    b = jax.random.normal(kb, (cout,), jnp.float32) * 0.01
    temb = jax.random.normal(kt, (cout,), jnp.float32) * 0.01
    return (w, b, temb)


def diffusion_forward(RGB, SAR, params, sqrt_acp_prev, key):
    # RGB, SAR: NCHW float32
    B, C, H, W = RGB.shape
    num_timesteps = sqrt_acp_prev.shape[0] - 1

    k_t, k_a, k_nr, k_ns = jax.random.split(key, 4)
    # single t shared across the batch, as in the PyTorch reference (np.random.randint once)
    t = jax.random.randint(k_t, (), 1, num_timesteps + 1)        # traced — no host sync
    lo = sqrt_acp_prev[t - 1]
    hi = sqrt_acp_prev[t]
    sqrt_alpha = jax.random.uniform(k_a, (B,), jnp.float32, minval=lo, maxval=hi)

    noise_RGB = jax.random.normal(k_nr, RGB.shape, jnp.float32)
    noise_SAR = jax.random.normal(k_ns, SAR.shape, jnp.float32)

    # spatial zero-pad (halo for the 3x3 conv); q-sample / concat / loss are fused in-kernel
    pad = lambda x: jnp.pad(x, ((0, 0), (0, 0), (1, 1), (1, 1)))
    RGB_p, SAR_p = pad(RGB), pad(SAR)
    nRGB_p, nSAR_p = pad(noise_RGB), pad(noise_SAR)

    w1, b1, t1 = params["rgb_to_sar"]
    w2, b2, t2 = params["sar_to_rgb"]

    # loss_1 = MSE_sum(SAR, model_RGB_to_SAR(cat([RGB, x_noisy_SAR]))) / (B*C*H*W)
    loss_1 = fused_denoiser_loss(RGB_p, SAR_p, nSAR_p, SAR, sqrt_alpha, w1, b1, t1)
    # loss_2 = MSE_sum(RGB, model_SAR_to_RGB(cat([SAR, x_noisy_RGB]))) / (B*C*H*W)
    loss_2 = fused_denoiser_loss(SAR_p, RGB_p, nRGB_p, RGB, sqrt_alpha, w2, b2, t2)
    return loss_1, loss_2


if __name__ == "__main__":
    key = jax.random.PRNGKey(0)
    B, C, H, W = 2, 3, 16, 16
    k_rgb, k_sar, k_p1, k_p2, k_fwd = jax.random.split(key, 5)

    RGB = jax.random.normal(k_rgb, (B, C, H, W), jnp.float32)
    SAR = jax.random.normal(k_sar, (B, C, H, W), jnp.float32)

    params = {
        "rgb_to_sar": init_surrogate_params(k_p1, 2 * C, C),
        "sar_to_rgb": init_surrogate_params(k_p2, 2 * C, C),
    }
    sqrt_acp_prev = make_noise_schedule(n_timestep=32)

    fwd = jax.jit(diffusion_forward)
    loss_1, loss_2 = fwd(RGB, SAR, params, sqrt_acp_prev, k_fwd)
    jax.block_until_ready((loss_1, loss_2))
    print("KERNEL_OK")
</pallas_src>

<mosaic_0001>
module attributes {stable_mosaic.version = 11 : i64} {
  func.func @fused_denoise_loss_kernel(%arg0: i32, %arg1: memref<2x1xf32, #tpu.memory_space<smem>>, %arg2: memref<1x3x18x18xf32, #tpu.memory_space<vmem>>, %arg3: memref<1x3x18x18xf32, #tpu.memory_space<vmem>>, %arg4: memref<1x3x18x18xf32, #tpu.memory_space<vmem>>, %arg5: memref<1x3x16x16xf32, #tpu.memory_space<vmem>>, %arg6: memref<81xf32, #tpu.memory_space<smem>>, %arg7: memref<81xf32, #tpu.memory_space<smem>>, %arg8: memref<3xf32, #tpu.memory_space<smem>>, %arg9: memref<3xf32, #tpu.memory_space<smem>>, %arg10: memref<1x1x128xf32, #tpu.memory_space<vmem>>, %arg11: memref<3x18x18xf32, #tpu.memory_space<vmem>>) attributes {dimension_semantics = [#tpu.dimension_semantics<parallel>], iteration_bounds = array<i64: 2>, scalar_prefetch = 0 : i64, scratch_operands = 1 : i64, tpu.core_type = #tpu.core_type<tc>, window_params = [{transform_indices = @transform_0, window_bounds = array<i64: 2, 1>}, {transform_indices = @transform_1, window_bounds = array<i64: 1, 3, 18, 18>}, {transform_indices = @transform_2, window_bounds = array<i64: 1, 3, 18, 18>}, {transform_indices = @transform_3, window_bounds = array<i64: 1, 3, 18, 18>}, {transform_indices = @transform_4, window_bounds = array<i64: 1, 3, 16, 16>}, {transform_indices = @transform_5, window_bounds = array<i64: 81>}, {transform_indices = @transform_6, window_bounds = array<i64: 81>}, {transform_indices = @transform_7, window_bounds = array<i64: 3>}, {transform_indices = @transform_8, window_bounds = array<i64: 3>}, {transform_indices = @transform_9, window_bounds = array<i64: 1, 1, 128>}]} {
    %0 = arith.index_cast %arg0 : i32 to index
    %c0 = arith.constant 0 : index
    %1 = memref.load %arg1[%0, %c0] : memref<2x1xf32, #tpu.memory_space<smem>>
    %2 = arith.mulf %1, %1 : f32
    %cst = arith.constant 1.000000e+00 : f32
    %3 = arith.subf %cst, %2 : f32
    %cst_0 = arith.constant 0.000000e+00 : f32
    %4 = arith.maximumf %3, %cst_0 : f32
    %5 = math.sqrt %4 : f32
    %c0_1 = arith.constant 0 : index
    %c0_2 = arith.constant 0 : index
    %c0_3 = arith.constant 0 : index
    %c0_4 = arith.constant 0 : index
    %6 = vector.load %arg3[%c0_1, %c0_2, %c0_3, %c0_4] : memref<1x3x18x18xf32, #tpu.memory_space<vmem>>, vector<1x3x18x18xf32>
    %7 = vector.shape_cast %6 : vector<1x3x18x18xf32> to vector<3x18x18xf32>
    %8 = vector.broadcast %1 : f32 to vector<3x18x18xf32>
    %9 = arith.mulf %8, %7 : vector<3x18x18xf32>
    %c0_5 = arith.constant 0 : index
    %c0_6 = arith.constant 0 : index
    %c0_7 = arith.constant 0 : index
    %c0_8 = arith.constant 0 : index
    %10 = vector.load %arg4[%c0_5, %c0_6, %c0_7, %c0_8] : memref<1x3x18x18xf32, #tpu.memory_space<vmem>>, vector<1x3x18x18xf32>
    %11 = vector.shape_cast %10 : vector<1x3x18x18xf32> to vector<3x18x18xf32>
    %12 = vector.broadcast %5 : f32 to vector<3x18x18xf32>
    %13 = arith.mulf %12, %11 : vector<3x18x18xf32>
    %14 = arith.addf %9, %13 : vector<3x18x18xf32>
    %c0_9 = arith.constant 0 : index
    %c0_10 = arith.constant 0 : index
    %c0_11 = arith.constant 0 : index
    %15 = vector.load %arg11[%c0_9, %c0_10, %c0_11] : memref<3x18x18xf32, #tpu.memory_space<vmem>>, vector<3x18x18xf32>
    tpu.vector_store %arg11[%c0_9, %c0_10, %c0_11], %14 {strides = array<i32>} : memref<3x18x18xf32, #tpu.memory_space<vmem>>, vector<3x18x18xf32>,
    %cst_12 = arith.constant 0.000000e+00 : f32
    %16 = vector.broadcast %cst_12 : f32 to vector<16x16xf32>
    %cst_13 = arith.constant 0.000000e+00 : f32
    %17 = vector.broadcast %cst_13 : f32 to vector<16x16xf32>
    %cst_14 = arith.constant 0.000000e+00 : f32
    %18 = vector.broadcast %cst_14 : f32 to vector<16x16xf32>
    %c0_15 = arith.constant 0 : index
    %c0_16 = arith.constant 0 : index
    %c0_17 = arith.constant 0 : index
    %c0_18 = arith.constant 0 : index
    %19 = vector.load %arg2[%c0_15, %c0_16, %c0_17, %c0_18] : memref<1x3x18x18xf32, #tpu.memory_space<vmem>>, vector<1x1x16x16xf32>
    %20 = vector.shape_cast %19 : vector<1x1x16x16xf32> to vector<16x16xf32>
    %c0_19 = arith.constant 0 : index
    %c0_20 = arith.constant 0 : index
    %c0_21 = arith.constant 0 : index
    %21 = vector.load %arg11[%c0_19, %c0_20, %c0_21] : memref<3x18x18xf32, #tpu.memory_space<vmem>>, vector<1x16x16xf32>
    %22 = vector.shape_cast %21 : vector<1x16x16xf32> to vector<16x16xf32>
    %c0_22 = arith.constant 0 : index
    %23 = memref.load %arg6[%c0_22] : memref<81xf32, #tpu.memory_space<smem>>
    %24 = vector.broadcast %23 : f32 to vector<16x16xf32>
    %25 = arith.mulf %24, %20 : vector<16x16xf32>
    %26 = arith.addf %16, %25 : vector<16x16xf32>
    %c0_23 = arith.constant 0 : index
    %27 = memref.load %arg7[%c0_23] : memref<81xf32, #tpu.memory_space<smem>>
    %28 = vector.broadcast %27 : f32 to vector<16x16xf32>
    %29 = arith.mulf %28, %22 : vector<16x16xf32>
    %30 = arith.addf %26, %29 : vector<16x16xf32>
    %c1 = arith.constant 1 : index
    %31 = memref.load %arg6[%c1] : memref<81xf32, #tpu.memory_space<smem>>
    %32 = vector.broadcast %31 : f32 to vector<16x16xf32>
    %33 = arith.mulf %32, %20 : vector<16x16xf32>
    %34 = arith.addf %17, %33 : vector<16x16xf32>
    %c1_24 = arith.constant 1 : index
    %35 = memref.load %arg7[%c1_24] : memref<81xf32, #tpu.memory_space<smem>>
    %36 = vector.broadcast %35 : f32 to vector<16x16xf32>
    %37 = arith.mulf %36, %22 : vector<16x16xf32>
    %38 = arith.addf %34, %37 : vector<16x16xf32>
    %c2 = arith.constant 2 : index
    %39 = memref.load %arg6[%c2] : memref<81xf32, #tpu.memory_space<smem>>
    %40 = vector.broadcast %39 : f32 to vector<16x16xf32>
    %41 = arith.mulf %40, %20 : vector<16x16xf32>
    %42 = arith.addf %18, %41 : vector<16x16xf32>
    %c2_25 = arith.constant 2 : index
    %43 = memref.load %arg7[%c2_25] : memref<81xf32, #tpu.memory_space<smem>>
    %44 = vector.broadcast %43 : f32 to vector<16x16xf32>
    %45 = arith.mulf %44, %22 : vector<16x16xf32>
    %46 = arith.addf %42, %45 : vector<16x16xf32>
    %c0_26 = arith.constant 0 : index
    %c1_27 = arith.constant 1 : index
    %c0_28 = arith.constant 0 : index
    %c0_29 = arith.constant 0 : index
    %47 = vector.load %arg2[%c0_26, %c1_27, %c0_28, %c0_29] : memref<1x3x18x18xf32, #tpu.memory_space<vmem>>, vector<1x1x16x16xf32>
    %48 = vector.shape_cast %47 : vector<1x1x16x16xf32> to vector<16x16xf32>
    %c1_30 = arith.constant 1 : index
    %c0_31 = arith.constant 0 : index
    %c0_32 = arith.constant 0 : index
    %49 = vector.load %arg11[%c1_30, %c0_31, %c0_32] : memref<3x18x18xf32, #tpu.memory_space<vmem>>, vector<1x16x16xf32>
    %50 = vector.shape_cast %49 : vector<1x16x16xf32> to vector<16x16xf32>
    %c3 = arith.constant 3 : index
    %51 = memref.load %arg6[%c3] : memref<81xf32, #tpu.memory_space<smem>>
    %52 = vector.broadcast %51 : f32 to vector<16x16xf32>
    %53 = arith.mulf %52, %48 : vector<16x16xf32>
    %54 = arith.addf %30, %53 : vector<16x16xf32>
    %c3_33 = arith.constant 3 : index
    %55 = memref.load %arg7[%c3_33] : memref<81xf32, #tpu.memory_space<smem>>
    %56 = vector.broadcast %55 : f32 to vector<16x16xf32>
    %57 = arith.mulf %56, %50 : vector<16x16xf32>
    %58 = arith.addf %54, %57 : vector<16x16xf32>
    %c4 = arith.constant 4 : index
    %59 = memref.load %arg6[%c4] : memref<81xf32, #tpu.memory_space<smem>>
    %60 = vector.broadcast %59 : f32 to vector<16x16xf32>
    %61 = arith.mulf %60, %48 : vector<16x16xf32>
    %62 = arith.addf %38, %61 : vector<16x16xf32>
    %c4_34 = arith.constant 4 : index
    %63 = memref.load %arg7[%c4_34] : memref<81xf32, #tpu.memory_space<smem>>
    %64 = vector.broadcast %63 : f32 to vector<16x16xf32>
    %65 = arith.mulf %64, %50 : vector<16x16xf32>
    %66 = arith.addf %62, %65 : vector<16x16xf32>
    %c5 = arith.constant 5 : index
    %67 = memref.load %arg6[%c5] : memref<81xf32, #tpu.memory_space<smem>>
    %68 = vector.broadcast %67 : f32 to vector<16x16xf32>
    %69 = arith.mulf %68, %48 : vector<16x16xf32>
    %70 = arith.addf %46, %69 : vector<16x16xf32>
    %c5_35 = arith.constant 5 : index
    %71 = memref.load %arg7[%c5_35] : memref<81xf32, #tpu.memory_space<smem>>
    %72 = vector.broadcast %71 : f32 to vector<16x16xf32>
    %73 = arith.mulf %72, %50 : vector<16x16xf32>
    %74 = arith.addf %70, %73 : vector<16x16xf32>
    %c0_36 = arith.constant 0 : index
    %c2_37 = arith.constant 2 : index
    %c0_38 = arith.constant 0 : index
    %c0_39 = arith.constant 0 : index
    %75 = vector.load %arg2[%c0_36, %c2_37, %c0_38, %c0_39] : memref<1x3x18x18xf32, #tpu.memory_space<vmem>>, vector<1x1x16x16xf32>
    %76 = vector.shape_cast %75 : vector<1x1x16x16xf32> to vector<16x16xf32>
    %c2_40 = arith.constant 2 : index
    %c0_41 = arith.constant 0 : index
    %c0_42 = arith.constant 0 : index
    %77 = vector.load %arg11[%c2_40, %c0_41, %c0_42] : memref<3x18x18xf32, #tpu.memory_space<vmem>>, vector<1x16x16xf32>
    %78 = vector.shape_cast %77 : vector<1x16x16xf32> to vector<16x16xf32>
    %c6 = arith.constant 6 : index
    %79 = memref.load %arg6[%c6] : memref<81xf32, #tpu.memory_space<smem>>
    %80 = vector.broadcast %79 : f32 to vector<16x16xf32>
    %81 = arith.mulf %80, %76 : vector<16x16xf32>
    %82 = arith.addf %58, %81 : vector<16x16xf32>
    %c6_43 = arith.constant 6 : index
    %83 = memref.load %arg7[%c6_43] : memref<81xf32, #tpu.memory_space<smem>>
    %84 = vector.broadcast %83 : f32 to vector<16x16xf32>
    %85 = arith.mulf %84, %78 : vector<16x16xf32>
    %86 = arith.addf %82, %85 : vector<16x16xf32>
    %c7 = arith.constant 7 : index
    %87 = memref.load %arg6[%c7] : memref<81xf32, #tpu.memory_space<smem>>
    %88 = vector.broadcast %87 : f32 to vector<16x16xf32>
    %89 = arith.mulf %88, %76 : vector<16x16xf32>
    %90 = arith.addf %66, %89 : vector<16x16xf32>
    %c7_44 = arith.constant 7 : index
    %91 = memref.load %arg7[%c7_44] : memref<81xf32, #tpu.memory_space<smem>>
    %92 = vector.broadcast %91 : f32 to vector<16x16xf32>
    %93 = arith.mulf %92, %78 : vector<16x16xf32>
    %94 = arith.addf %90, %93 : vector<16x16xf32>
    %c8 = arith.constant 8 : index
    %95 = memref.load %arg6[%c8] : memref<81xf32, #tpu.memory_space<smem>>
    %96 = vector.broadcast %95 : f32 to vector<16x16xf32>
    %97 = arith.mulf %96, %76 : vector<16x16xf32>
    %98 = arith.addf %74, %97 : vector<16x16xf32>
    %c8_45 = arith.constant 8 : index
    %99 = memref.load %arg7[%c8_45] : memref<81xf32, #tpu.memory_space<smem>>
    %100 = vector.broadcast %99 : f32 to vector<16x16xf32>
    %101 = arith.mulf %100, %78 : vector<16x16xf32>
    %102 = arith.addf %98, %101 : vector<16x16xf32>
    %c0_46 = arith.constant 0 : index
    %c0_47 = arith.constant 0 : index
    %c0_48 = arith.constant 0 : index
    %c1_49 = arith.constant 1 : index
    %103 = vector.load %arg2[%c0_46, %c0_47, %c0_48, %c1_49] : memref<1x3x18x18xf32, #tpu.memory_space<vmem>>, vector<1x1x16x16xf32>
    %104 = vector.shape_cast %103 : vector<1x1x16x16xf32> to vector<16x16xf32>
    %c0_50 = arith.constant 0 : index
    %c0_51 = arith.constant 0 : index
    %c1_52 = arith.constant 1 : index
    %105 = vector.load %arg11[%c0_50, %c0_51, %c1_52] : memref<3x18x18xf32, #tpu.memory_space<vmem>>, vector<1x16x16xf32>
    %106 = vector.shape_cast %105 : vector<1x16x16xf32> to vector<16x16xf32>
    %c9 = arith.constant 9 : index
    %107 = memref.load %arg6[%c9] : memref<81xf32, #tpu.memory_space<smem>>
    %108 = vector.broadcast %107 : f32 to vector<16x16xf32>
    %109 = arith.mulf %108, %104 : vector<16x16xf32>
    %110 = arith.addf %86, %109 : vector<16x16xf32>
    %c9_53 = arith.constant 9 : index
    %111 = memref.load %arg7[%c9_53] : memref<81xf32, #tpu.memory_space<smem>>
    %112 = vector.broadcast %111 : f32 to vector<16x16xf32>
    %113 = arith.mulf %112, %106 : vector<16x16xf32>
    %114 = arith.addf %110, %113 : vector<16x16xf32>
    %c10 = arith.constant 10 : index
    %115 = memref.load %arg6[%c10] : memref<81xf32, #tpu.memory_space<smem>>
    %116 = vector.broadcast %115 : f32 to vector<16x16xf32>
    %117 = arith.mulf %116, %104 : vector<16x16xf32>
    %118 = arith.addf %94, %117 : vector<16x16xf32>
    %c10_54 = arith.constant 10 : index
    %119 = memref.load %arg7[%c10_54] : memref<81xf32, #tpu.memory_space<smem>>
    %120 = vector.broadcast %119 : f32 to vector<16x16xf32>
    %121 = arith.mulf %120, %106 : vector<16x16xf32>
    %122 = arith.addf %118, %121 : vector<16x16xf32>
    %c11 = arith.constant 11 : index
    %123 = memref.load %arg6[%c11] : memref<81xf32, #tpu.memory_space<smem>>
    %124 = vector.broadcast %123 : f32 to vector<16x16xf32>
    %125 = arith.mulf %124, %104 : vector<16x16xf32>
    %126 = arith.addf %102, %125 : vector<16x16xf32>
    %c11_55 = arith.constant 11 : index
    %127 = memref.load %arg7[%c11_55] : memref<81xf32, #tpu.memory_space<smem>>
    %128 = vector.broadcast %127 : f32 to vector<16x16xf32>
    %129 = arith.mulf %128, %106 : vector<16x16xf32>
    %130 = arith.addf %126, %129 : vector<16x16xf32>
    %c0_56 = arith.constant 0 : index
    %c1_57 = arith.constant 1 : index
    %c0_58 = arith.constant 0 : index
    %c1_59 = arith.constant 1 : index
    %131 = vector.load %arg2[%c0_56, %c1_57, %c0_58, %c1_59] : memref<1x3x18x18xf32, #tpu.memory_space<vmem>>, vector<1x1x16x16xf32>
    %132 = vector.shape_cast %131 : vector<1x1x16x16xf32> to vector<16x16xf32>
    %c1_60 = arith.constant 1 : index
    %c0_61 = arith.constant 0 : index
    %c1_62 = arith.constant 1 : index
    %133 = vector.load %arg11[%c1_60, %c0_61, %c1_62] : memref<3x18x18xf32, #tpu.memory_space<vmem>>, vector<1x16x16xf32>
    %134 = vector.shape_cast %133 : vector<1x16x16xf32> to vector<16x16xf32>
    %c12 = arith.constant 12 : index
    %135 = memref.load %arg6[%c12] : memref<81xf32, #tpu.memory_space<smem>>
    %136 = vector.broadcast %135 : f32 to vector<16x16xf32>
    %137 = arith.mulf %136, %132 : vector<16x16xf32>
    %138 = arith.addf %114, %137 : vector<16x16xf32>
    %c12_63 = arith.constant 12 : index
    %139 = memref.load %arg7[%c12_63] : memref<81xf32, #tpu.memory_space<smem>>
    %140 = vector.broadcast %139 : f32 to vector<16x16xf32>
    %141 = arith.mulf %140, %134 : vector<16x16xf32>
    %142 = arith.addf %138, %141 : vector<16x16xf32>
    %c13 = arith.constant 13 : index
    %143 = memref.load %arg6[%c13] : memref<81xf32, #tpu.memory_space<smem>>
    %144 = vector.broadcast %143 : f32 to vector<16x16xf32>
    %145 = arith.mulf %144, %132 : vector<16x16xf32>
    %146 = arith.addf %122, %145 : vector<16x16xf32>
    %c13_64 = arith.constant 13 : index
    %147 = memref.load %arg7[%c13_64] : memref<81xf32, #tpu.memory_space<smem>>
    %148 = vector.broadcast %147 : f32 to vector<16x16xf32>
    %149 = arith.mulf %148, %134 : vector<16x16xf32>
    %150 = arith.addf %146, %149 : vector<16x16xf32>
    %c14 = arith.constant 14 : index
    %151 = memref.load %arg6[%c14] : memref<81xf32, #tpu.memory_space<smem>>
    %152 = vector.broadcast %151 : f32 to vector<16x16xf32>
    %153 = arith.mulf %152, %132 : vector<16x16xf32>
    %154 = arith.addf %130, %153 : vector<16x16xf32>
    %c14_65 = arith.constant 14 : index
    %155 = memref.load %arg7[%c14_65] : memref<81xf32, #tpu.memory_space<smem>>
    %156 = vector.broadcast %155 : f32 to vector<16x16xf32>
    %157 = arith.mulf %156, %134 : vector<16x16xf32>
    %158 = arith.addf %154, %157 : vector<16x16xf32>
    %c0_66 = arith.constant 0 : index
    %c2_67 = arith.constant 2 : index
    %c0_68 = arith.constant 0 : index
    %c1_69 = arith.constant 1 : index
    %159 = vector.load %arg2[%c0_66, %c2_67, %c0_68, %c1_69] : memref<1x3x18x18xf32, #tpu.memory_space<vmem>>, vector<1x1x16x16xf32>
    %160 = vector.shape_cast %159 : vector<1x1x16x16xf32> to vector<16x16xf32>
    %c2_70 = arith.constant 2 : index
    %c0_71 = arith.constant 0 : index
    %c1_72 = arith.constant 1 : index
    %161 = vector.load %arg11[%c2_70, %c0_71, %c1_72] : memref<3x18x18xf32, #tpu.memory_space<vmem>>, vector<1x16x16xf32>
    %162 = vector.shape_cast %161 : vector<1x16x16xf32> to vector<16x16xf32>
    %c15 = arith.constant 15 : index
    %163 = memref.load %arg6[%c15] : memref<81xf32, #tpu.memory_space<smem>>
    %164 = vector.broadcast %163 : f32 to vector<16x16xf32>
    %165 = arith.mulf %164, %160 : vector<16x16xf32>
    %166 = arith.addf %142, %165 : vector<16x16xf32>
    %c15_73 = arith.constant 15 : index
    %167 = memref.load %arg7[%c15_73] : memref<81xf32, #tpu.memory_space<smem>>
    %168 = vector.broadcast %167 : f32 to vector<16x16xf32>
    %169 = arith.mulf %168, %162 : vector<16x16xf32>
    %170 = arith.addf %166, %169 : vector<16x16xf32>
    %c16 = arith.constant 16 : index
    %171 = memref.load %arg6[%c16] : memref<81xf32, #tpu.memory_space<smem>>
    %172 = vector.broadcast %171 : f32 to vector<16x16xf32>
    %173 = arith.mulf %172, %160 : vector<16x16xf32>
    %174 = arith.addf %150, %173 : vector<16x16xf32>
    %c16_74 = arith.constant 16 : index
    %175 = memref.load %arg7[%c16_74] : memref<81xf32, #tpu.memory_space<smem>>
    %176 = vector.broadcast %175 : f32 to vector<16x16xf32>
    %177 = arith.mulf %176, %162 : vector<16x16xf32>
    %178 = arith.addf %174, %177 : vector<16x16xf32>
    %c17 = arith.constant 17 : index
    %179 = memref.load %arg6[%c17] : memref<81xf32, #tpu.memory_space<smem>>
    %180 = vector.broadcast %179 : f32 to vector<16x16xf32>
    %181 = arith.mulf %180, %160 : vector<16x16xf32>
    %182 = arith.addf %158, %181 : vector<16x16xf32>
    %c17_75 = arith.constant 17 : index
    %183 = memref.load %arg7[%c17_75] : memref<81xf32, #tpu.memory_space<smem>>
    %184 = vector.broadcast %183 : f32 to vector<16x16xf32>
    %185 = arith.mulf %184, %162 : vector<16x16xf32>
    %186 = arith.addf %182, %185 : vector<16x16xf32>
    %c0_76 = arith.constant 0 : index
    %c0_77 = arith.constant 0 : index
    %c0_78 = arith.constant 0 : index
    %c2_79 = arith.constant 2 : index
    %187 = vector.load %arg2[%c0_76, %c0_77, %c0_78, %c2_79] : memref<1x3x18x18xf32, #tpu.memory_space<vmem>>, vector<1x1x16x16xf32>
    %188 = vector.shape_cast %187 : vector<1x1x16x16xf32> to vector<16x16xf32>
    %c0_80 = arith.constant 0 : index
    %c0_81 = arith.constant 0 : index
    %c2_82 = arith.constant 2 : index
    %189 = vector.load %arg11[%c0_80, %c0_81, %c2_82] : memref<3x18x18xf32, #tpu.memory_space<vmem>>, vector<1x16x16xf32>
    %190 = vector.shape_cast %189 : vector<1x16x16xf32> to vector<16x16xf32>
    %c18 = arith.constant 18 : index
    %191 = memref.load %arg6[%c18] : memref<81xf32, #tpu.memory_space<smem>>
    %192 = vector.broadcast %191 : f32 to vector<16x16xf32>
    %193 = arith.mulf %192, %188 : vector<16x16xf32>
    %194 = arith.addf %170, %193 : vector<16x16xf32>
    %c18_83 = arith.constant 18 : index
    %195 = memref.load %arg7[%c18_83] : memref<81xf32, #tpu.memory_space<smem>>
    %196 = vector.broadcast %195 : f32 to vector<16x16xf32>
    %197 = arith.mulf %196, %190 : vector<16x16xf32>
    %198 = arith.addf %194, %197 : vector<16x16xf32>
    %c19 = arith.constant 19 : index
    %199 = memref.load %arg6[%c19] : memref<81xf32, #tpu.memory_space<smem>>
    %200 = vector.broadcast %199 : f32 to vector<16x16xf32>
    %201 = arith.mulf %200, %188 : vector<16x16xf32>
    %202 = arith.addf %178, %201 : vector<16x16xf32>
    %c19_84 = arith.constant 19 : index
    %203 = memref.load %arg7[%c19_84] : memref<81xf32, #tpu.memory_space<smem>>
    %204 = vector.broadcast %203 : f32 to vector<16x16xf32>
    %205 = arith.mulf %204, %190 : vector<16x16xf32>
    %206 = arith.addf %202, %205 : vector<16x16xf32>
    %c20 = arith.constant 20 : index
    %207 = memref.load %arg6[%c20] : memref<81xf32, #tpu.memory_space<smem>>
    %208 = vector.broadcast %207 : f32 to vector<16x16xf32>
    %209 = arith.mulf %208, %188 : vector<16x16xf32>
    %210 = arith.addf %186, %209 : vector<16x16xf32>
    %c20_85 = arith.constant 20 : index
    %211 = memref.load %arg7[%c20_85] : memref<81xf32, #tpu.memory_space<smem>>
    %212 = vector.broadcast %211 : f32 to vector<16x16xf32>
    %213 = arith.mulf %212, %190 : vector<16x16xf32>
    %214 = arith.addf %210, %213 : vector<16x16xf32>
    %c0_86 = arith.constant 0 : index
    %c1_87 = arith.constant 1 : index
    %c0_88 = arith.constant 0 : index
    %c2_89 = arith.constant 2 : index
    %215 = vector.load %arg2[%c0_86, %c1_87, %c0_88, %c2_89] : memref<1x3x18x18xf32, #tpu.memory_space<vmem>>, vector<1x1x16x16xf32>
    %216 = vector.shape_cast %215 : vector<1x1x16x16xf32> to vector<16x16xf32>
    %c1_90 = arith.constant 1 : index
    %c0_91 = arith.constant 0 : index
    %c2_92 = arith.constant 2 : index
    %217 = vector.load %arg11[%c1_90, %c0_91, %c2_92] : memref<3x18x18xf32, #tpu.memory_space<vmem>>, vector<1x16x16xf32>
    %218 = vector.shape_cast %217 : vector<1x16x16xf32> to vector<16x16xf32>
    %c21 = arith.constant 21 : index
    %219 = memref.load %arg6[%c21] : memref<81xf32, #tpu.memory_space<smem>>
    %220 = vector.broadcast %219 : f32 to vector<16x16xf32>
    %221 = arith.mulf %220, %216 : vector<16x16xf32>
    %222 = arith.addf %198, %221 : vector<16x16xf32>
    %c21_93 = arith.constant 21 : index
    %223 = memref.load %arg7[%c21_93] : memref<81xf32, #tpu.memory_space<smem>>
    %224 = vector.broadcast %223 : f32 to vector<16x16xf32>
    %225 = arith.mulf %224, %218 : vector<16x16xf32>
    %226 = arith.addf %222, %225 : vector<16x16xf32>
    %c22 = arith.constant 22 : index
    %227 = memref.load %arg6[%c22] : memref<81xf32, #tpu.memory_space<smem>>
    %228 = vector.broadcast %227 : f32 to vector<16x16xf32>
    %229 = arith.mulf %228, %216 : vector<16x16xf32>
    %230 = arith.addf %206, %229 : vector<16x16xf32>
    %c22_94 = arith.constant 22 : index
    %231 = memref.load %arg7[%c22_94] : memref<81xf32, #tpu.memory_space<smem>>
    %232 = vector.broadcast %231 : f32 to vector<16x16xf32>
    %233 = arith.mulf %232, %218 : vector<16x16xf32>
    %234 = arith.addf %230, %233 : vector<16x16xf32>
    %c23 = arith.constant 23 : index
    %235 = memref.load %arg6[%c23] : memref<81xf32, #tpu.memory_space<smem>>
    %236 = vector.broadcast %235 : f32 to vector<16x16xf32>
    %237 = arith.mulf %236, %216 : vector<16x16xf32>
    %238 = arith.addf %214, %237 : vector<16x16xf32>
    %c23_95 = arith.constant 23 : index
    %239 = memref.load %arg7[%c23_95] : memref<81xf32, #tpu.memory_space<smem>>
    %240 = vector.broadcast %239 : f32 to vector<16x16xf32>
    %241 = arith.mulf %240, %218 : vector<16x16xf32>
    %242 = arith.addf %238, %241 : vector<16x16xf32>
    %c0_96 = arith.constant 0 : index
    %c2_97 = arith.constant 2 : index
    %c0_98 = arith.constant 0 : index
    %c2_99 = arith.constant 2 : index
    %243 = vector.load %arg2[%c0_96, %c2_97, %c0_98, %c2_99] : memref<1x3x18x18xf32, #tpu.memory_space<vmem>>, vector<1x1x16x16xf32>
    %244 = vector.shape_cast %243 : vector<1x1x16x16xf32> to vector<16x16xf32>
    %c2_100 = arith.constant 2 : index
    %c0_101 = arith.constant 0 : index
    %c2_102 = arith.constant 2 : index
    %245 = vector.load %arg11[%c2_100, %c0_101, %c2_102] : memref<3x18x18xf32, #tpu.memory_space<vmem>>, vector<1x16x16xf32>
    %246 = vector.shape_cast %245 : vector<1x16x16xf32> to vector<16x16xf32>
    %c24 = arith.constant 24 : index
    %247 = memref.load %arg6[%c24] : memref<81xf32, #tpu.memory_space<smem>>
    %248 = vector.broadcast %247 : f32 to vector<16x16xf32>
    %249 = arith.mulf %248, %244 : vector<16x16xf32>
    %250 = arith.addf %226, %249 : vector<16x16xf32>
    %c24_103 = arith.constant 24 : index
    %251 = memref.load %arg7[%c24_103] : memref<81xf32, #tpu.memory_space<smem>>
    %252 = vector.broadcast %251 : f32 to vector<16x16xf32>
    %253 = arith.mulf %252, %246 : vector<16x16xf32>
    %254 = arith.addf %250, %253 : vector<16x16xf32>
    %c25 = arith.constant 25 : index
    %255 = memref.load %arg6[%c25] : memref<81xf32, #tpu.memory_space<smem>>
    %256 = vector.broadcast %255 : f32 to vector<16x16xf32>
    %257 = arith.mulf %256, %244 : vector<16x16xf32>
    %258 = arith.addf %234, %257 : vector<16x16xf32>
    %c25_104 = arith.constant 25 : index
    %259 = memref.load %arg7[%c25_104] : memref<81xf32, #tpu.memory_space<smem>>
    %260 = vector.broadcast %259 : f32 to vector<16x16xf32>
    %261 = arith.mulf %260, %246 : vector<16x16xf32>
    %262 = arith.addf %258, %261 : vector<16x16xf32>
    %c26 = arith.constant 26 : index
    %263 = memref.load %arg6[%c26] : memref<81xf32, #tpu.memory_space<smem>>
    %264 = vector.broadcast %263 : f32 to vector<16x16xf32>
    %265 = arith.mulf %264, %244 : vector<16x16xf32>
    %266 = arith.addf %242, %265 : vector<16x16xf32>
    %c26_105 = arith.constant 26 : index
    %267 = memref.load %arg7[%c26_105] : memref<81xf32, #tpu.memory_space<smem>>
    %268 = vector.broadcast %267 : f32 to vector<16x16xf32>
    %269 = arith.mulf %268, %246 : vector<16x16xf32>
    %270 = arith.addf %266, %269 : vector<16x16xf32>
    %c0_106 = arith.constant 0 : index
    %c0_107 = arith.constant 0 : index
    %c1_108 = arith.constant 1 : index
    %c0_109 = arith.constant 0 : index
    %271 = vector.load %arg2[%c0_106, %c0_107, %c1_108, %c0_109] : memref<1x3x18x18xf32, #tpu.memory_space<vmem>>, vector<1x1x16x16xf32>
    %272 = vector.shape_cast %271 : vector<1x1x16x16xf32> to vector<16x16xf32>
    %c0_110 = arith.constant 0 : index
    %c1_111 = arith.constant 1 : index
    %c0_112 = arith.constant 0 : index
    %273 = vector.load %arg11[%c0_110, %c1_111, %c0_112] : memref<3x18x18xf32, #tpu.memory_space<vmem>>, vector<1x16x16xf32>
    %274 = vector.shape_cast %273 : vector<1x16x16xf32> to vector<16x16xf32>
    %c27 = arith.constant 27 : index
    %275 = memref.load %arg6[%c27] : memref<81xf32, #tpu.memory_space<smem>>
    %276 = vector.broadcast %275 : f32 to vector<16x16xf32>
    %277 = arith.mulf %276, %272 : vector<16x16xf32>
    %278 = arith.addf %254, %277 : vector<16x16xf32>
    %c27_113 = arith.constant 27 : index
    %279 = memref.load %arg7[%c27_113] : memref<81xf32, #tpu.memory_space<smem>>
    %280 = vector.broadcast %279 : f32 to vector<16x16xf32>
    %281 = arith.mulf %280, %274 : vector<16x16xf32>
    %282 = arith.addf %278, %281 : vector<16x16xf32>
    %c28 = arith.constant 28 : index
    %283 = memref.load %arg6[%c28] : memref<81xf32, #tpu.memory_space<smem>>
    %284 = vector.broadcast %283 : f32 to vector<16x16xf32>
    %285 = arith.mulf %284, %272 : vector<16x16xf32>
    %286 = arith.addf %262, %285 : vector<16x16xf32>
    %c28_114 = arith.constant 28 : index
    %287 = memref.load %arg7[%c28_114] : memref<81xf32, #tpu.memory_space<smem>>
    %288 = vector.broadcast %287 : f32 to vector<16x16xf32>
    %289 = arith.mulf %288, %274 : vector<16x16xf32>
    %290 = arith.addf %286, %289 : vector<16x16xf32>
    %c29 = arith.constant 29 : index
    %291 = memref.load %arg6[%c29] : memref<81xf32, #tpu.memory_space<smem>>
    %292 = vector.broadcast %291 : f32 to vector<16x16xf32>
    %293 = arith.mulf %292, %272 : vector<16x16xf32>
    %294 = arith.addf %270, %293 : vector<16x16xf32>
    %c29_115 = arith.constant 29 : index
    %295 = memref.load %arg7[%c29_115] : memref<81xf32, #tpu.memory_space<smem>>
    %296 = vector.broadcast %295 : f32 to vector<16x16xf32>
    %297 = arith.mulf %296, %274 : vector<16x16xf32>
    %298 = arith.addf %294, %297 : vector<16x16xf32>
    %c0_116 = arith.constant 0 : index
    %c1_117 = arith.constant 1 : index
    %c1_118 = arith.constant 1 : index
    %c0_119 = arith.constant 0 : index
    %299 = vector.load %arg2[%c0_116, %c1_117, %c1_118, %c0_119] : memref<1x3x18x18xf32, #tpu.memory_space<vmem>>, vector<1x1x16x16xf32>
    %300 = vector.shape_cast %299 : vector<1x1x16x16xf32> to vector<16x16xf32>
    %c1_120 = arith.constant 1 : index
    %c1_121 = arith.constant 1 : index
    %c0_122 = arith.constant 0 : index
    %301 = vector.load %arg11[%c1_120, %c1_121, %c0_122] : memref<3x18x18xf32, #tpu.memory_space<vmem>>, vector<1x16x16xf32>
    %302 = vector.shape_cast %301 : vector<1x16x16xf32> to vector<16x16xf32>
    %c30 = arith.constant 30 : index
    %303 = memref.load %arg6[%c30] : memref<81xf32, #tpu.memory_space<smem>>
    %304 = vector.broadcast %303 : f32 to vector<16x16xf32>
    %305 = arith.mulf %304, %300 : vector<16x16xf32>
    %306 = arith.addf %282, %305 : vector<16x16xf32>
    %c30_123 = arith.constant 30 : index
    %307 = memref.load %arg7[%c30_123] : memref<81xf32, #tpu.memory_space<smem>>
    %308 = vector.broadcast %307 : f32 to vector<16x16xf32>
    %309 = arith.mulf %308, %302 : vector<16x16xf32>
    %310 = arith.addf %306, %309 : vector<16x16xf32>
    %c31 = arith.constant 31 : index
    %311 = memref.load %arg6[%c31] : memref<81xf32, #tpu.memory_space<smem>>
    %312 = vector.broadcast %311 : f32 to vector<16x16xf32>
    %313 = arith.mulf %312, %300 : vector<16x16xf32>
    %314 = arith.addf %290, %313 : vector<16x16xf32>
    %c31_124 = arith.constant 31 : index
    %315 = memref.load %arg7[%c31_124] : memref<81xf32, #tpu.memory_space<smem>>
    %316 = vector.broadcast %315 : f32 to vector<16x16xf32>
    %317 = arith.mulf %316, %302 : vector<16x16xf32>
    %318 = arith.addf %314, %317 : vector<16x16xf32>
    %c32 = arith.constant 32 : index
    %319 = memref.load %arg6[%c32] : memref<81xf32, #tpu.memory_space<smem>>
    %320 = vector.broadcast %319 : f32 to vector<16x16xf32>
    %321 = arith.mulf %320, %300 : vector<16x16xf32>
    %322 = arith.addf %298, %321 : vector<16x16xf32>
    %c32_125 = arith.constant 32 : index
    %323 = memref.load %arg7[%c32_125] : memref<81xf32, #tpu.memory_space<smem>>
    %324 = vector.broadcast %323 : f32 to vector<16x16xf32>
    %325 = arith.mulf %324, %302 : vector<16x16xf32>
    %326 = arith.addf %322, %325 : vector<16x16xf32>
    %c0_126 = arith.constant 0 : index
    %c2_127 = arith.constant 2 : index
    %c1_128 = arith.constant 1 : index
    %c0_129 = arith.constant 0 : index
    %327 = vector.load %arg2[%c0_126, %c2_127, %c1_128, %c0_129] : memref<1x3x18x18xf32, #tpu.memory_space<vmem>>, vector<1x1x16x16xf32>
    %328 = vector.shape_cast %327 : vector<1x1x16x16xf32> to vector<16x16xf32>
    %c2_130 = arith.constant 2 : index
    %c1_131 = arith.constant 1 : index
    %c0_132 = arith.constant 0 : index
    %329 = vector.load %arg11[%c2_130, %c1_131, %c0_132] : memref<3x18x18xf32, #tpu.memory_space<vmem>>, vector<1x16x16xf32>
    %330 = vector.shape_cast %329 : vector<1x16x16xf32> to vector<16x16xf32>
    %c33 = arith.constant 33 : index
    %331 = memref.load %arg6[%c33] : memref<81xf32, #tpu.memory_space<smem>>
    %332 = vector.broadcast %331 : f32 to vector<16x16xf32>
    %333 = arith.mulf %332, %328 : vector<16x16xf32>
    %334 = arith.addf %310, %333 : vector<16x16xf32>
    %c33_133 = arith.constant 33 : index
    %335 = memref.load %arg7[%c33_133] : memref<81xf32, #tpu.memory_space<smem>>
    %336 = vector.broadcast %335 : f32 to vector<16x16xf32>
    %337 = arith.mulf %336, %330 : vector<16x16xf32>
    %338 = arith.addf %334, %337 : vector<16x16xf32>
    %c34 = arith.constant 34 : index
    %339 = memref.load %arg6[%c34] : memref<81xf32, #tpu.memory_space<smem>>
    %340 = vector.broadcast %339 : f32 to vector<16x16xf32>
    %341 = arith.mulf %340, %328 : vector<16x16xf32>
    %342 = arith.addf %318, %341 : vector<16x16xf32>
    %c34_134 = arith.constant 34 : index
    %343 = memref.load %arg7[%c34_134] : memref<81xf32, #tpu.memory_space<smem>>
    %344 = vector.broadcast %343 : f32 to vector<16x16xf32>
    %345 = arith.mulf %344, %330 : vector<16x16xf32>
    %346 = arith.addf %342, %345 : vector<16x16xf32>
    %c35 = arith.constant 35 : index
    %347 = memref.load %arg6[%c35] : memref<81xf32, #tpu.memory_space<smem>>
    %348 = vector.broadcast %347 : f32 to vector<16x16xf32>
    %349 = arith.mulf %348, %328 : vector<16x16xf32>
    %350 = arith.addf %326, %349 : vector<16x16xf32>
    %c35_135 = arith.constant 35 : index
    %351 = memref.load %arg7[%c35_135] : memref<81xf32, #tpu.memory_space<smem>>
    %352 = vector.broadcast %351 : f32 to vector<16x16xf32>
    %353 = arith.mulf %352, %330 : vector<16x16xf32>
    %354 = arith.addf %350, %353 : vector<16x16xf32>
    %c0_136 = arith.constant 0 : index
    %c0_137 = arith.constant 0 : index
    %c1_138 = arith.constant 1 : index
    %c1_139 = arith.constant 1 : index
    %355 = vector.load %arg2[%c0_136, %c0_137, %c1_138, %c1_139] : memref<1x3x18x18xf32, #tpu.memory_space<vmem>>, vector<1x1x16x16xf32>
    %356 = vector.shape_cast %355 : vector<1x1x16x16xf32> to vector<16x16xf32>
    %c0_140 = arith.constant 0 : index
    %c1_141 = arith.constant 1 : index
    %c1_142 = arith.constant 1 : index
    %357 = vector.load %arg11[%c0_140, %c1_141, %c1_142] : memref<3x18x18xf32, #tpu.memory_space<vmem>>, vector<1x16x16xf32>
    %358 = vector.shape_cast %357 : vector<1x16x16xf32> to vector<16x16xf32>
    %c36 = arith.constant 36 : index
    %359 = memref.load %arg6[%c36] : memref<81xf32, #tpu.memory_space<smem>>
    %360 = vector.broadcast %359 : f32 to vector<16x16xf32>
    %361 = arith.mulf %360, %356 : vector<16x16xf32>
    %362 = arith.addf %338, %361 : vector<16x16xf32>
    %c36_143 = arith.constant 36 : index
    %363 = memref.load %arg7[%c36_143] : memref<81xf32, #tpu.memory_space<smem>>
    %364 = vector.broadcast %363 : f32 to vector<16x16xf32>
    %365 = arith.mulf %364, %358 : vector<16x16xf32>
    %366 = arith.addf %362, %365 : vector<16x16xf32>
    %c37 = arith.constant 37 : index
    %367 = memref.load %arg6[%c37] : memref<81xf32, #tpu.memory_space<smem>>
    %368 = vector.broadcast %367 : f32 to vector<16x16xf32>
    %369 = arith.mulf %368, %356 : vector<16x16xf32>
    %370 = arith.addf %346, %369 : vector<16x16xf32>
    %c37_144 = arith.constant 37 : index
    %371 = memref.load %arg7[%c37_144] : memref<81xf32, #tpu.memory_space<smem>>
    %372 = vector.broadcast %371 : f32 to vector<16x16xf32>
    %373 = arith.mulf %372, %358 : vector<16x16xf32>
    %374 = arith.addf %370, %373 : vector<16x16xf32>
    %c38 = arith.constant 38 : index
    %375 = memref.load %arg6[%c38] : memref<81xf32, #tpu.memory_space<smem>>
    %376 = vector.broadcast %375 : f32 to vector<16x16xf32>
    %377 = arith.mulf %376, %356 : vector<16x16xf32>
    %378 = arith.addf %354, %377 : vector<16x16xf32>
    %c38_145 = arith.constant 38 : index
    %379 = memref.load %arg7[%c38_145] : memref<81xf32, #tpu.memory_space<smem>>
    %380 = vector.broadcast %379 : f32 to vector<16x16xf32>
    %381 = arith.mulf %380, %358 : vector<16x16xf32>
    %382 = arith.addf %378, %381 : vector<16x16xf32>
    %c0_146 = arith.constant 0 : index
    %c1_147 = arith.constant 1 : index
    %c1_148 = arith.constant 1 : index
    %c1_149 = arith.constant 1 : index
    %383 = vector.load %arg2[%c0_146, %c1_147, %c1_148, %c1_149] : memref<1x3x18x18xf32, #tpu.memory_space<vmem>>, vector<1x1x16x16xf32>
    %384 = vector.shape_cast %383 : vector<1x1x16x16xf32> to vector<16x16xf32>
    %c1_150 = arith.constant 1 : index
    %c1_151 = arith.constant 1 : index
    %c1_152 = arith.constant 1 : index
    %385 = vector.load %arg11[%c1_150, %c1_151, %c1_152] : memref<3x18x18xf32, #tpu.memory_space<vmem>>, vector<1x16x16xf32>
    %386 = vector.shape_cast %385 : vector<1x16x16xf32> to vector<16x16xf32>
    %c39 = arith.constant 39 : index
    %387 = memref.load %arg6[%c39] : memref<81xf32, #tpu.memory_space<smem>>
    %388 = vector.broadcast %387 : f32 to vector<16x16xf32>
    %389 = arith.mulf %388, %384 : vector<16x16xf32>
    %390 = arith.addf %366, %389 : vector<16x16xf32>
    %c39_153 = arith.constant 39 : index
    %391 = memref.load %arg7[%c39_153] : memref<81xf32, #tpu.memory_space<smem>>
    %392 = vector.broadcast %391 : f32 to vector<16x16xf32>
    %393 = arith.mulf %392, %386 : vector<16x16xf32>
    %394 = arith.addf %390, %393 : vector<16x16xf32>
    %c40 = arith.constant 40 : index
    %395 = memref.load %arg6[%c40] : memref<81xf32, #tpu.memory_space<smem>>
    %396 = vector.broadcast %395 : f32 to vector<16x16xf32>
    %397 = arith.mulf %396, %384 : vector<16x16xf32>
    %398 = arith.addf %374, %397 : vector<16x16xf32>
    %c40_154 = arith.constant 40 : index
    %399 = memref.load %arg7[%c40_154] : memref<81xf32, #tpu.memory_space<smem>>
    %400 = vector.broadcast %399 : f32 to vector<16x16xf32>
    %401 = arith.mulf %400, %386 : vector<16x16xf32>
    %402 = arith.addf %398, %401 : vector<16x16xf32>
    %c41 = arith.constant 41 : index
    %403 = memref.load %arg6[%c41] : memref<81xf32, #tpu.memory_space<smem>>
    %404 = vector.broadcast %403 : f32 to vector<16x16xf32>
    %405 = arith.mulf %404, %384 : vector<16x16xf32>
    %406 = arith.addf %382, %405 : vector<16x16xf32>
    %c41_155 = arith.constant 41 : index
    %407 = memref.load %arg7[%c41_155] : memref<81xf32, #tpu.memory_space<smem>>
    %408 = vector.broadcast %407 : f32 to vector<16x16xf32>
    %409 = arith.mulf %408, %386 : vector<16x16xf32>
    %410 = arith.addf %406, %409 : vector<16x16xf32>
    %c0_156 = arith.constant 0 : index
    %c2_157 = arith.constant 2 : index
    %c1_158 = arith.constant 1 : index
    %c1_159 = arith.constant 1 : index
    %411 = vector.load %arg2[%c0_156, %c2_157, %c1_158, %c1_159] : memref<1x3x18x18xf32, #tpu.memory_space<vmem>>, vector<1x1x16x16xf32>
    %412 = vector.shape_cast %411 : vector<1x1x16x16xf32> to vector<16x16xf32>
    %c2_160 = arith.constant 2 : index
    %c1_161 = arith.constant 1 : index
    %c1_162 = arith.constant 1 : index
    %413 = vector.load %arg11[%c2_160, %c1_161, %c1_162] : memref<3x18x18xf32, #tpu.memory_space<vmem>>, vector<1x16x16xf32>
    %414 = vector.shape_cast %413 : vector<1x16x16xf32> to vector<16x16xf32>
    %c42 = arith.constant 42 : index
    %415 = memref.load %arg6[%c42] : memref<81xf32, #tpu.memory_space<smem>>
    %416 = vector.broadcast %415 : f32 to vector<16x16xf32>
    %417 = arith.mulf %416, %412 : vector<16x16xf32>
    %418 = arith.addf %394, %417 : vector<16x16xf32>
    %c42_163 = arith.constant 42 : index
    %419 = memref.load %arg7[%c42_163] : memref<81xf32, #tpu.memory_space<smem>>
    %420 = vector.broadcast %419 : f32 to vector<16x16xf32>
    %421 = arith.mulf %420, %414 : vector<16x16xf32>
    %422 = arith.addf %418, %421 : vector<16x16xf32>
    %c43 = arith.constant 43 : index
    %423 = memref.load %arg6[%c43] : memref<81xf32, #tpu.memory_space<smem>>
    %424 = vector.broadcast %423 : f32 to vector<16x16xf32>
    %425 = arith.mulf %424, %412 : vector<16x16xf32>
    %426 = arith.addf %402, %425 : vector<16x16xf32>
    %c43_164 = arith.constant 43 : index
    %427 = memref.load %arg7[%c43_164] : memref<81xf32, #tpu.memory_space<smem>>
    %428 = vector.broadcast %427 : f32 to vector<16x16xf32>
    %429 = arith.mulf %428, %414 : vector<16x16xf32>
    %430 = arith.addf %426, %429 : vector<16x16xf32>
    %c44 = arith.constant 44 : index
    %431 = memref.load %arg6[%c44] : memref<81xf32, #tpu.memory_space<smem>>
    %432 = vector.broadcast %431 : f32 to vector<16x16xf32>
    %433 = arith.mulf %432, %412 : vector<16x16xf32>
    %434 = arith.addf %410, %433 : vector<16x16xf32>
    %c44_165 = arith.constant 44 : index
    %435 = memref.load %arg7[%c44_165] : memref<81xf32, #tpu.memory_space<smem>>
    %436 = vector.broadcast %435 : f32 to vector<16x16xf32>
    %437 = arith.mulf %436, %414 : vector<16x16xf32>
    %438 = arith.addf %434, %437 : vector<16x16xf32>
    %c0_166 = arith.constant 0 : index
    %c0_167 = arith.constant 0 : index
    %c1_168 = arith.constant 1 : index
    %c2_169 = arith.constant 2 : index
    %439 = vector.load %arg2[%c0_166, %c0_167, %c1_168, %c2_169] : memref<1x3x18x18xf32, #tpu.memory_space<vmem>>, vector<1x1x16x16xf32>
    %440 = vector.shape_cast %439 : vector<1x1x16x16xf32> to vector<16x16xf32>
    %c0_170 = arith.constant 0 : index
    %c1_171 = arith.constant 1 : index
    %c2_172 = arith.constant 2 : index
    %441 = vector.load %arg11[%c0_170, %c1_171, %c2_172] : memref<3x18x18xf32, #tpu.memory_space<vmem>>, vector<1x16x16xf32>
    %442 = vector.shape_cast %441 : vector<1x16x16xf32> to vector<16x16xf32>
    %c45 = arith.constant 45 : index
    %443 = memref.load %arg6[%c45] : memref<81xf32, #tpu.memory_space<smem>>
    %444 = vector.broadcast %443 : f32 to vector<16x16xf32>
    %445 = arith.mulf %444, %440 : vector<16x16xf32>
    %446 = arith.addf %422, %445 : vector<16x16xf32>
    %c45_173 = arith.constant 45 : index
    %447 = memref.load %arg7[%c45_173] : memref<81xf32, #tpu.memory_space<smem>>
    %448 = vector.broadcast %447 : f32 to vector<16x16xf32>
    %449 = arith.mulf %448, %442 : vector<16x16xf32>
    %450 = arith.addf %446, %449 : vector<16x16xf32>
    %c46 = arith.constant 46 : index
    %451 = memref.load %arg6[%c46] : memref<81xf32, #tpu.memory_space<smem>>
    %452 = vector.broadcast %451 : f32 to vector<16x16xf32>
    %453 = arith.mulf %452, %440 : vector<16x16xf32>
    %454 = arith.addf %430, %453 : vector<16x16xf32>
    %c46_174 = arith.constant 46 : index
    %455 = memref.load %arg7[%c46_174] : memref<81xf32, #tpu.memory_space<smem>>
    %456 = vector.broadcast %455 : f32 to vector<16x16xf32>
    %457 = arith.mulf %456, %442 : vector<16x16xf32>
    %458 = arith.addf %454, %457 : vector<16x16xf32>
    %c47 = arith.constant 47 : index
    %459 = memref.load %arg6[%c47] : memref<81xf32, #tpu.memory_space<smem>>
    %460 = vector.broadcast %459 : f32 to vector<16x16xf32>
    %461 = arith.mulf %460, %440 : vector<16x16xf32>
    %462 = arith.addf %438, %461 : vector<16x16xf32>
    %c47_175 = arith.constant 47 : index
    %463 = memref.load %arg7[%c47_175] : memref<81xf32, #tpu.memory_space<smem>>
    %464 = vector.broadcast %463 : f32 to vector<16x16xf32>
    %465 = arith.mulf %464, %442 : vector<16x16xf32>
    %466 = arith.addf %462, %465 : vector<16x16xf32>
    %c0_176 = arith.constant 0 : index
    %c1_177 = arith.constant 1 : index
    %c1_178 = arith.constant 1 : index
    %c2_179 = arith.constant 2 : index
    %467 = vector.load %arg2[%c0_176, %c1_177, %c1_178, %c2_179] : memref<1x3x18x18xf32, #tpu.memory_space<vmem>>, vector<1x1x16x16xf32>
    %468 = vector.shape_cast %467 : vector<1x1x16x16xf32> to vector<16x16xf32>
    %c1_180 = arith.constant 1 : index
    %c1_181 = arith.constant 1 : index
    %c2_182 = arith.constant 2 : index
    %469 = vector.load %arg11[%c1_180, %c1_181, %c2_182] : memref<3x18x18xf32, #tpu.memory_space<vmem>>, vector<1x16x16xf32>
    %470 = vector.shape_cast %469 : vector<1x16x16xf32> to vector<16x16xf32>
    %c48 = arith.constant 48 : index
    %471 = memref.load %arg6[%c48] : memref<81xf32, #tpu.memory_space<smem>>
    %472 = vector.broadcast %471 : f32 to vector<16x16xf32>
    %473 = arith.mulf %472, %468 : vector<16x16xf32>
    %474 = arith.addf %450, %473 : vector<16x16xf32>
    %c48_183 = arith.constant 48 : index
    %475 = memref.load %arg7[%c48_183] : memref<81xf32, #tpu.memory_space<smem>>
    %476 = vector.broadcast %475 : f32 to vector<16x16xf32>
    %477 = arith.mulf %476, %470 : vector<16x16xf32>
    %478 = arith.addf %474, %477 : vector<16x16xf32>
    %c49 = arith.constant 49 : index
    %479 = memref.load %arg6[%c49] : memref<81xf32, #tpu.memory_space<smem>>
    %480 = vector.broadcast %479 : f32 to vector<16x16xf32>
    %481 = arith.mulf %480, %468 : vector<16x16xf32>
    %482 = arith.addf %458, %481 : vector<16x16xf32>
    %c49_184 = arith.constant 49 : index
    %483 = memref.load %arg7[%c49_184] : memref<81xf32, #tpu.memory_space<smem>>
    %484 = vector.broadcast %483 : f32 to vector<16x16xf32>
    %485 = arith.mulf %484, %470 : vector<16x16xf32>
    %486 = arith.addf %482, %485 : vector<16x16xf32>
    %c50 = arith.constant 50 : index
    %487 = memref.load %arg6[%c50] : memref<81xf32, #tpu.memory_space<smem>>
    %488 = vector.broadcast %487 : f32 to vector<16x16xf32>
    %489 = arith.mulf %488, %468 : vector<16x16xf32>
    %490 = arith.addf %466, %489 : vector<16x16xf32>
    %c50_185 = arith.constant 50 : index
    %491 = memref.load %arg7[%c50_185] : memref<81xf32, #tpu.memory_space<smem>>
    %492 = vector.broadcast %491 : f32 to vector<16x16xf32>
    %493 = arith.mulf %492, %470 : vector<16x16xf32>
    %494 = arith.addf %490, %493 : vector<16x16xf32>
    %c0_186 = arith.constant 0 : index
    %c2_187 = arith.constant 2 : index
    %c1_188 = arith.constant 1 : index
    %c2_189 = arith.constant 2 : index
    %495 = vector.load %arg2[%c0_186, %c2_187, %c1_188, %c2_189] : memref<1x3x18x18xf32, #tpu.memory_space<vmem>>, vector<1x1x16x16xf32>
    %496 = vector.shape_cast %495 : vector<1x1x16x16xf32> to vector<16x16xf32>
    %c2_190 = arith.constant 2 : index
    %c1_191 = arith.constant 1 : index
    %c2_192 = arith.constant 2 : index
    %497 = vector.load %arg11[%c2_190, %c1_191, %c2_192] : memref<3x18x18xf32, #tpu.memory_space<vmem>>, vector<1x16x16xf32>
    %498 = vector.shape_cast %497 : vector<1x16x16xf32> to vector<16x16xf32>
    %c51 = arith.constant 51 : index
    %499 = memref.load %arg6[%c51] : memref<81xf32, #tpu.memory_space<smem>>
    %500 = vector.broadcast %499 : f32 to vector<16x16xf32>
    %501 = arith.mulf %500, %496 : vector<16x16xf32>
    %502 = arith.addf %478, %501 : vector<16x16xf32>
    %c51_193 = arith.constant 51 : index
    %503 = memref.load %arg7[%c51_193] : memref<81xf32, #tpu.memory_space<smem>>
    %504 = vector.broadcast %503 : f32 to vector<16x16xf32>
    %505 = arith.mulf %504, %498 : vector<16x16xf32>
    %506 = arith.addf %502, %505 : vector<16x16xf32>
    %c52 = arith.constant 52 : index
    %507 = memref.load %arg6[%c52] : memref<81xf32, #tpu.memory_space<smem>>
    %508 = vector.broadcast %507 : f32 to vector<16x16xf32>
    %509 = arith.mulf %508, %496 : vector<16x16xf32>
    %510 = arith.addf %486, %509 : vector<16x16xf32>
    %c52_194 = arith.constant 52 : index
    %511 = memref.load %arg7[%c52_194] : memref<81xf32, #tpu.memory_space<smem>>
    %512 = vector.broadcast %511 : f32 to vector<16x16xf32>
    %513 = arith.mulf %512, %498 : vector<16x16xf32>
    %514 = arith.addf %510, %513 : vector<16x16xf32>
    %c53 = arith.constant 53 : index
    %515 = memref.load %arg6[%c53] : memref<81xf32, #tpu.memory_space<smem>>
    %516 = vector.broadcast %515 : f32 to vector<16x16xf32>
    %517 = arith.mulf %516, %496 : vector<16x16xf32>
    %518 = arith.addf %494, %517 : vector<16x16xf32>
    %c53_195 = arith.constant 53 : index
    %519 = memref.load %arg7[%c53_195] : memref<81xf32, #tpu.memory_space<smem>>
    %520 = vector.broadcast %519 : f32 to vector<16x16xf32>
    %521 = arith.mulf %520, %498 : vector<16x16xf32>
    %522 = arith.addf %518, %521 : vector<16x16xf32>
    %c0_196 = arith.constant 0 : index
    %c0_197 = arith.constant 0 : index
    %c2_198 = arith.constant 2 : index
    %c0_199 = arith.constant 0 : index
    %523 = vector.load %arg2[%c0_196, %c0_197, %c2_198, %c0_199] : memref<1x3x18x18xf32, #tpu.memory_space<vmem>>, vector<1x1x16x16xf32>
    %524 = vector.shape_cast %523 : vector<1x1x16x16xf32> to vector<16x16xf32>
    %c0_200 = arith.constant 0 : index
    %c2_201 = arith.constant 2 : index
    %c0_202 = arith.constant 0 : index
    %525 = vector.load %arg11[%c0_200, %c2_201, %c0_202] : memref<3x18x18xf32, #tpu.memory_space<vmem>>, vector<1x16x16xf32>
    %526 = vector.shape_cast %525 : vector<1x16x16xf32> to vector<16x16xf32>
    %c54 = arith.constant 54 : index
    %527 = memref.load %arg6[%c54] : memref<81xf32, #tpu.memory_space<smem>>
    %528 = vector.broadcast %527 : f32 to vector<16x16xf32>
    %529 = arith.mulf %528, %524 : vector<16x16xf32>
    %530 = arith.addf %506, %529 : vector<16x16xf32>
    %c54_203 = arith.constant 54 : index
    %531 = memref.load %arg7[%c54_203] : memref<81xf32, #tpu.memory_space<smem>>
    %532 = vector.broadcast %531 : f32 to vector<16x16xf32>
    %533 = arith.mulf %532, %526 : vector<16x16xf32>
    %534 = arith.addf %530, %533 : vector<16x16xf32>
    %c55 = arith.constant 55 : index
    %535 = memref.load %arg6[%c55] : memref<81xf32, #tpu.memory_space<smem>>
    %536 = vector.broadcast %535 : f32 to vector<16x16xf32>
    %537 = arith.mulf %536, %524 : vector<16x16xf32>
    %538 = arith.addf %514, %537 : vector<16x16xf32>
    %c55_204 = arith.constant 55 : index
    %539 = memref.load %arg7[%c55_204] : memref<81xf32, #tpu.memory_space<smem>>
    %540 = vector.broadcast %539 : f32 to vector<16x16xf32>
    %541 = arith.mulf %540, %526 : vector<16x16xf32>
    %542 = arith.addf %538, %541 : vector<16x16xf32>
    %c56 = arith.constant 56 : index
    %543 = memref.load %arg6[%c56] : memref<81xf32, #tpu.memory_space<smem>>
    %544 = vector.broadcast %543 : f32 to vector<16x16xf32>
    %545 = arith.mulf %544, %524 : vector<16x16xf32>
    %546 = arith.addf %522, %545 : vector<16x16xf32>
    %c56_205 = arith.constant 56 : index
    %547 = memref.load %arg7[%c56_205] : memref<81xf32, #tpu.memory_space<smem>>
    %548 = vector.broadcast %547 : f32 to vector<16x16xf32>
    %549 = arith.mulf %548, %526 : vector<16x16xf32>
    %550 = arith.addf %546, %549 : vector<16x16xf32>
    %c0_206 = arith.constant 0 : index
    %c1_207 = arith.constant 1 : index
    %c2_208 = arith.constant 2 : index
    %c0_209 = arith.constant 0 : index
    %551 = vector.load %arg2[%c0_206, %c1_207, %c2_208, %c0_209] : memref<1x3x18x18xf32, #tpu.memory_space<vmem>>, vector<1x1x16x16xf32>
    %552 = vector.shape_cast %551 : vector<1x1x16x16xf32> to vector<16x16xf32>
    %c1_210 = arith.constant 1 : index
    %c2_211 = arith.constant 2 : index
    %c0_212 = arith.constant 0 : index
    %553 = vector.load %arg11[%c1_210, %c2_211, %c0_212] : memref<3x18x18xf32, #tpu.memory_space<vmem>>, vector<1x16x16xf32>
    %554 = vector.shape_cast %553 : vector<1x16x16xf32> to vector<16x16xf32>
    %c57 = arith.constant 57 : index
    %555 = memref.load %arg6[%c57] : memref<81xf32, #tpu.memory_space<smem>>
    %556 = vector.broadcast %555 : f32 to vector<16x16xf32>
    %557 = arith.mulf %556, %552 : vector<16x16xf32>
    %558 = arith.addf %534, %557 : vector<16x16xf32>
    %c57_213 = arith.constant 57 : index
    %559 = memref.load %arg7[%c57_213] : memref<81xf32, #tpu.memory_space<smem>>
    %560 = vector.broadcast %559 : f32 to vector<16x16xf32>
    %561 = arith.mulf %560, %554 : vector<16x16xf32>
    %562 = arith.addf %558, %561 : vector<16x16xf32>
    %c58 = arith.constant 58 : index
    %563 = memref.load %arg6[%c58] : memref<81xf32, #tpu.memory_space<smem>>
    %564 = vector.broadcast %563 : f32 to vector<16x16xf32>
    %565 = arith.mulf %564, %552 : vector<16x16xf32>
    %566 = arith.addf %542, %565 : vector<16x16xf32>
    %c58_214 = arith.constant 58 : index
    %567 = memref.load %arg7[%c58_214] : memref<81xf32, #tpu.memory_space<smem>>
    %568 = vector.broadcast %567 : f32 to vector<16x16xf32>
    %569 = arith.mulf %568, %554 : vector<16x16xf32>
    %570 = arith.addf %566, %569 : vector<16x16xf32>
    %c59 = arith.constant 59 : index
    %571 = memref.load %arg6[%c59] : memref<81xf32, #tpu.memory_space<smem>>
    %572 = vector.broadcast %571 : f32 to vector<16x16xf32>
    %573 = arith.mulf %572, %552 : vector<16x16xf32>
    %574 = arith.addf %550, %573 : vector<16x16xf32>
    %c59_215 = arith.constant 59 : index
    %575 = memref.load %arg7[%c59_215] : memref<81xf32, #tpu.memory_space<smem>>
    %576 = vector.broadcast %575 : f32 to vector<16x16xf32>
    %577 = arith.mulf %576, %554 : vector<16x16xf32>
    %578 = arith.addf %574, %577 : vector<16x16xf32>
    %c0_216 = arith.constant 0 : index
    %c2_217 = arith.constant 2 : index
    %c2_218 = arith.constant 2 : index
    %c0_219 = arith.constant 0 : index
    %579 = vector.load %arg2[%c0_216, %c2_217, %c2_218, %c0_219] : memref<1x3x18x18xf32, #tpu.memory_space<vmem>>, vector<1x1x16x16xf32>
    %580 = vector.shape_cast %579 : vector<1x1x16x16xf32> to vector<16x16xf32>
    %c2_220 = arith.constant 2 : index
    %c2_221 = arith.constant 2 : index
    %c0_222 = arith.constant 0 : index
    %581 = vector.load %arg11[%c2_220, %c2_221, %c0_222] : memref<3x18x18xf32, #tpu.memory_space<vmem>>, vector<1x16x16xf32>
    %582 = vector.shape_cast %581 : vector<1x16x16xf32> to vector<16x16xf32>
    %c60 = arith.constant 60 : index
    %583 = memref.load %arg6[%c60] : memref<81xf32, #tpu.memory_space<smem>>
    %584 = vector.broadcast %583 : f32 to vector<16x16xf32>
    %585 = arith.mulf %584, %580 : vector<16x16xf32>
    %586 = arith.addf %562, %585 : vector<16x16xf32>
    %c60_223 = arith.constant 60 : index
    %587 = memref.load %arg7[%c60_223] : memref<81xf32, #tpu.memory_space<smem>>
    %588 = vector.broadcast %587 : f32 to vector<16x16xf32>
    %589 = arith.mulf %588, %582 : vector<16x16xf32>
    %590 = arith.addf %586, %589 : vector<16x16xf32>
    %c61 = arith.constant 61 : index
    %591 = memref.load %arg6[%c61] : memref<81xf32, #tpu.memory_space<smem>>
    %592 = vector.broadcast %591 : f32 to vector<16x16xf32>
    %593 = arith.mulf %592, %580 : vector<16x16xf32>
    %594 = arith.addf %570, %593 : vector<16x16xf32>
    %c61_224 = arith.constant 61 : index
    %595 = memref.load %arg7[%c61_224] : memref<81xf32, #tpu.memory_space<smem>>
    %596 = vector.broadcast %595 : f32 to vector<16x16xf32>
    %597 = arith.mulf %596, %582 : vector<16x16xf32>
    %598 = arith.addf %594, %597 : vector<16x16xf32>
    %c62 = arith.constant 62 : index
    %599 = memref.load %arg6[%c62] : memref<81xf32, #tpu.memory_space<smem>>
    %600 = vector.broadcast %599 : f32 to vector<16x16xf32>
    %601 = arith.mulf %600, %580 : vector<16x16xf32>
    %602 = arith.addf %578, %601 : vector<16x16xf32>
    %c62_225 = arith.constant 62 : index
    %603 = memref.load %arg7[%c62_225] : memref<81xf32, #tpu.memory_space<smem>>
    %604 = vector.broadcast %603 : f32 to vector<16x16xf32>
    %605 = arith.mulf %604, %582 : vector<16x16xf32>
    %606 = arith.addf %602, %605 : vector<16x16xf32>
    %c0_226 = arith.constant 0 : index
    %c0_227 = arith.constant 0 : index
    %c2_228 = arith.constant 2 : index
    %c1_229 = arith.constant 1 : index
    %607 = vector.load %arg2[%c0_226, %c0_227, %c2_228, %c1_229] : memref<1x3x18x18xf32, #tpu.memory_space<vmem>>, vector<1x1x16x16xf32>
    %608 = vector.shape_cast %607 : vector<1x1x16x16xf32> to vector<16x16xf32>
    %c0_230 = arith.constant 0 : index
    %c2_231 = arith.constant 2 : index
    %c1_232 = arith.constant 1 : index
    %609 = vector.load %arg11[%c0_230, %c2_231, %c1_232] : memref<3x18x18xf32, #tpu.memory_space<vmem>>, vector<1x16x16xf32>
    %610 = vector.shape_cast %609 : vector<1x16x16xf32> to vector<16x16xf32>
    %c63 = arith.constant 63 : index
    %611 = memref.load %arg6[%c63] : memref<81xf32, #tpu.memory_space<smem>>
    %612 = vector.broadcast %611 : f32 to vector<16x16xf32>
    %613 = arith.mulf %612, %608 : vector<16x16xf32>
    %614 = arith.addf %590, %613 : vector<16x16xf32>
    %c63_233 = arith.constant 63 : index
    %615 = memref.load %arg7[%c63_233] : memref<81xf32, #tpu.memory_space<smem>>
    %616 = vector.broadcast %615 : f32 to vector<16x16xf32>
    %617 = arith.mulf %616, %610 : vector<16x16xf32>
    %618 = arith.addf %614, %617 : vector<16x16xf32>
    %c64 = arith.constant 64 : index
    %619 = memref.load %arg6[%c64] : memref<81xf32, #tpu.memory_space<smem>>
    %620 = vector.broadcast %619 : f32 to vector<16x16xf32>
    %621 = arith.mulf %620, %608 : vector<16x16xf32>
    %622 = arith.addf %598, %621 : vector<16x16xf32>
    %c64_234 = arith.constant 64 : index
    %623 = memref.load %arg7[%c64_234] : memref<81xf32, #tpu.memory_space<smem>>
    %624 = vector.broadcast %623 : f32 to vector<16x16xf32>
    %625 = arith.mulf %624, %610 : vector<16x16xf32>
    %626 = arith.addf %622, %625 : vector<16x16xf32>
    %c65 = arith.constant 65 : index
    %627 = memref.load %arg6[%c65] : memref<81xf32, #tpu.memory_space<smem>>
    %628 = vector.broadcast %627 : f32 to vector<16x16xf32>
    %629 = arith.mulf %628, %608 : vector<16x16xf32>
    %630 = arith.addf %606, %629 : vector<16x16xf32>
    %c65_235 = arith.constant 65 : index
    %631 = memref.load %arg7[%c65_235] : memref<81xf32, #tpu.memory_space<smem>>
    %632 = vector.broadcast %631 : f32 to vector<16x16xf32>
    %633 = arith.mulf %632, %610 : vector<16x16xf32>
    %634 = arith.addf %630, %633 : vector<16x16xf32>
    %c0_236 = arith.constant 0 : index
    %c1_237 = arith.constant 1 : index
    %c2_238 = arith.constant 2 : index
    %c1_239 = arith.constant 1 : index
    %635 = vector.load %arg2[%c0_236, %c1_237, %c2_238, %c1_239] : memref<1x3x18x18xf32, #tpu.memory_space<vmem>>, vector<1x1x16x16xf32>
    %636 = vector.shape_cast %635 : vector<1x1x16x16xf32> to vector<16x16xf32>
    %c1_240 = arith.constant 1 : index
    %c2_241 = arith.constant 2 : index
    %c1_242 = arith.constant 1 : index
    %637 = vector.load %arg11[%c1_240, %c2_241, %c1_242] : memref<3x18x18xf32, #tpu.memory_space<vmem>>, vector<1x16x16xf32>
    %638 = vector.shape_cast %637 : vector<1x16x16xf32> to vector<16x16xf32>
    %c66 = arith.constant 66 : index
    %639 = memref.load %arg6[%c66] : memref<81xf32, #tpu.memory_space<smem>>
    %640 = vector.broadcast %639 : f32 to vector<16x16xf32>
    %641 = arith.mulf %640, %636 : vector<16x16xf32>
    %642 = arith.addf %618, %641 : vector<16x16xf32>
    %c66_243 = arith.constant 66 : index
    %643 = memref.load %arg7[%c66_243] : memref<81xf32, #tpu.memory_space<smem>>
    %644 = vector.broadcast %643 : f32 to vector<16x16xf32>
    %645 = arith.mulf %644, %638 : vector<16x16xf32>
    %646 = arith.addf %642, %645 : vector<16x16xf32>
    %c67 = arith.constant 67 : index
    %647 = memref.load %arg6[%c67] : memref<81xf32, #tpu.memory_space<smem>>
    %648 = vector.broadcast %647 : f32 to vector<16x16xf32>
    %649 = arith.mulf %648, %636 : vector<16x16xf32>
    %650 = arith.addf %626, %649 : vector<16x16xf32>
    %c67_244 = arith.constant 67 : index
    %651 = memref.load %arg7[%c67_244] : memref<81xf32, #tpu.memory_space<smem>>
    %652 = vector.broadcast %651 : f32 to vector<16x16xf32>
    %653 = arith.mulf %652, %638 : vector<16x16xf32>
    %654 = arith.addf %650, %653 : vector<16x16xf32>
    %c68 = arith.constant 68 : index
    %655 = memref.load %arg6[%c68] : memref<81xf32, #tpu.memory_space<smem>>
    %656 = vector.broadcast %655 : f32 to vector<16x16xf32>
    %657 = arith.mulf %656, %636 : vector<16x16xf32>
    %658 = arith.addf %634, %657 : vector<16x16xf32>
    %c68_245 = arith.constant 68 : index
    %659 = memref.load %arg7[%c68_245] : memref<81xf32, #tpu.memory_space<smem>>
    %660 = vector.broadcast %659 : f32 to vector<16x16xf32>
    %661 = arith.mulf %660, %638 : vector<16x16xf32>
    %662 = arith.addf %658, %661 : vector<16x16xf32>
    %c0_246 = arith.constant 0 : index
    %c2_247 = arith.constant 2 : index
    %c2_248 = arith.constant 2 : index
    %c1_249 = arith.constant 1 : index
    %663 = vector.load %arg2[%c0_246, %c2_247, %c2_248, %c1_249] : memref<1x3x18x18xf32, #tpu.memory_space<vmem>>, vector<1x1x16x16xf32>
    %664 = vector.shape_cast %663 : vector<1x1x16x16xf32> to vector<16x16xf32>
    %c2_250 = arith.constant 2 : index
    %c2_251 = arith.constant 2 : index
    %c1_252 = arith.constant 1 : index
    %665 = vector.load %arg11[%c2_250, %c2_251, %c1_252] : memref<3x18x18xf32, #tpu.memory_space<vmem>>, vector<1x16x16xf32>
    %666 = vector.shape_cast %665 : vector<1x16x16xf32> to vector<16x16xf32>
    %c69 = arith.constant 69 : index
    %667 = memref.load %arg6[%c69] : memref<81xf32, #tpu.memory_space<smem>>
    %668 = vector.broadcast %667 : f32 to vector<16x16xf32>
    %669 = arith.mulf %668, %664 : vector<16x16xf32>
    %670 = arith.addf %646, %669 : vector<16x16xf32>
    %c69_253 = arith.constant 69 : index
    %671 = memref.load %arg7[%c69_253] : memref<81xf32, #tpu.memory_space<smem>>
    %672 = vector.broadcast %671 : f32 to vector<16x16xf32>
    %673 = arith.mulf %672, %666 : vector<16x16xf32>
    %674 = arith.addf %670, %673 : vector<16x16xf32>
    %c70 = arith.constant 70 : index
    %675 = memref.load %arg6[%c70] : memref<81xf32, #tpu.memory_space<smem>>
    %676 = vector.broadcast %675 : f32 to vector<16x16xf32>
    %677 = arith.mulf %676, %664 : vector<16x16xf32>
    %678 = arith.addf %654, %677 : vector<16x16xf32>
    %c70_254 = arith.constant 70 : index
    %679 = memref.load %arg7[%c70_254] : memref<81xf32, #tpu.memory_space<smem>>
    %680 = vector.broadcast %679 : f32 to vector<16x16xf32>
    %681 = arith.mulf %680, %666 : vector<16x16xf32>
    %682 = arith.addf %678, %681 : vector<16x16xf32>
    %c71 = arith.constant 71 : index
    %683 = memref.load %arg6[%c71] : memref<81xf32, #tpu.memory_space<smem>>
    %684 = vector.broadcast %683 : f32 to vector<16x16xf32>
    %685 = arith.mulf %684, %664 : vector<16x16xf32>
    %686 = arith.addf %662, %685 : vector<16x16xf32>
    %c71_255 = arith.constant 71 : index
    %687 = memref.load %arg7[%c71_255] : memref<81xf32, #tpu.memory_space<smem>>
    %688 = vector.broadcast %687 : f32 to vector<16x16xf32>
    %689 = arith.mulf %688, %666 : vector<16x16xf32>
    %690 = arith.addf %686, %689 : vector<16x16xf32>
    %c0_256 = arith.constant 0 : index
    %c0_257 = arith.constant 0 : index
    %c2_258 = arith.constant 2 : index
    %c2_259 = arith.constant 2 : index
    %691 = vector.load %arg2[%c0_256, %c0_257, %c2_258, %c2_259] : memref<1x3x18x18xf32, #tpu.memory_space<vmem>>, vector<1x1x16x16xf32>
    %692 = vector.shape_cast %691 : vector<1x1x16x16xf32> to vector<16x16xf32>
    %c0_260 = arith.constant 0 : index
    %c2_261 = arith.constant 2 : index
    %c2_262 = arith.constant 2 : index
    %693 = vector.load %arg11[%c0_260, %c2_261, %c2_262] : memref<3x18x18xf32, #tpu.memory_space<vmem>>, vector<1x16x16xf32>
    %694 = vector.shape_cast %693 : vector<1x16x16xf32> to vector<16x16xf32>
    %c72 = arith.constant 72 : index
    %695 = memref.load %arg6[%c72] : memref<81xf32, #tpu.memory_space<smem>>
    %696 = vector.broadcast %695 : f32 to vector<16x16xf32>
    %697 = arith.mulf %696, %692 : vector<16x16xf32>
    %698 = arith.addf %674, %697 : vector<16x16xf32>
    %c72_263 = arith.constant 72 : index
    %699 = memref.load %arg7[%c72_263] : memref<81xf32, #tpu.memory_space<smem>>
    %700 = vector.broadcast %699 : f32 to vector<16x16xf32>
    %701 = arith.mulf %700, %694 : vector<16x16xf32>
    %702 = arith.addf %698, %701 : vector<16x16xf32>
    %c73 = arith.constant 73 : index
    %703 = memref.load %arg6[%c73] : memref<81xf32, #tpu.memory_space<smem>>
    %704 = vector.broadcast %703 : f32 to vector<16x16xf32>
    %705 = arith.mulf %704, %692 : vector<16x16xf32>
    %706 = arith.addf %682, %705 : vector<16x16xf32>
    %c73_264 = arith.constant 73 : index
    %707 = memref.load %arg7[%c73_264] : memref<81xf32, #tpu.memory_space<smem>>
    %708 = vector.broadcast %707 : f32 to vector<16x16xf32>
    %709 = arith.mulf %708, %694 : vector<16x16xf32>
    %710 = arith.addf %706, %709 : vector<16x16xf32>
    %c74 = arith.constant 74 : index
    %711 = memref.load %arg6[%c74] : memref<81xf32, #tpu.memory_space<smem>>
    %712 = vector.broadcast %711 : f32 to vector<16x16xf32>
    %713 = arith.mulf %712, %692 : vector<16x16xf32>
    %714 = arith.addf %690, %713 : vector<16x16xf32>
    %c74_265 = arith.constant 74 : index
    %715 = memref.load %arg7[%c74_265] : memref<81xf32, #tpu.memory_space<smem>>
    %716 = vector.broadcast %715 : f32 to vector<16x16xf32>
    %717 = arith.mulf %716, %694 : vector<16x16xf32>
    %718 = arith.addf %714, %717 : vector<16x16xf32>
    %c0_266 = arith.constant 0 : index
    %c1_267 = arith.constant 1 : index
    %c2_268 = arith.constant 2 : index
    %c2_269 = arith.constant 2 : index
    %719 = vector.load %arg2[%c0_266, %c1_267, %c2_268, %c2_269] : memref<1x3x18x18xf32, #tpu.memory_space<vmem>>, vector<1x1x16x16xf32>
    %720 = vector.shape_cast %719 : vector<1x1x16x16xf32> to vector<16x16xf32>
    %c1_270 = arith.constant 1 : index
    %c2_271 = arith.constant 2 : index
    %c2_272 = arith.constant 2 : index
    %721 = vector.load %arg11[%c1_270, %c2_271, %c2_272] : memref<3x18x18xf32, #tpu.memory_space<vmem>>, vector<1x16x16xf32>
    %722 = vector.shape_cast %721 : vector<1x16x16xf32> to vector<16x16xf32>
    %c75 = arith.constant 75 : index
    %723 = memref.load %arg6[%c75] : memref<81xf32, #tpu.memory_space<smem>>
    %724 = vector.broadcast %723 : f32 to vector<16x16xf32>
    %725 = arith.mulf %724, %720 : vector<16x16xf32>
    %726 = arith.addf %702, %725 : vector<16x16xf32>
    %c75_273 = arith.constant 75 : index
    %727 = memref.load %arg7[%c75_273] : memref<81xf32, #tpu.memory_space<smem>>
    %728 = vector.broadcast %727 : f32 to vector<16x16xf32>
    %729 = arith.mulf %728, %722 : vector<16x16xf32>
    %730 = arith.addf %726, %729 : vector<16x16xf32>
    %c76 = arith.constant 76 : index
    %731 = memref.load %arg6[%c76] : memref<81xf32, #tpu.memory_space<smem>>
    %732 = vector.broadcast %731 : f32 to vector<16x16xf32>
    %733 = arith.mulf %732, %720 : vector<16x16xf32>
    %734 = arith.addf %710, %733 : vector<16x16xf32>
    %c76_274 = arith.constant 76 : index
    %735 = memref.load %arg7[%c76_274] : memref<81xf32, #tpu.memory_space<smem>>
    %736 = vector.broadcast %735 : f32 to vector<16x16xf32>
    %737 = arith.mulf %736, %722 : vector<16x16xf32>
    %738 = arith.addf %734, %737 : vector<16x16xf32>
    %c77 = arith.constant 77 : index
    %739 = memref.load %arg6[%c77] : memref<81xf32, #tpu.memory_space<smem>>
    %740 = vector.broadcast %739 : f32 to vector<16x16xf32>
    %741 = arith.mulf %740, %720 : vector<16x16xf32>
    %742 = arith.addf %718, %741 : vector<16x16xf32>
    %c77_275 = arith.constant 77 : index
    %743 = memref.load %arg7[%c77_275] : memref<81xf32, #tpu.memory_space<smem>>
    %744 = vector.broadcast %743 : f32 to vector<16x16xf32>
    %745 = arith.mulf %744, %722 : vector<16x16xf32>
    %746 = arith.addf %742, %745 : vector<16x16xf32>
    %c0_276 = arith.constant 0 : index
    %c2_277 = arith.constant 2 : index
    %c2_278 = arith.constant 2 : index
    %c2_279 = arith.constant 2 : index
    %747 = vector.load %arg2[%c0_276, %c2_277, %c2_278, %c2_279] : memref<1x3x18x18xf32, #tpu.memory_space<vmem>>, vector<1x1x16x16xf32>
    %748 = vector.shape_cast %747 : vector<1x1x16x16xf32> to vector<16x16xf32>
    %c2_280 = arith.constant 2 : index
    %c2_281 = arith.constant 2 : index
    %c2_282 = arith.constant 2 : index
    %749 = vector.load %arg11[%c2_280, %c2_281, %c2_282] : memref<3x18x18xf32, #tpu.memory_space<vmem>>, vector<1x16x16xf32>
    %750 = vector.shape_cast %749 : vector<1x16x16xf32> to vector<16x16xf32>
    %c78 = arith.constant 78 : index
    %751 = memref.load %arg6[%c78] : memref<81xf32, #tpu.memory_space<smem>>
    %752 = vector.broadcast %751 : f32 to vector<16x16xf32>
    %753 = arith.mulf %752, %748 : vector<16x16xf32>
    %754 = arith.addf %730, %753 : vector<16x16xf32>
    %c78_283 = arith.constant 78 : index
    %755 = memref.load %arg7[%c78_283] : memref<81xf32, #tpu.memory_space<smem>>
    %756 = vector.broadcast %755 : f32 to vector<16x16xf32>
    %757 = arith.mulf %756, %750 : vector<16x16xf32>
    %758 = arith.addf %754, %757 : vector<16x16xf32>
    %c79 = arith.constant 79 : index
    %759 = memref.load %arg6[%c79] : memref<81xf32, #tpu.memory_space<smem>>
    %760 = vector.broadcast %759 : f32 to vector<16x16xf32>
    %761 = arith.mulf %760, %748 : vector<16x16xf32>
    %762 = arith.addf %738, %761 : vector<16x16xf32>
    %c79_284 = arith.constant 79 : index
    %763 = memref.load %arg7[%c79_284] : memref<81xf32, #tpu.memory_space<smem>>
    %764 = vector.broadcast %763 : f32 to vector<16x16xf32>
    %765 = arith.mulf %764, %750 : vector<16x16xf32>
    %766 = arith.addf %762, %765 : vector<16x16xf32>
    %c80 = arith.constant 80 : index
    %767 = memref.load %arg6[%c80] : memref<81xf32, #tpu.memory_space<smem>>
    %768 = vector.broadcast %767 : f32 to vector<16x16xf32>
    %769 = arith.mulf %768, %748 : vector<16x16xf32>
    %770 = arith.addf %746, %769 : vector<16x16xf32>
    %c80_285 = arith.constant 80 : index
    %771 = memref.load %arg7[%c80_285] : memref<81xf32, #tpu.memory_space<smem>>
    %772 = vector.broadcast %771 : f32 to vector<16x16xf32>
    %773 = arith.mulf %772, %750 : vector<16x16xf32>
    %774 = arith.addf %770, %773 : vector<16x16xf32>
    %c0_286 = arith.constant 0 : index
    %775 = memref.load %arg8[%c0_286] : memref<3xf32, #tpu.memory_space<smem>>
    %776 = vector.broadcast %775 : f32 to vector<16x16xf32>
    %777 = arith.addf %758, %776 : vector<16x16xf32>
    %c0_287 = arith.constant 0 : index
    %778 = memref.load %arg9[%c0_287] : memref<3xf32, #tpu.memory_space<smem>>
    %779 = arith.mulf %1, %778 : f32
    %780 = vector.broadcast %779 : f32 to vector<16x16xf32>
    %781 = arith.addf %777, %780 : vector<16x16xf32>
    %c0_288 = arith.constant 0 : index
    %c0_289 = arith.constant 0 : index
    %c0_290 = arith.constant 0 : index
    %c0_291 = arith.constant 0 : index
    %782 = vector.load %arg5[%c0_288, %c0_289, %c0_290, %c0_291] : memref<1x3x16x16xf32, #tpu.memory_space<vmem>>, vector<1x1x16x16xf32>
    %783 = vector.shape_cast %782 : vector<1x1x16x16xf32> to vector<16x16xf32>
    %784 = arith.subf %783, %781 : vector<16x16xf32>
    %785 = arith.mulf %784, %784 : vector<16x16xf32>
    %786 = vector.shape_cast %785 : vector<16x16xf32> to vector<1x16x16xf32>
    %cst_292 = arith.constant dense<0.000000e+00> : vector<1xf32>
    %787 = vector.multi_reduction <add>, %786, %cst_292 [1, 2] : vector<1x16x16xf32> to vector<1xf32>
    %788 = vector.shape_cast %787 : vector<1xf32> to vector<1x1x1xf32>
    %789 = vector.extract %788[0, 0, 0] : f32 from vector<1x1x1xf32>
    %cst_293 = arith.constant 0.000000e+00 : f32
    %790 = arith.addf %cst_293, %789 : f32
    %c1_294 = arith.constant 1 : index
    %791 = memref.load %arg8[%c1_294] : memref<3xf32, #tpu.memory_space<smem>>
    %792 = vector.broadcast %791 : f32 to vector<16x16xf32>
    %793 = arith.addf %766, %792 : vector<16x16xf32>
    %c1_295 = arith.constant 1 : index
    %794 = memref.load %arg9[%c1_295] : memref<3xf32, #tpu.memory_space<smem>>
    %795 = arith.mulf %1, %794 : f32
    %796 = vector.broadcast %795 : f32 to vector<16x16xf32>
    %797 = arith.addf %793, %796 : vector<16x16xf32>
    %c0_296 = arith.constant 0 : index
    %c1_297 = arith.constant 1 : index
    %c0_298 = arith.constant 0 : index
    %c0_299 = arith.constant 0 : index
    %798 = vector.load %arg5[%c0_296, %c1_297, %c0_298, %c0_299] : memref<1x3x16x16xf32, #tpu.memory_space<vmem>>, vector<1x1x16x16xf32>
    %799 = vector.shape_cast %798 : vector<1x1x16x16xf32> to vector<16x16xf32>
    %800 = arith.subf %799, %797 : vector<16x16xf32>
    %801 = arith.mulf %800, %800 : vector<16x16xf32>
    %802 = vector.shape_cast %801 : vector<16x16xf32> to vector<1x16x16xf32>
    %cst_300 = arith.constant dense<0.000000e+00> : vector<1xf32>
    %803 = vector.multi_reduction <add>, %802, %cst_300 [1, 2] : vector<1x16x16xf32> to vector<1xf32>
    %804 = vector.shape_cast %803 : vector<1xf32> to vector<1x1x1xf32>
    %805 = vector.extract %804[0, 0, 0] : f32 from vector<1x1x1xf32>
    %806 = arith.addf %790, %805 : f32
    %c2_301 = arith.constant 2 : index
    %807 = memref.load %arg8[%c2_301] : memref<3xf32, #tpu.memory_space<smem>>
    %808 = vector.broadcast %807 : f32 to vector<16x16xf32>
    %809 = arith.addf %774, %808 : vector<16x16xf32>
    %c2_302 = arith.constant 2 : index
    %810 = memref.load %arg9[%c2_302] : memref<3xf32, #tpu.memory_space<smem>>
    %811 = arith.mulf %1, %810 : f32
    %812 = vector.broadcast %811 : f32 to vector<16x16xf32>
    %813 = arith.addf %809, %812 : vector<16x16xf32>
    %c0_303 = arith.constant 0 : index
    %c2_304 = arith.constant 2 : index
    %c0_305 = arith.constant 0 : index
    %c0_306 = arith.constant 0 : index
    %814 = vector.load %arg5[%c0_303, %c2_304, %c0_305, %c0_306] : memref<1x3x16x16xf32, #tpu.memory_space<vmem>>, vector<1x1x16x16xf32>
    %815 = vector.shape_cast %814 : vector<1x1x16x16xf32> to vector<16x16xf32>
    %816 = arith.subf %815, %813 : vector<16x16xf32>
    %817 = arith.mulf %816, %816 : vector<16x16xf32>
    %818 = vector.shape_cast %817 : vector<16x16xf32> to vector<1x16x16xf32>
    %cst_307 = arith.constant dense<0.000000e+00> : vector<1xf32>
    %819 = vector.multi_reduction <add>, %818, %cst_307 [1, 2] : vector<1x16x16xf32> to vector<1xf32>
    %820 = vector.shape_cast %819 : vector<1xf32> to vector<1x1x1xf32>
    %821 = vector.extract %820[0, 0, 0] : f32 from vector<1x1x1xf32>
    %822 = arith.addf %806, %821 : f32
    %cst_308 = arith.constant 0.000000e+00 : f32
    %823 = vector.broadcast %cst_308 : f32 to vector<1x1x128xf32>
    %cst_309 = arith.constant 6.51041686E-4 : f32
    %824 = arith.mulf %822, %cst_309 : f32
    %825 = vector.broadcast %824 : f32 to vector<1x1x128xf32>
    %826 = arith.addf %823, %825 : vector<1x1x128xf32>
    %c0_310 = arith.constant 0 : index
    %c0_311 = arith.constant 0 : index
    %c0_312 = arith.constant 0 : index
    %827 = vector.load %arg10[%c0_310, %c0_311, %c0_312] : memref<1x1x128xf32, #tpu.memory_space<vmem>>, vector<1x1x128xf32>
    tpu.vector_store %arg10[%c0_310, %c0_311, %c0_312], %826 {strides = array<i32>} : memref<1x1x128xf32, #tpu.memory_space<vmem>>, vector<1x1x128xf32>,
    return
  }
  func.func @transform_0(%arg0: i32) -> (i32, i32) {
    %c0_i32 = arith.constant 0 : i32
    %c0_i32_0 = arith.constant 0 : i32
    %c0_i32_1 = arith.constant 0 : i32
    return %c0_i32, %c0_i32_0 : i32, i32
  }
  func.func @transform_1(%arg0: i32) -> (i32, i32, i32, i32) {
    %c0_i32 = arith.constant 0 : i32
    %c0_i32_0 = arith.constant 0 : i32
    %c0_i32_1 = arith.constant 0 : i32
    %c0_i32_2 = arith.constant 0 : i32
    return %arg0, %c0_i32, %c0_i32_0, %c0_i32_1 : i32, i32, i32, i32
  }
  func.func @transform_2(%arg0: i32) -> (i32, i32, i32, i32) {
    %c0_i32 = arith.constant 0 : i32
    %c0_i32_0 = arith.constant 0 : i32
    %c0_i32_1 = arith.constant 0 : i32
    %c0_i32_2 = arith.constant 0 : i32
    return %arg0, %c0_i32, %c0_i32_0, %c0_i32_1 : i32, i32, i32, i32
  }
  func.func @transform_3(%arg0: i32) -> (i32, i32, i32, i32) {
    %c0_i32 = arith.constant 0 : i32
    %c0_i32_0 = arith.constant 0 : i32
    %c0_i32_1 = arith.constant 0 : i32
    %c0_i32_2 = arith.constant 0 : i32
    return %arg0, %c0_i32, %c0_i32_0, %c0_i32_1 : i32, i32, i32, i32
  }
  func.func @transform_4(%arg0: i32) -> (i32, i32, i32, i32) {
    %c0_i32 = arith.constant 0 : i32
    %c0_i32_0 = arith.constant 0 : i32
    %c0_i32_1 = arith.constant 0 : i32
    %c0_i32_2 = arith.constant 0 : i32
    return %arg0, %c0_i32, %c0_i32_0, %c0_i32_1 : i32, i32, i32, i32
  }
  func.func @transform_5(%arg0: i32) -> i32 {
    %c0_i32 = arith.constant 0 : i32
    %c0_i32_0 = arith.constant 0 : i32
    return %c0_i32 : i32
  }
  func.func @transform_6(%arg0: i32) -> i32 {
    %c0_i32 = arith.constant 0 : i32
    %c0_i32_0 = arith.constant 0 : i32
    return %c0_i32 : i32
  }
  func.func @transform_7(%arg0: i32) -> i32 {
    %c0_i32 = arith.constant 0 : i32
    %c0_i32_0 = arith.constant 0 : i32
    return %c0_i32 : i32
  }
  func.func @transform_8(%arg0: i32) -> i32 {
    %c0_i32 = arith.constant 0 : i32
    %c0_i32_0 = arith.constant 0 : i32
    return %c0_i32 : i32
  }
  func.func @transform_9(%arg0: i32) -> (i32, i32, i32) {
    %c0_i32 = arith.constant 0 : i32
    %c0_i32_0 = arith.constant 0 : i32
    %c0_i32_1 = arith.constant 0 : i32
    return %arg0, %c0_i32, %c0_i32_0 : i32, i32, i32
  }
}

</mosaic_0001>

<bundles_post_ra>
// kernel: diffusion_forward.5
= control target key start
LH: loop header
LB: loop body
LE: loop exit
PB: predicated region body
PF: predicated region fallthrough
CT: control target
= control target key end

     0   :  { %s4925_s0 = inlined_call_operand.vmem [shape: f32[2,1], index: 0, kind: input, shape index: {}]   ;;  %s4926_s1 = inlined_call_operand.vmem [shape: f32[2,3,18,18], index: 1, kind: input, shape index: {}]   ;;  %s4927_s2 = inlined_call_operand.vmem [shape: f32[2,3,18,18], index: 2, kind: input, shape index: {}]   ;;  %s4928_s3 = inlined_call_operand.vmem [shape: f32[2,3,18,18], index: 3, kind: input, shape index: {}]   ;;  %s4929_s4 = inlined_call_operand.vmem [shape: f32[2,3,16,16], index: 4, kind: input, shape index: {}]   ;;  %s4930_s5 = inlined_call_operand.vmem [shape: f32[81], index: 5, kind: input, shape index: {}]   ;;  %s4931_s6 = inlined_call_operand.vmem [shape: f32[81], index: 6, kind: input, shape index: {}]   ;;  %s4932_s7 = inlined_call_operand.vmem [shape: f32[3], index: 7, kind: input, shape index: {}]   ;;  %s4933_s8 = inlined_call_operand.vmem [shape: f32[3], index: 8, kind: input, shape index: {}]   ;;  %s4934_s9 = inlined_call_operand.vmem [shape: f32[2,1,128], index: 9, kind: output, shape index: {}]  }
   0x1   :  { %4961 = sst [smem:[#allocation34_spill]] %s4925_s0 }
   0x2   :  { %4962 = sst [smem:[#allocation35_spill]] %s4926_s1 }
   0x3   :  { %4963 = sst [smem:[#allocation36_spill]] %s4927_s2 }
   0x4   :  { %4964 = sst [smem:[#allocation37_spill]] %s4928_s3 }
   0x5   :  { %4965 = sst [smem:[#allocation38_spill]] %s4930_s5 }
   0x6   :  { %14 = vsyncpa [#allocation4], 0 }
   0x7   :  { %15 = vsyncpa [#allocation6], 0 }
   0x8   :  { %16 = vsyncpa [#allocation9], 0  ;;  %s3054_s30 = smov 0  }
   0x9 LB: > { %s4966_s5 = sld [smem:[#allocation38_spill]]  ;;  %s3063_s13 = sadd.s32 4294967295, %s2994_s30   ;;  %s2994_s30 = sphi %s3054_s30, %s22_s30  }
   0xa   : > { %p2627_p0 = scmp.ge.s32.totalorder %s2994_s30, 1  ;;  %p262_p1 = scmp.lt.s32.totalorder %s2994_s30, 3 }
   0xb   : > { %p4935_p2 = scmp.eq.s32.totalorder %s3063_s13, 0  ;;  %s308_s17 = sshll.u32 %s4932_s7, 4  ;;  %s3075_s17 = int_to_ptr.vmem [resolvable:$true] %s308_s17 }
   0xc   : > { %p3068_p3 = pnand %p2627_p0, %p262_p1  ;;  %s4968_s0 = sld [smem:[#allocation34_spill]] }
   0xd   : > { %s297_s24 = sshll.u32 %s4931_s6, 4  ;;  %s319_s27 = sshll.u32 %s4933_s8, 4  ;;  %s3093_s24 = int_to_ptr.vmem [resolvable:$true] %s297_s24  ;;  %s320_s27 = int_to_ptr.vmem [resolvable:$true] %s319_s27 }
   0xe   : > { %p2857_p4 = pneg %p3068_p3 }
   0xf   : > { %s286_s12 = sshll.u32 %s4966_s5, 4  ;;  %s287_s12 = int_to_ptr.vmem [resolvable:$true] %s286_s12 }
  0x10   : > { %p3086_p5 = pnand %p4935_p2, %p2857_p4  ;;  %s2901_s28 = scalar_lea.vmem %s287_s12, 16 }
  0x11   : > { %p2902_p6 = scmp.ne.s32.totalorder %s287_s12, %s2901_s28  ;;  %p2909_p10 = scmp.lt.s32.totalorder %s287_s12, %s287_s12 }
  0x12   : > { %s275_s20 = sshll.u32 %s4968_s0, 4  ;;  %p3100_p7 = pneg %p3086_p5  ;;  %s3082_s20 = int_to_ptr.vmem [resolvable:$true] %s275_s20 }
  0x13   : > { %p2910_p11 = scmp.lt.s32.totalorder %s2901_s28, %s2901_s28 }
  0x14   : > { %p2904_p8 = pnand %p3100_p7, %p2902_p6 }
  0x15   : > { %p2911_p12 = por %p2910_p11, %p2909_p10 }
  0x16   : > { %p2905_p9 = pneg %p2904_p8 }
  0x18   : > { %p2912_p13 = pnand %p2911_p12, %p2905_p9 }
  0x1a   : > { %2915 = shalt.err (!%p2912_p13)
}
  0x1b   : > { %s2996_s10 = smov [#allocation5]   ;;  %s2916_s11 = scalar_lea.vmem %s3075_s17, 16 }
  0x1c   : > { %2863 = dma.vmem_to_smem (!%p3086_p5), %s287_s12, 16, %s2996_s10, [#allocation6]  }
  0x1d   : > { %p2917_p0 = scmp.ne.s32.totalorder %s3075_s17, %s2916_s11  ;;  %p2924_p6 = scmp.lt.s32.totalorder %s3075_s17, %s3075_s17 }
  0x1e   : > { %p2925_p8 = scmp.lt.s32.totalorder %s2916_s11, %s2916_s11 }
  0x1f   : > { %p2919_p1 = pnand %p2917_p0, %p3100_p7 }
  0x20   : > { %p2926_p2 = por %p2925_p8, %p2924_p6 }
  0x21   : > { %p2920_p4 = pneg %p2919_p1 }
  0x23   : > { %p2927_p10 = pnand %p2926_p2, %p2920_p4 }
  0x25   : > { %2930 = shalt.err (!%p2927_p10)
}
  0x26   : > { %s2997_s15 = smov [#allocation8]   ;;  %s2931_s12 = scalar_lea.vmem %s3082_s20, 32 }
  0x27   : > { %2869 = dma.vmem_to_smem (!%p3086_p5), %s3075_s17, 16, %s2997_s15, [#allocation9]  }
  0x28   : > { %p2932_p9 = scmp.ne.s32.totalorder %s3082_s20, %s2931_s12  ;;  %p2939_p13 = scmp.lt.s32.totalorder %s3082_s20, %s3082_s20 }
  0x29   : > { %p2940_p0 = scmp.lt.s32.totalorder %s2931_s12, %s2931_s12 }
  0x2a   : > { %p2934_p11 = pnand %p2932_p9, %p3100_p7 }
  0x2b   : > { %p2941_p1 = por %p2940_p0, %p2939_p13 }
  0x2c   : > { %p2935_p12 = pneg %p2934_p11 }
  0x2e   : > { %p2942_p2 = pnand %p2941_p1, %p2935_p12 }
  0x30   : > { %2945 = shalt.err (!%p2942_p2)
}
  0x31   : > { %s2998_s16 = smov [#allocation3]   ;;  %s2946_s17 = scalar_lea.vmem %s3093_s24, 16 }
  0x32   : > { %2860 = dma.vmem_to_smem (!%p3086_p5), %s3082_s20, 32, %s2998_s16, [#allocation4]  }
  0x33   : > { %p2947_p4 = scmp.ne.s32.totalorder %s3093_s24, %s2946_s17  ;;  %p2954_p10 = scmp.lt.s32.totalorder %s3093_s24, %s3093_s24 }
  0x34   : > { %p2955_p9 = scmp.lt.s32.totalorder %s2946_s17, %s2946_s17 }
  0x35   : > { %p2949_p6 = pnand %p2947_p4, %p3100_p7 }
  0x36   : > { %p2956_p11 = por %p2955_p9, %p2954_p10 }
  0x37   : > { %p2950_p8 = pneg %p2949_p6 }
  0x39   : > { %p2957_p12 = pnand %p2956_p11, %p2950_p8 }
  0x3b   : > { %2960 = shalt.err (!%p2957_p12)
}
  0x3c   : > { %s2999_s18 = smov [#allocation7]   ;;  %s2961_s20 = scalar_lea.vmem %s320_s27, 16 }
  0x3d   : > { %2866 = dma.vmem_to_smem (!%p3086_p5), %s3093_s24, 16, %s2999_s18, [#allocation6]  }
  0x3e   : > { %p2962_p13 = scmp.ne.s32.totalorder %s320_s27, %s2961_s20  ;;  %p2969_p2 = scmp.lt.s32.totalorder %s320_s27, %s320_s27 }
  0x3f   : > { %p2970_p4 = scmp.lt.s32.totalorder %s2961_s20, %s2961_s20 }
  0x40   : > { %p2964_p0 = pnand %p2962_p13, %p3100_p7 }
  0x41   : > { %p2971_p6 = por %p2970_p4, %p2969_p2 }
  0x42   : > { %p2965_p1 = pneg %p2964_p0 }
  0x44   : > { %p2972_p8 = pnand %p2971_p6, %p2965_p1 }
  0x46   : > { %2975 = shalt.err (!%p2972_p8)
}
  0x47   : > { %s3000_s23 = smov [#allocation10]   ;;  %364 = sbr.rel (%p3068_p3) target bundleno = 909 (0x38d), region = 56 }
  0x48   : > { %2872 = dma.vmem_to_smem (!%p3086_p5), %s320_s27, 16, %s3000_s23, [#allocation9]  }
  0x4e   : > { %p4971_p10 = scmp.eq.s32.totalorder %s3063_s13, 0 }
  0x50   : > { %2981 = dma.done.wait (%p4971_p10), [#allocation4], 32   ;;  %p4972_p9 = pmov %p4971_p10 }
  0x52   : > { %2983 = vsyncadd (%p4972_p9), [#allocation4], 4294967264  ;;  %p4973_p7 = pmov %p4972_p9 }
  0x54   : > { %2985 = dma.done.wait (%p4973_p7), [#allocation6], 32   ;;  %p4974_p11 = pmov %p4973_p7 }
  0x55   : > { %p4975_p12 = pmov %p4973_p7 }
  0x56   : > { %2987 = vsyncadd (%p4974_p11), [#allocation6], 4294967264 }
  0x57   : > { %2989 = dma.done.wait (%p4975_p12), [#allocation9], 32   ;;  %p4976_p5 = pmov %p4973_p7 }
  0x59   : > { %2991 = vsyncadd (%p4976_p5), [#allocation9], 4294967264 }
  0x5a   : > { %386 = sfence }
  0x5b   : > { %p430_p3 = scmp.lt.s32.totalorder %s3063_s13, 1  ;;  %s2667_s14 = sld [smem:[#allocation5 + $0xa]]  ;;  %vm514_vm2 = vcmask 146432   ;;  %vm517_vm3 = vcmask 140288   ;;  %vm2416_vm4 = vcmask 130048  }
  0x5c   : > { %s2665_s21 = sld [smem:[#allocation5 + $0x9]]  ;;  %s3161_s25 = sld [smem:[#allocation5 + $0xb]] }
  0x5d   : > { %s3159_s24 = scalar_select %p430_p3, %s3063_s13, 1 }
  0x5e   : > { %s2644_s26 = sshll.u32 %s3063_s13, 7  ;;  %s3169_s29 = sld [smem:[#allocation5 + $0xc]] }
  0x5f   : > { %s3165_s27 = smul.u32 72, %s3159_s24  ;;  %s3167_s28 = sld [smem:[#allocation3 + %s2644_s26]] }
  0x60   : > { %s4977_s1 = sld [smem:[#allocation35_spill]]  ;;  %s3183_s13 = sld [smem:[#allocation5 + $0xd]] }
  0x61   : > { %v678_v1 = vstv %s2667_s14  ;;  %s4938_s12 = smov 127   ;;  %s3198_s17 = sld [smem:[#allocation5 + $0xe]] }
  0x62   : > { %v650_v3 = vstv %s2665_s21  ;;  %v706_v6 = vstv %s3161_s25  ;;  %s3002_s19 = smov 0.0   ;;  %s3205_s20 = sld [smem:[#allocation5 + $0xf]] }
  0x63   : > { %s3215_s23 = sld [smem:[#allocation5 + $0x10]]  ;;  %s3225_s14 = sld [smem:[#allocation5 + $0x11]] }
  0x64   : > { %v734_v10 = vstv %s3169_s29  ;;  %s2683_s21 = sld [smem:[#allocation5 + $0x12]]  ;;  %s2685_s25 = sld [smem:[#allocation5 + $0x13]] }
  0x65   : > { %s455_s16 = smul.f32 %s3167_s28, %s3167_s28  ;;  %s2687_s26 = sld [smem:[#allocation5 + $0x14]]  ;;  %v476_v57 = vstv %s3167_s28 }
  0x66   : > { %s3175_s15 = scalar_lea.vmem %s4977_s1, %s3165_s27  ;;  %v762_v14 = vstv %s3183_s13  ;;  %s4936_s29 = smov 126  }
  0x67   : > { %v3178_v0 = vld [vmem:[%s3175_s15 + $0x8] sm:$0xff]  ;;  %v3181_v2 = vld [vmem:[%s3175_s15] sm:$0xff]  ;;  %s456_s18 = ssub.f32 1.0, %s455_s16  ;;  %v3212_v17 = vld [vmem:[%s3175_s15 + $0x18] sm:$0xff]  ;;  %v790_v18 = vstv %s3198_s17  ;;  %s4978_s2 = sld [smem:[#allocation36_spill]] }
  0x68   : > { %v680_v4 = vmul.f32 %v678_v1, %v3178_v0  ;;  %v651_v5 = vmul.f32 %v650_v3, %v3181_v2  ;;  %v652_v7 = vmul.f32 %v650_v3, %v3178_v0  ;;  %v708_v8 = vmul.f32 %v706_v6, %v3178_v0  ;;  %v3195_v9 = vld [vmem:[%s3175_s15 + $0x20] sm:$0xff]  ;;  %v3222_v21 = vld [vmem:[%s3175_s15 + $0x38] sm:$0xff]  ;;  %v3237_v33 = vld [vmem:[%s3175_s15 + $0x30] sm:$0xff]  ;;  %s4979_s3 = sld [smem:[#allocation37_spill]]  ;;  %s3298_s10 = sld [smem:[#allocation5 + $0x7]] }
  0x69   : > { %v679_v11 = vmul.f32 %v678_v1, %v3181_v2  ;;  %s457_s22 = smax.f32 %s3002_s19, %s456_s18  ;;  %v736_v12 = vmul.f32 %v3195_v9, %v734_v10  ;;  %v707_v15 = vmul.f32 %v706_v6, %v3181_v2  ;;  %v764_v16 = vmul.f32 %v3195_v9, %v762_v14  ;;  %s3277_s19 = sld [smem:[#allocation7 + $0xa]] }
  0x6a   : > { %685 = vrot.lane.b32.xlu1 %v680_v4, %s4938_s12  ;;  %655 = vrot.lane.b32.xlu0 %v651_v5, %s4938_s12  ;;  %v458_v13 = vstv %s457_s22  ;;  %v735_v19 = vmul.f32 %v3212_v17, %v734_v10  ;;  %v792_v20 = vmul.f32 %v3195_v9, %v790_v18  ;;  %v818_v22 = vstv %s3205_s20  ;;  %s3280_s22 = sld [smem:[#allocation7 + $0xb]]  ;;  %s3282_s20 = sld [smem:[#allocation7 + $0xc]] }
  0x6b   : > { %2899 = vrsqrt.f32 %v458_v13  ;;  %vm461_vm0 = vcmp.eq.f32.partialorder %v458_v13, inf  ;;  %v464_v24 = vand.u32 2147483648, %v458_v13  ;;  %v763_v25 = vmul.f32 %v3212_v17, %v762_v14  ;;  %s3300_s11 = sld [smem:[#allocation7 + $0x4]]  ;;  %s3304_s16 = sld [smem:[#allocation7 + $0x7]] }
  0x6c   : > { %v820_v26 = vmul.f32 %v3222_v21, %v818_v22  ;;  %vm463_vm1 = vcmp.eq.f32.partialorder %v458_v13, 0.0  ;;  %v846_v28 = vstv %s3215_s23  ;;  %v791_v31 = vmul.f32 %v3212_v17, %v790_v18  ;;  %s3286_s23 = sld [smem:[#allocation7 + $0xd]]  ;;  %s3306_s17 = sld [smem:[#allocation7]] }
  0x6d   : > { %v848_v32 = vmul.f32 %v3222_v21, %v846_v28  ;;  %v874_v34 = vstv %s3225_s14  ;;  %v819_v35 = vmul.f32 %v3237_v33, %v818_v22  ;;  %v902_v37 = vstv %s2683_s21  ;;  %s439_s13 = scalar_lea.vmem %s4978_s2, %s3165_s27  ;;  %s3288_s14 = sld [smem:[#allocation5 + $0x1]] }
  0x6e   : > { %713 = vrot.lane.b32.xlu1 %v708_v8, %s4938_s12  ;;  %657 = vrot.lane.b32.xlu0 %v652_v7, %s4938_s12  ;;  %v876_v36 = vmul.f32 %v3222_v21, %v874_v34  ;;  %v847_v38 = vmul.f32 %v3237_v33, %v846_v28  ;;  %v904_v39 = vmul.f32 %v902_v37, %v3178_v0  ;;  %v930_v40 = vstv %s2685_s25  ;;  %s3270_s18 = scalar_lea.vmem %s4979_s3, %s3165_s27  ;;  %v467_v48 = vld [vmem:[%s439_s13] sm:$0xff]  ;;  %s3275_s27 = sld [smem:[#allocation7 + $0x9]] }
  0x6f   : > { %v875_v41 = vmul.f32 %v3237_v33, %v874_v34  ;;  %v932_v42 = vmul.f32 %v930_v40, %v3178_v0  ;;  %v958_v43 = vstv %s2687_s26  ;;  %v903_v44 = vmul.f32 %v902_v37, %v3181_v2  ;;  %v468_v49 = vld [vmem:[%s439_s13 + $0x8] sm:$0xff]  ;;  %v469_v50 = vld [vmem:[%s439_s13 + $0x10] sm:$0x3]  ;;  %v470_v51 = vld [vmem:[%s439_s13 + $0x18] sm:$0xff]  ;;  %s3293_s25 = sld [smem:[#allocation5 + $0x4]]  ;;  %s3296_s26 = sld [smem:[#allocation7 + $0x1]] }
  0x70   : > { %v960_v45 = vmul.f32 %v958_v43, %v3178_v0  ;;  %v931_v46 = vmul.f32 %v930_v40, %v3181_v2  ;;  %v959_v47 = vmul.f32 %v958_v43, %v3181_v2  ;;  %v471_v52 = vld [vmem:[%s439_s13 + $0x20] sm:$0xff]  ;;  %v472_v53 = vld [vmem:[%s439_s13 + $0x28] sm:$0x3]  ;;  %v473_v54 = vld [vmem:[%s439_s13 + $0x30] sm:$0xff]  ;;  %v477_v61 = vmul.f32 %v476_v57, %v467_v48  ;;  %s3319_s0 = sld [smem:[#allocation5 + $0x5]]  ;;  %s3321_s1 = sld [smem:[#allocation5 + $0x8]] }
  0x71   : > { %v474_v55 = vld [vmem:[%s439_s13 + $0x38] sm:$0xff]  ;;  %v475_v56 = vld [vmem:[%s439_s13 + $0x40] sm:$0x3]  ;;  %v487_v59 = vld [vmem:[%s3270_s18 + $0x8] sm:$0xff]  ;;  %v478_v62 = vmul.f32 %v476_v57, %v468_v49  ;;  %v479_v3 = vmul.f32 %v476_v57, %v469_v50  ;;  %v480_v4 = vmul.f32 %v476_v57, %v470_v51  ;;  %v481_v5 = vmul.f32 %v476_v57, %v471_v52  ;;  %s3302_s13 = sld [smem:[#allocation5]]  ;;  %s3327_s2 = sld [smem:[#allocation7 + $0x6]] }
  0x72   : > { %683 = vrot.lane.b32.xlu0 %v679_v11, %s4938_s12  ;;  %741 = vrot.lane.b32.xlu1 %v736_v12, %s4938_s12  ;;  %v486_v58 = vld [vmem:[%s3270_s18] sm:$0xff]  ;;  %v488_v60 = vld [vmem:[%s3270_s18 + $0x10] sm:$0x3]  ;;  %v482_v6 = vmul.f32 %v476_v57, %v472_v53  ;;  %v483_v11 = vmul.f32 %v476_v57, %v473_v54  ;;  %v484_v12 = vmul.f32 %v476_v57, %v474_v55  ;;  %s3333_s3 = sld [smem:[#allocation7 + $0x2]]  ;;  %s3339_s5 = sld [smem:[#allocation7 + $0x5]] }
  0x73   : > { %v489_v63 = vld [vmem:[%s3270_s18 + $0x18] sm:$0xff]  ;;  %v490_v1 = vld [vmem:[%s3270_s18 + $0x20] sm:$0xff]  ;;  %v491_v7 = vld [vmem:[%s3270_s18 + $0x28] sm:$0x3]  ;;  %v542_v37 = vstv %s3288_s14  ;;  %s3535_s14 = sld [smem:[#allocation5 + $0x16]] }
  0x74   : > { %v492_v8 = vld [vmem:[%s3270_s18 + $0x30] sm:$0xff]  ;;  %v493_v10 = vld [vmem:[%s3270_s18 + $0x38] sm:$0xff]  ;;  %v494_v14 = vld [vmem:[%s3270_s18 + $0x40] sm:$0x3]  ;;  %s3308_s18 = sld [smem:[#allocation5 + $0x3]]  ;;  %v692_v40 = vstv %s3277_s19  ;;  %v544_v50 = vmul.f32 %v542_v37, %v3178_v0  ;;  %s4980_s19 = smov 127  }
  0x75   : > { %v2900_v23 = vpop.eup %2899  ;;  %v748_v43 = vstv %s3282_s20  ;;  %v590_v48 = vstv %s3300_s11  ;;  %v632_v49 = vstv %s3304_s16  ;;  %s4981_s20 = smov 126   ;;  %s3571_s11 = sld [smem:[#allocation5 + $0x18]] }
  0x76   : > { %711 = vrot.lane.b32.xlu0 %v707_v15, %s4938_s12  ;;  %769 = vrot.lane.b32.xlu1 %v764_v16, %s4938_s12  ;;  %v460_v27 = vmul.f32 %v2900_v23, %v458_v13  ;;  %s3593_s16 = sld [smem:[#allocation5 + $0x19]] }
  0x78   : > { %v462_v29 = vsel %vm461_vm0, %v458_v13, %v460_v27  ;;  %v485_v13 = vmul.f32 %v476_v57, %v475_v56  ;;  %v536_v56 = vstv %s3306_s17  ;;  %s3606_s17 = sld [smem:[#allocation7 + $0x19]] }
  0x79   : > { %v465_v30 = vsel %vm463_vm1, %v464_v24, %v462_v29 }
  0x7a   : > { %739 = vrot.lane.b32.xlu0 %v735_v19, %s4938_s12  ;;  %797 = vrot.lane.b32.xlu1 %v792_v20, %s4938_s12  ;;  %2829 = vpush %v465_v30  ;;  %v572_v52 = vstv %s3308_s18  ;;  %s3611_s18 = sld [smem:[#allocation5 + $0x1a]] }
  0x7e   : > { %767 = vrot.lane.b32.xlu0 %v763_v25, %s4938_s12  ;;  %825 = vrot.lane.b32.xlu1 %v820_v26, %s4938_s12 }
  0x82   : > { %795 = vrot.lane.b32.xlu0 %v791_v31, %s4938_s12  ;;  %853 = vrot.lane.b32.xlu1 %v848_v32, %s4938_s12 }
  0x86   : > { %823 = vrot.lane.b32.xlu0 %v819_v35, %s4938_s12  ;;  %881 = vrot.lane.b32.xlu1 %v876_v36, %s4938_s12 }
  0x8a   : > { %851 = vrot.lane.b32.xlu0 %v847_v38, %s4938_s12  ;;  %909 = vrot.lane.b32.xlu1 %v904_v39, %s4936_s29  ;;  %v584_v38 = vstv %s3293_s25  ;;  %v664_v39 = vstv %s3275_s27  ;;  %s3354_s27 = sld [smem:[#allocation7 + $0x8]]  ;;  %s3546_s25 = sld [smem:[#allocation7 + $0x16]] }
  0x8b   : > { %v3357_v54 = vmul.f32 %v3212_v17, %v584_v38 }
  0x8e   : > { %879 = vrot.lane.b32.xlu0 %v875_v41, %s4938_s12  ;;  %937 = vrot.lane.b32.xlu1 %v932_v42, %s4936_s29  ;;  %s3314_s12 = sld [smem:[#allocation5 + $0x2]]  ;;  %v720_v41 = vstv %s3280_s22  ;;  %v626_v42 = vstv %s3298_s10  ;;  %s3521_s22 = sld [smem:[#allocation5 + $0x15]] }
  0x8f   : > { %v3350_v51 = vmul.f32 %v3222_v21, %v626_v42  ;;  %s3566_s10 = sld [smem:[#allocation7 + $0x17]] }
  0x92   : > { %907 = vrot.lane.b32.xlu0 %v903_v44, %s4936_s29  ;;  %965 = vrot.lane.b32.xlu1 %v960_v45, %s4936_s29  ;;  %v776_v44 = vstv %s3286_s23  ;;  %v548_v45 = vstv %s3296_s26  ;;  %s3530_s23 = sld [smem:[#allocation7 + $0x15]]  ;;  %s3553_s26 = sld [smem:[#allocation5 + $0x17]] }
  0x96   : > { %935 = vrot.lane.b32.xlu0 %v931_v46, %s4936_s29  ;;  %v530_v46 = vstv %s3302_s13  ;;  %s3584_s13 = sld [smem:[#allocation7 + $0x18]] }
  0x9a   : > { %963 = vrot.lane.b32.xlu0 %v959_v47, %s4936_s29  ;;  %s3312_s29 = sld [smem:[#allocation7 + $0x3]]  ;;  %v586_v47 = vmul.f32 %v3195_v9, %v584_v38 }
  0xa0   : > { %v578_v57 = vstv %s3312_s29  ;;  %s3476_s29 = sld [smem:[#allocation7 + $0x11]] }
  0xab   : > { %s2830_s21 = spop %2829 }
  0xac   : > { %v495_v15 = vstv %s2830_s21  ;;  %s3310_s21 = sld [smem:[#allocation5 + $0x6]] }
  0xad   : > { %v496_v16 = vmul.f32 %v495_v15, %v486_v58  ;;  %v497_v18 = vmul.f32 %v495_v15, %v487_v59  ;;  %v498_v19 = vmul.f32 %v495_v15, %v488_v60  ;;  %v499_v20 = vmul.f32 %v495_v15, %v489_v63 }
  0xae   : > { %v500_v22 = vmul.f32 %v495_v15, %v490_v1  ;;  %v501_v23 = vmul.f32 %v495_v15, %v491_v7  ;;  %v502_v24 = vmul.f32 %v495_v15, %v492_v8  ;;  %v503_v25 = vmul.f32 %v495_v15, %v493_v10 }
  0xaf   : > { %v504_v26 = vmul.f32 %v495_v15, %v494_v14  ;;  %v505_v27 = vadd.f32 %v496_v16, %v477_v61  ;;  %v506_v28 = vadd.f32 %v497_v18, %v478_v62  ;;  %v507_v29 = vadd.f32 %v498_v19, %v479_v3 }
  0xb0   : > { %v508_v30 = vadd.f32 %v499_v20, %v480_v4  ;;  %v509_v31 = vadd.f32 %v500_v22, %v481_v5  ;;  %v510_v32 = vadd.f32 %v501_v23, %v482_v6  ;;  %v511_v34 = vadd.f32 %v502_v24, %v483_v11 }
  0xb1   : > { %v512_v35 = vadd.f32 %v503_v25, %v484_v12  ;;  %v513_v36 = vadd.f32 %v504_v26, %v485_v13  ;;  %515 = vst.msk [vmem:[#allocation2] sm:$0xff] %vm514_vm2, %v505_v27  ;;  %516 = vst.msk [vmem:[#allocation2 + $0x8] sm:$0xff] %vm514_vm2, %v506_v28  ;;  %v531_v58 = vmul.f32 %v530_v46, %v3181_v2  ;;  %v554_v59 = vstv %s3314_s12  ;;  %s3377_s12 = sld [smem:[#allocation7 + $0xe]] }
  0xb2   : > { %518 = vst.msk [vmem:[#allocation2 + $0x10] sm:$0x3] %vm517_vm3, %v507_v29  ;;  %521 = vst.msk [vmem:[#allocation2 + $0x28] sm:$0x3] %vm517_vm3, %v510_v32  ;;  %v614_v53 = vstv %s3310_s21  ;;  %v596_v62 = vstv %s3319_s0  ;;  %v638_v63 = vstv %s3321_s1  ;;  %v573_v3 = vmul.f32 %v3212_v17, %v572_v52  ;;  %s3429_s0 = sld [smem:[#allocation7 + $0xf]]  ;;  %s3500_s1 = sld [smem:[#allocation7 + $0x12]] }
  0xb3   : > { %519 = vst.msk [vmem:[#allocation2 + $0x18] sm:$0xff] %vm514_vm2, %v508_v30  ;;  %520 = vst.msk [vmem:[#allocation2 + $0x20] sm:$0xff] %vm514_vm2, %v509_v31  ;;  %v615_v4 = vmul.f32 %v3237_v33, %v614_v53  ;;  %v620_v5 = vstv %s3327_s2  ;;  %v532_v6 = vmul.f32 %v530_v46, %v3178_v0  ;;  %v560_v7 = vstv %s3333_s3  ;;  %s3453_s3 = sld [smem:[#allocation7 + $0x10]]  ;;  %s2686_s2 = sld [smem:[#allocation7 + $0x13]] }
  0xb4   : > { %522 = vst.msk [vmem:[#allocation2 + $0x30] sm:$0xff] %vm514_vm2, %v511_v34  ;;  %523 = vst.msk [vmem:[#allocation2 + $0x38] sm:$0xff] %vm514_vm2, %v512_v35  ;;  %v556_v8 = vmul.f32 %v554_v59, %v3178_v0  ;;  %v574_v10 = vmul.f32 %v3195_v9, %v572_v52  ;;  %v616_v11 = vmul.f32 %v3222_v21, %v614_v53  ;;  %v602_v14 = vstv %s3339_s5  ;;  %s3517_s5 = sld [smem:[#allocation7 + $0x14]]  ;;  %s3624_s21 = sld [smem:[#allocation7 + $0x1a]] }
  0xb5   : > { %524 = vst.msk [vmem:[#allocation2 + $0x40] sm:$0x3] %vm517_vm3, %v513_v36  ;;  %v598_v13 = vmul.f32 %v3195_v9, %v596_v62  ;;  %v640_v15 = vmul.f32 %v3222_v21, %v638_v63  ;;  %v3391_v16 = vmul.f32 %v3237_v33, %v626_v42  ;;  %v543_v20 = vmul.f32 %v542_v37, %v3181_v2 }
  0xb6   : > { %v3406_v26 = vmul.f32 %v3212_v17, %v596_v62  ;;  %v555_v27 = vmul.f32 %v554_v59, %v3181_v2  ;;  %v644_v31 = vstv %s3354_s27  ;;  %s3629_s27 = sld [smem:[#allocation5 + $0x24]] }
  0xb7   : > { %v804_v52 = vstv %s3377_s12  ;;  %s3642_s12 = sld [smem:[#allocation7 + $0x24]] }
  0xb8   : > { %v3359_v55 = vld [vmem:[#allocation2] sm:$0xff]  ;;  %v3369_v1 = vld [vmem:[#allocation2 + $0x8] sm:$0xff] }
  0xb9   : > { %v665_v60 = vmul.f32 %v664_v39, %v3359_v55  ;;  %v693_v61 = vmul.f32 %v692_v40, %v3359_v55  ;;  %v666_v18 = vmul.f32 %v664_v39, %v3369_v1  ;;  %v721_v0 = vmul.f32 %v720_v41, %v3359_v55 }
  0xba   : > { %v3383_v12 = vld [vmem:[#allocation2 + $0x18] sm:$0xff]  ;;  %v550_v19 = vmul.f32 %v548_v45, %v3369_v1  ;;  %v694_v22 = vmul.f32 %v692_v40, %v3369_v1  ;;  %v3400_v23 = vld [vmem:[#allocation2 + $0x20] sm:$0xff]  ;;  %v537_v25 = vmul.f32 %v536_v56, %v3359_v55  ;;  %v562_v30 = vmul.f32 %v560_v7, %v3369_v1 }
  0xbb   : > { %669 = vrot.lane.b32.xlu1 %v665_v60, %s4980_s19  ;;  %697 = vrot.lane.b32.xlu0 %v693_v61, %s4980_s19  ;;  %v3402_v24 = vld [vmem:[#allocation2 + $0x38] sm:$0xff]  ;;  %v749_v28 = vmul.f32 %v748_v43, %v3383_v12  ;;  %v722_v32 = vmul.f32 %v720_v41, %v3369_v1  ;;  %v777_v34 = vmul.f32 %v776_v44, %v3383_v12  ;;  %v3421_v36 = vld [vmem:[#allocation2 + $0x30] sm:$0xff] }
  0xbc   : > { %v552_v29 = vadd.f32 %v550_v19, %v544_v50  ;;  %v539_v2 = vadd.f32 %v537_v25, %v531_v58  ;;  %v538_v35 = vmul.f32 %v536_v56, %v3369_v1  ;;  %v592_v37 = vmul.f32 %v590_v48, %v3400_v23 }
  0xbd   : > { %v634_v38 = vmul.f32 %v632_v49, %v3402_v24  ;;  %v564_v40 = vadd.f32 %v562_v30, %v556_v8  ;;  %v579_v41 = vmul.f32 %v578_v57, %v3383_v12  ;;  %v604_v46 = vmul.f32 %v602_v14, %v3400_v23 }
  0xbe   : > { %v588_v39 = vadd.f32 %v586_v47, %v552_v29  ;;  %v575_v42 = vadd.f32 %v573_v3, %v539_v2  ;;  %v540_v50 = vadd.f32 %v538_v35, %v532_v6  ;;  %v549_v56 = vmul.f32 %v548_v45, %v3359_v55 }
  0xbf   : > { %671 = vrot.lane.b32.xlu1 %v666_v18, %s4980_s19  ;;  %725 = vrot.lane.b32.xlu0 %v721_v0, %s4980_s19  ;;  %v600_v53 = vadd.f32 %v598_v13, %v564_v40  ;;  %v621_v58 = vmul.f32 %v620_v5, %v3421_v36  ;;  %v580_v61 = vmul.f32 %v578_v57, %v3400_v23  ;;  %v888_v35 = vstv %s3476_s29  ;;  %s3677_s29 = sld [smem:[#allocation5 + $0x26]] }
  0xc0   : > { %v594_v47 = vadd.f32 %v592_v37, %v588_v39  ;;  %v581_v59 = vadd.f32 %v579_v41, %v575_v42  ;;  %v576_v60 = vadd.f32 %v574_v10, %v540_v50  ;;  %v646_v3 = vmul.f32 %v644_v31, %v3402_v24 }
  0xc1   : > { %v606_v6 = vadd.f32 %v604_v46, %v600_v53  ;;  %v551_v8 = vadd.f32 %v549_v56, %v543_v20  ;;  %v591_v10 = vmul.f32 %v590_v48, %v3383_v12  ;;  %v561_v18 = vmul.f32 %v560_v7, %v3359_v55 }
  0xc2   : > { %v630_v62 = vadd.f32 %v3350_v51, %v594_v47  ;;  %v617_v45 = vadd.f32 %v615_v4, %v581_v59  ;;  %v582_v13 = vadd.f32 %v580_v61, %v576_v60  ;;  %v750_v4 = vmul.f32 %v748_v43, %v3400_v23 }
  0xc3   : > { %699 = vrot.lane.b32.xlu1 %v694_v22, %s4980_s19  ;;  %753 = vrot.lane.b32.xlu0 %v749_v28, %s4980_s19  ;;  %v642_v57 = vadd.f32 %v640_v15, %v606_v6  ;;  %v587_v0 = vadd.f32 %v3357_v54, %v551_v8  ;;  %v622_v7 = vmul.f32 %v620_v5, %v3402_v24  ;;  %v832_v28 = vstv %s3429_s0  ;;  %s3654_s0 = sld [smem:[#allocation5 + $0x25]] }
  0xc4   : > { %v3461_v51 = vadd.f32 %v634_v38, %v630_v62  ;;  %v3467_v19 = vadd.f32 %v621_v58, %v617_v45  ;;  %v618_v48 = vadd.f32 %v616_v11, %v582_v13  ;;  %v805_v20 = vmul.f32 %v804_v52, %v3383_v12 }
  0xc5   : > { %v3473_v22 = vadd.f32 %v646_v3, %v642_v57  ;;  %v593_v25 = vadd.f32 %v591_v10, %v587_v0  ;;  %v563_v15 = vadd.f32 %v561_v18, %v555_v27  ;;  %v633_v43 = vmul.f32 %v632_v49, %v3421_v36 }
  0xc6   : > { %v3478_v54 = vadd.f32 %v622_v7, %v618_v48  ;;  %v639_v11 = vmul.f32 %v3237_v33, %v638_v63  ;;  %v603_v27 = vmul.f32 %v602_v14, %v3383_v12  ;;  %v778_v30 = vmul.f32 %v776_v44, %v3400_v23 }
  0xc7   : > { %727 = vrot.lane.b32.xlu1 %v722_v32, %s4980_s19  ;;  %781 = vrot.lane.b32.xlu0 %v777_v34, %s4980_s19  ;;  %v629_v5 = vadd.f32 %v3391_v16, %v593_v25  ;;  %v599_v29 = vadd.f32 %v3406_v26, %v563_v15  ;;  %v833_v49 = vmul.f32 %v832_v28, %v3421_v36  ;;  %v860_v34 = vstv %s3453_s3  ;;  %s3669_s3 = sld [smem:[#allocation7 + $0x25]] }
  0xc8   : > { %v645_v14 = vmul.f32 %v644_v31, %v3421_v36  ;;  %v806_v26 = vmul.f32 %v804_v52, %v3400_v23  ;;  %v861_v44 = vmul.f32 %v860_v34, %v3421_v36  ;;  %v834_v37 = vmul.f32 %v832_v28, %v3402_v24 }
  0xc9   : > { %v3497_v32 = vadd.f32 %v633_v43, %v629_v5  ;;  %v605_v63 = vadd.f32 %v603_v27, %v599_v29  ;;  %v889_v38 = vmul.f32 %v888_v35, %v3421_v36  ;;  %v916_v39 = vstv %s3500_s1  ;;  %s3692_s1 = sld [smem:[#allocation7 + $0x26]] }
  0xca   : > { %v862_v31 = vmul.f32 %v860_v34, %v3402_v24  ;;  %v917_v40 = vmul.f32 %v916_v39, %v3359_v55  ;;  %v944_v41 = vstv %s2686_s2  ;;  %v890_v42 = vmul.f32 %v888_v35, %v3402_v24  ;;  %s3697_s2 = sld [smem:[#allocation5 + $0x27]] }
  0xcb   : > { %755 = vrot.lane.b32.xlu1 %v750_v4, %s4980_s19  ;;  %809 = vrot.lane.b32.xlu0 %v805_v20, %s4980_s19  ;;  %v641_v16 = vadd.f32 %v639_v11, %v605_v63  ;;  %v945_v46 = vmul.f32 %v944_v41, %v3359_v55  ;;  %v972_v50 = vstv %s3517_s5  ;;  %v986_v52 = vstv %s3521_s22  ;;  %s3710_s5 = sld [smem:[#allocation7 + $0x27]]  ;;  %s3722_s22 = sld [smem:[#allocation5 + $0x28]] }
  0xcc   : > { %v918_v53 = vmul.f32 %v916_v39, %v3369_v1  ;;  %v973_v56 = vmul.f32 %v972_v50, %v3359_v55  ;;  %v987_v58 = vmul.f32 %v3212_v17, %v986_v52  ;;  %v946_v59 = vmul.f32 %v944_v41, %v3369_v1 }
  0xcd   : > { %v3509_v2 = vadd.f32 %v645_v14, %v641_v16  ;;  %v1000_v60 = vstv %s3530_s23  ;;  %v1014_v62 = vstv %s3535_s14  ;;  %v974_v55 = vmul.f32 %v972_v50, %v3369_v1  ;;  %s3737_s23 = sld [smem:[#allocation7 + $0x28]]  ;;  %s3745_s14 = sld [smem:[#allocation5 + $0x29]] }
  0xce   : > { %v1001_v3 = vmul.f32 %v1000_v60, %v3383_v12  ;;  %v988_v6 = vmul.f32 %v3195_v9, %v986_v52  ;;  %v1015_v8 = vmul.f32 %v3212_v17, %v1014_v62  ;;  %v1028_v10 = vstv %s3546_s25  ;;  %s3764_s25 = sld [smem:[#allocation7 + $0x29]] }
  0xcf   : > { %783 = vrot.lane.b32.xlu1 %v778_v30, %s4980_s19  ;;  %837 = vrot.lane.b32.xlu0 %v833_v49, %s4980_s19  ;;  %v1042_v1 = vstv %s3553_s26  ;;  %v1002_v18 = vmul.f32 %v1000_v60, %v3400_v23  ;;  %v1029_v57 = vmul.f32 %v1028_v10, %v3383_v12  ;;  %v1016_v48 = vmul.f32 %v3195_v9, %v1014_v62  ;;  %v3666_v60 = vld [vmem:[#allocation2 + $0x1] sm:$0xff]  ;;  %s3769_s26 = sld [smem:[#allocation5 + $0x2a]] }
  0xd0   : > { %v1043_v7 = vmul.f32 %v3212_v17, %v1042_v1  ;;  %v1056_v20 = vstv %s3566_s10  ;;  %v1070_v28 = vstv %s3571_s11  ;;  %v1030_v43 = vmul.f32 %v1028_v10, %v3400_v23  ;;  %s3781_s10 = sld [smem:[#allocation5 + $0x2b]]  ;;  %s3800_s11 = sld [smem:[#allocation7 + $0x2a]] }
  0xd1   : > { %v1057_v17 = vmul.f32 %v1056_v20, %v3383_v12  ;;  %v1044_v11 = vmul.f32 %v3195_v9, %v1042_v1  ;;  %v1071_v5 = vmul.f32 %v3237_v33, %v1070_v28  ;;  %v1084_v30 = vstv %s3584_s13  ;;  %s3811_s13 = sld [smem:[#allocation7 + $0x2b]] }
  0xd2   : > { %v1098_v12 = vstv %s3593_s16  ;;  %v1058_v9 = vmul.f32 %v1056_v20, %v3400_v23  ;;  %v1085_v49 = vmul.f32 %v1084_v30, %v3421_v36  ;;  %v1072_v63 = vmul.f32 %v3222_v21, %v1070_v28  ;;  %s3819_s16 = sld [smem:[#allocation5 + $0x2c]] }
  0xd3   : > { %811 = vrot.lane.b32.xlu1 %v806_v26, %s4980_s19  ;;  %865 = vrot.lane.b32.xlu0 %v861_v44, %s4980_s19  ;;  %v1099_v34 = vmul.f32 %v3237_v33, %v1098_v12  ;;  %v1112_v26 = vstv %s3606_s17  ;;  %v1126_v23 = vstv %s3611_s18  ;;  %v1086_v44 = vmul.f32 %v1084_v30, %v3402_v24  ;;  %s3838_s17 = sld [smem:[#allocation7 + $0x2c]]  ;;  %s3844_s18 = sld [smem:[#allocation5 + $0x2d]] }
  0xd4   : > { %v1113_v35 = vmul.f32 %v1112_v26, %v3421_v36  ;;  %v1100_v39 = vmul.f32 %v3222_v21, %v1098_v12  ;;  %v1274_v50 = vstv %s3629_s27  ;;  %v1288_v62 = vstv %s3642_s12  ;;  %v3719_v12 = vld [vmem:[%s3175_s15 + $0x19] sm:$0xff]  ;;  %s3873_s27 = sld [smem:[#allocation7 + $0x2d]]  ;;  %s3877_s12 = sld [smem:[#allocation7 + $0x2e]] }
  0xd7   : > { %839 = vrot.lane.b32.xlu1 %v834_v37, %s4980_s19  ;;  %893 = vrot.lane.b32.xlu0 %v889_v38, %s4980_s19 }
  0xdb   : > { %867 = vrot.lane.b32.xlu1 %v862_v31, %s4980_s19  ;;  %921 = vrot.lane.b32.xlu0 %v917_v40, %s4981_s20  ;;  %v1127_v31 = vmul.f32 %v3237_v33, %v1126_v23  ;;  %v1140_v40 = vstv %s3624_s21  ;;  %v1114_v33 = vmul.f32 %v1112_v26, %v3402_v24  ;;  %s3856_s21 = sld [smem:[#allocation5 + $0x2e]] }
  0xdc   : > { %v3537_v47 = vpop.permute.xlu0 %655  ;;  %v3561_v45 = vpop.permute.xlu1 %685  ;;  %v1141_v52 = vmul.f32 %v1140_v40, %v3421_v36  ;;  %v3674_v36 = vld [vmem:[%s3175_s15 + $0x9] sm:$0xff] }
  0xdf   : > { %895 = vrot.lane.b32.xlu1 %v890_v42, %s4980_s19  ;;  %949 = vrot.lane.b32.xlu0 %v945_v46, %s4981_s20  ;;  %v3651_v46 = vld [vmem:[%s3175_s15 + $0x1] sm:$0xff] }
  0xe0   : > { %v3548_v61 = vpop.permute.xlu0 %657  ;;  %v3575_v0 = vpop.permute.xlu1 %713 }
  0xe3   : > { %923 = vrot.lane.b32.xlu1 %v918_v53, %s4981_s20  ;;  %977 = vrot.lane.b32.xlu0 %v973_v56, %s4981_s20  ;;  %v1128_v53 = vmul.f32 %v3222_v21, %v1126_v23  ;;  %v1275_v56 = vmul.f32 %v1274_v50, %v3651_v46  ;;  %v1142_v21 = vmul.f32 %v1140_v40, %v3402_v24  ;;  %v1330_v24 = vstv %s3677_s29  ;;  %s3887_s29 = sld [smem:[#allocation7 + $0x1c]] }
  0xe4   : > { %v3563_v13 = vpop.permute.xlu0 %683  ;;  %v3588_v25 = vpop.permute.xlu1 %741  ;;  %v1386_v40 = vstv %s3722_s22  ;;  %s3901_s22 = sld [smem:[#allocation7 + $0x1e]] }
  0xe7   : > { %951 = vrot.lane.b32.xlu1 %v946_v59, %s4981_s20  ;;  %991 = vrot.lane.b32.xlu0 %v987_v58, %s4981_s20 }
  0xe8   : > { %v3577_v4 = vpop.permute.xlu0 %711  ;;  %v3601_v27 = vpop.permute.xlu1 %769 }
  0xeb   : > { %979 = vrot.lane.b32.xlu1 %v974_v55, %s4981_s20  ;;  %1005 = vrot.lane.b32.xlu0 %v1001_v3, %s4981_s20  ;;  %v1302_v55 = vstv %s3654_s0  ;;  %v1289_v3 = vmul.f32 %v1288_v62, %v3666_v60  ;;  %s3879_s0 = sld [smem:[#allocation7 + $0x2f]] }
  0xec   : > { %v3590_v15 = vpop.permute.xlu0 %739  ;;  %v3619_v14 = vpop.permute.xlu1 %797 }
  0xed   : > { %4982 = vst [vmem:[#allocation14_spill] sm:$0xff] %v3619_v14 }
  0xef   : > { %993 = vrot.lane.b32.xlu1 %v988_v6, %s4981_s20  ;;  %1019 = vrot.lane.b32.xlu0 %v1015_v8, %s4981_s20  ;;  %v1276_v6 = vmul.f32 %v1274_v50, %v3674_v36  ;;  %v1303_v8 = vmul.f32 %v1302_v55, %v3651_v46 }
  0xf0   : > { %v3603_v29 = vpop.permute.xlu0 %767  ;;  %v3633_v37 = vpop.permute.xlu1 %825 }
  0xf3   : > { %1007 = vrot.lane.b32.xlu1 %v1002_v18, %s4981_s20  ;;  %1033 = vrot.lane.b32.xlu0 %v1029_v57, %s4981_s20  ;;  %v3689_v18 = vld [vmem:[#allocation2 + $0x9] sm:$0xff]  ;;  %v1316_v57 = vstv %s3669_s3  ;;  %s3885_s3 = sld [smem:[#allocation7 + $0x1b]] }
  0xf4   : > { %v3621_v16 = vpop.permute.xlu0 %795  ;;  %v3646_v41 = vpop.permute.xlu1 %853  ;;  %4984 = vst [vmem:[#allocation16_spill] sm:$0xff] %v3689_v18 }
  0xf7   : > { %1021 = vrot.lane.b32.xlu1 %v1016_v48, %s4981_s20  ;;  %1047 = vrot.lane.b32.xlu0 %v1043_v7, %s4981_s20  ;;  %v1290_v48 = vmul.f32 %v1288_v62, %v3689_v18  ;;  %v1317_v7 = vmul.f32 %v1316_v57, %v3666_v60  ;;  %v1387_v62 = vmul.f32 %v3719_v12, %v1386_v40 }
  0xf8   : > { %v3635_v38 = vpop.permute.xlu0 %823  ;;  %v3662_v58 = vpop.permute.xlu1 %881 }
  0xf9   : > { %4983 = vst [vmem:[#allocation15_spill] sm:$0xff] %v3662_v58 }
  0xfb   : > { %1035 = vrot.lane.b32.xlu1 %v1030_v43, %s4981_s20  ;;  %1061 = vrot.lane.b32.xlu0 %v1057_v17, %s4981_s20  ;;  %v1304_v43 = vmul.f32 %v1302_v55, %v3674_v36  ;;  %v1331_v17 = vmul.f32 %v1330_v24, %v3651_v46 }
  0xfc   : > { %v3648_v42 = vpop.permute.xlu0 %851  ;;  %v3685_v10 = vpop.permute.xlu1 %909 }
  0xff   : > { %1049 = vrot.lane.b32.xlu1 %v1044_v11, %s4981_s20  ;;  %1075 = vrot.lane.b32.xlu0 %v1071_v5, %s4981_s20  ;;  %v1344_v11 = vstv %s3692_s1  ;;  %s3891_s1 = sld [smem:[#allocation7 + $0x30]] }
 0x100   : > { %v3664_v59 = vpop.permute.xlu0 %879  ;;  %v3701_v20 = vpop.permute.xlu1 %937 }
 0x101   : > { %4985 = vst [vmem:[#allocation17_spill] sm:$0xff] %v3701_v20  ;;  %v1484_v20 = vstv %s3811_s13  ;;  %s3971_s13 = sld [smem:[#allocation5 + $0x1b]] }
 0x103   : > { %1063 = vrot.lane.b32.xlu1 %v1058_v9, %s4981_s20  ;;  %1089 = vrot.lane.b32.xlu0 %v1085_v49, %s4981_s20  ;;  %v1358_v9 = vstv %s3697_s2  ;;  %v1318_v49 = vmul.f32 %v1316_v57, %v3689_v18  ;;  %s3893_s2 = sld [smem:[#allocation7 + $0x31]] }
 0x104   : > { %v3687_v1 = vpop.permute.xlu0 %907  ;;  %v3714_v5 = vpop.permute.xlu1 %965  ;;  %v1359_v26 = vmul.f32 %v3719_v12, %v1358_v9 }
 0x105   : > { %4986 = vst [vmem:[#allocation18_spill] sm:$0xff] %v3714_v5  ;;  %v1456_v5 = vstv %s3800_s11  ;;  %s3957_s11 = sld [smem:[#allocation5 + $0x30]] }
 0x107   : > { %1077 = vrot.lane.b32.xlu1 %v1072_v63, %s4981_s20  ;;  %1103 = vrot.lane.b32.xlu0 %v1099_v34, %s4981_s20  ;;  %v1345_v63 = vmul.f32 %v1344_v11, %v3666_v60  ;;  %v1332_v34 = vmul.f32 %v1330_v24, %v3674_v36 }
 0x108   : > { %v3703_v28 = vpop.permute.xlu0 %935 }
 0x10b   : > { %1091 = vrot.lane.b32.xlu1 %v1086_v44, %s4981_s20  ;;  %1117 = vrot.lane.b32.xlu0 %v1113_v35, %s4981_s20  ;;  %v3734_v35 = vld [vmem:[#allocation2 + $0x19] sm:$0xff] }
 0x10c   : > { %v3716_v30 = vpop.permute.xlu0 %963 }
 0x10d   : > { %4987 = vst [vmem:[#allocation19_spill] sm:$0xff] %v3716_v30 }
 0x10f   : > { %1105 = vrot.lane.b32.xlu1 %v1100_v39, %s4981_s20  ;;  %1131 = vrot.lane.b32.xlu0 %v1127_v31, %s4981_s20  ;;  %v1372_v39 = vstv %s3710_s5  ;;  %v3742_v31 = vld [vmem:[%s3175_s15 + $0x21] sm:$0xff]  ;;  %s3899_s5 = sld [smem:[#allocation7 + $0x1d]] }
 0x110   : > { %4988 = vst [vmem:[#allocation20_spill] sm:$0xff] %v3742_v31 }
 0x113   : > { %1119 = vrot.lane.b32.xlu1 %v1114_v33, %s4981_s20  ;;  %1145 = vrot.lane.b32.xlu0 %v1141_v52, %s4981_s20  ;;  %v1346_v52 = vmul.f32 %v1344_v11, %v3689_v18 }
 0x117   : > { %1133 = vrot.lane.b32.xlu1 %v1128_v53, %s4981_s20  ;;  %1279 = vrot.lane.b32.xlu0 %v1275_v56, %s4980_s19  ;;  %v1373_v53 = vmul.f32 %v1372_v39, %v3734_v35  ;;  %v1360_v56 = vmul.f32 %v3742_v31, %v1358_v9 }
 0x11b   : > { %1147 = vrot.lane.b32.xlu1 %v1142_v21, %s4981_s20  ;;  %1293 = vrot.lane.b32.xlu0 %v1289_v3, %s4980_s19  ;;  %v3761_v3 = vld [vmem:[#allocation2 + $0x21] sm:$0xff] }
 0x11f   : > { %1281 = vrot.lane.b32.xlu1 %v1276_v6, %s4980_s19  ;;  %1307 = vrot.lane.b32.xlu0 %v1303_v8, %s4980_s19  ;;  %v1400_v6 = vstv %s3737_s23  ;;  %v1414_v8 = vstv %s3745_s14  ;;  %s3903_s23 = sld [smem:[#allocation7 + $0x21]]  ;;  %s3905_s14 = sld [smem:[#allocation7 + $0x32]] }
 0x123   : > { %1295 = vrot.lane.b32.xlu1 %v1290_v48, %s4980_s19  ;;  %1321 = vrot.lane.b32.xlu0 %v1317_v7, %s4980_s19  ;;  %v1374_v48 = vmul.f32 %v1372_v39, %v3761_v3  ;;  %v1401_v7 = vmul.f32 %v1400_v6, %v3734_v35 }
 0x127   : > { %1309 = vrot.lane.b32.xlu1 %v1304_v43, %s4980_s19  ;;  %1335 = vrot.lane.b32.xlu0 %v1331_v17, %s4980_s19  ;;  %v1388_v43 = vmul.f32 %v3742_v31, %v1386_v40  ;;  %v1415_v17 = vmul.f32 %v3719_v12, %v1414_v8  ;;  %v1402_v40 = vmul.f32 %v1400_v6, %v3761_v3 }
 0x12b   : > { %1323 = vrot.lane.b32.xlu1 %v1318_v49, %s4980_s19  ;;  %1349 = vrot.lane.b32.xlu0 %v1345_v63, %s4980_s19  ;;  %v1428_v49 = vstv %s3764_s25  ;;  %v3791_v63 = vld [vmem:[%s3175_s15 + $0x31] sm:$0xff]  ;;  %s3910_s25 = sld [smem:[#allocation7 + $0x1f]] }
 0x12c   : > { %4989 = vst [vmem:[#allocation21_spill] sm:$0xff] %v3791_v63 }
 0x12d   : > { %v3730_v23 = vpop.permute.xlu1 %669  ;;  %v3732_v44 = vpop.permute.xlu0 %697 }
 0x12f   : > { %1337 = vrot.lane.b32.xlu1 %v1332_v34, %s4980_s19  ;;  %1363 = vrot.lane.b32.xlu0 %v1359_v26, %s4980_s19  ;;  %v1442_v34 = vstv %s3769_s26  ;;  %s3913_s26 = sld [smem:[#allocation5 + $0x2f]] }
 0x131   : > { %v3747_v50 = vpop.permute.xlu1 %671  ;;  %v3749_v33 = vpop.permute.xlu0 %725 }
 0x133   : > { %1351 = vrot.lane.b32.xlu1 %v1346_v52, %s4980_s19  ;;  %1377 = vrot.lane.b32.xlu0 %v1373_v53, %s4980_s19  ;;  %v1429_v52 = vmul.f32 %v1428_v49, %v3734_v35  ;;  %v1416_v53 = vmul.f32 %v3742_v31, %v1414_v8 }
 0x135   : > { %v3757_v55 = vpop.permute.xlu1 %699  ;;  %v3759_v21 = vpop.permute.xlu0 %753 }
 0x137   : > { %1365 = vrot.lane.b32.xlu1 %v1360_v56, %s4980_s19  ;;  %1391 = vrot.lane.b32.xlu0 %v1387_v62, %s4980_s19  ;;  %v1443_v56 = vmul.f32 %v3791_v63, %v1442_v34  ;;  %v1470_v62 = vstv %s3781_s10  ;;  %s3932_s10 = sld [smem:[#allocation7 + $0x22]] }
 0x138   : > { %v1471_v6 = vmul.f32 %v3791_v63, %v1470_v62 }
 0x139   : > { %v3771_v57 = vpop.permute.xlu1 %727  ;;  %v3773_v24 = vpop.permute.xlu0 %781 }
 0x13b   : > { %1379 = vrot.lane.b32.xlu1 %v1374_v48, %s4980_s19  ;;  %1405 = vrot.lane.b32.xlu0 %v1401_v7, %s4980_s19 }
 0x13d   : > { %v3783_v11 = vpop.permute.xlu1 %755  ;;  %v3785_v9 = vpop.permute.xlu0 %809 }
 0x13f   : > { %1393 = vrot.lane.b32.xlu1 %v1388_v43, %s4980_s19  ;;  %1419 = vrot.lane.b32.xlu0 %v1415_v17, %s4980_s19  ;;  %v3817_v43 = vld [vmem:[%s3175_s15 + $0x39] sm:$0xff] }
 0x140   : > { %4991 = vst [vmem:[#allocation23_spill] sm:$0xff] %v3817_v43 }
 0x141   : > { %v3794_v26 = vpop.permute.xlu1 %783  ;;  %v3796_v39 = vpop.permute.xlu0 %837 }
 0x143   : > { %1407 = vrot.lane.b32.xlu1 %v1402_v40, %s4980_s19  ;;  %1433 = vrot.lane.b32.xlu0 %v1429_v52, %s4980_s19  ;;  %v1430_v40 = vmul.f32 %v1428_v49, %v3761_v3  ;;  %v3826_v52 = vld [vmem:[#allocation2 + $0x31] sm:$0xff]  ;;  %v1472_v49 = vmul.f32 %v3817_v43, %v1470_v62 }
 0x144   : > { %v1457_v30 = vmul.f32 %v1456_v5, %v3826_v52  ;;  %v1485_v31 = vmul.f32 %v1484_v20, %v3826_v52 }
 0x145   : > { %v3807_v48 = vpop.permute.xlu1 %811  ;;  %v3809_v7 = vpop.permute.xlu0 %865 }
 0x146   : > { %4990 = vst [vmem:[#allocation22_spill] sm:$0xff] %v3807_v48  ;;  %v3851_v48 = vld [vmem:[#allocation2 + $0x39] sm:$0xff] }
 0x147   : > { %1421 = vrot.lane.b32.xlu1 %v1416_v53, %s4980_s19  ;;  %1447 = vrot.lane.b32.xlu0 %v1443_v56, %s4980_s19  ;;  %v1444_v53 = vmul.f32 %v3817_v43, %v1442_v34  ;;  %4995 = vst [vmem:[#allocation27_spill] sm:$0xff] %v3851_v48 }
 0x149   : > { %v3821_v8 = vpop.permute.xlu1 %839  ;;  %v3823_v17 = vpop.permute.xlu0 %893 }
 0x14a   : > { %4992 = vst [vmem:[#allocation24_spill] sm:$0xff] %v3823_v17  ;;  %v1512_v17 = vstv %s3838_s17  ;;  %s3985_s17 = sld [smem:[#allocation5 + $0x31]] }
 0x14b   : > { %1435 = vrot.lane.b32.xlu1 %v1430_v40, %s4980_s19  ;;  %1475 = vrot.lane.b32.xlu0 %v1471_v6, %s4980_s19  ;;  %v1498_v40 = vstv %s3819_s16  ;;  %v1513_v14 = vmul.f32 %v1512_v17, %v3826_v52  ;;  %s3983_s16 = sld [smem:[#allocation5 + $0x1e]] }
 0x14d   : > { %v3832_v56 = vpop.permute.xlu1 %867  ;;  %v3834_v58 = vpop.permute.xlu0 %921 }
 0x14e   : > { %4993 = vst [vmem:[#allocation25_spill] sm:$0xff] %v3832_v56  ;;  %v1526_v56 = vstv %s3844_s18  ;;  %s3998_s18 = sld [smem:[#allocation7 + $0x20]] }
 0x14f   : > { %1449 = vrot.lane.b32.xlu1 %v1444_v53, %s4980_s19  ;;  %1461 = vrot.lane.b32.xlu0 %v1457_v30, %s4980_s19  ;;  %v1499_v30 = vmul.f32 %v3791_v63, %v1498_v40  ;;  %v1486_v63 = vmul.f32 %v1484_v20, %v3851_v48 }
 0x151   : > { %v3846_v34 = vpop.permute.xlu1 %895  ;;  %v3848_v6 = vpop.permute.xlu0 %949 }
 0x152   : > { %4994 = vst [vmem:[#allocation26_spill] sm:$0xff] %v3846_v34  ;;  %v1458_v34 = vmul.f32 %v1456_v5, %v3851_v48  ;;  %v661_v5 = vadd.f32 %v3537_v47, %v3467_v19 }
 0x153   : > { %1477 = vrot.lane.b32.xlu1 %v1472_v49, %s4980_s19  ;;  %1489 = vrot.lane.b32.xlu0 %v1485_v31, %s4980_s19 }
 0x154   : > { %v675_v20 = vadd.f32 %v3730_v23, %v661_v5  ;;  %v1514_v5 = vmul.f32 %v1512_v17, %v3851_v48  ;;  %v1596_v17 = vstv %s3879_s0  ;;  %v1164_v48 = vstv %s3885_s3  ;;  %s4088_s0 = sld [smem:[#allocation5 + $0x1d]]  ;;  %s4090_s3 = sld [smem:[#allocation5 + $0x32]] }
 0x155   : > { %v3858_v62 = vpop.permute.xlu1 %923  ;;  %v3860_v53 = vpop.permute.xlu0 %977 }
 0x156   : > { %4996 = vst [vmem:[#allocation28_spill] sm:$0xff] %v3860_v53  ;;  %v1554_v53 = vstv %s3856_s21  ;;  %v745_v23 = vadd.f32 %v3590_v15, %v675_v20  ;;  %v1568_v20 = vstv %s3877_s12  ;;  %s4040_s21 = sld [smem:[#allocation5 + $0x1c]]  ;;  %s4077_s12 = sld [smem:[#allocation5 + $0x1f]] }
 0x157   : > { %1463 = vrot.lane.b32.xlu1 %v1458_v34, %s4980_s19  ;;  %1503 = vrot.lane.b32.xlu0 %v1499_v30, %s4980_s19  ;;  %v1500_v34 = vmul.f32 %v3817_v43, %v1498_v40  ;;  %v1527_v30 = vmul.f32 %v1526_v56, %v3651_v46  ;;  %v1528_v43 = vmul.f32 %v1526_v56, %v3674_v36  ;;  %v1652_v56 = vstv %s3893_s2  ;;  %s4141_s2 = sld [smem:[#allocation5 + $0x33]] }
 0x158   : > { %v759_v15 = vadd.f32 %v3759_v21, %v745_v23 }
 0x159   : > { %v3867_v49 = vpop.permute.xlu1 %951  ;;  %v3869_v31 = vpop.permute.xlu0 %991 }
 0x15a   : > { %4997 = vst [vmem:[#allocation29_spill] sm:$0xff] %v3867_v49  ;;  %v4949_v49 = vstv %s3910_s25 }
 0x15b   : > { %1491 = vrot.lane.b32.xlu1 %v1486_v63, %s4980_s19  ;;  %1517 = vrot.lane.b32.xlu0 %v1513_v14, %s4980_s19  ;;  %v1555_v14 = vmul.f32 %v1554_v53, %v3651_v46 }
 0x15d   : > { %v3895_v19 = vpop.permute.xlu1 %979  ;;  %v3897_v47 = vpop.permute.xlu0 %1005 }
 0x15e   : > { %4998 = vst [vmem:[#allocation30_spill] sm:$0xff] %v3895_v19  ;;  %v689_v19 = vadd.f32 %v3563_v13, %v3497_v32  ;;  %v1624_v13 = vstv %s3891_s1  ;;  %s4125_s1 = sld [smem:[#allocation5 + $0x20]] }
 0x15f   : > { %1505 = vrot.lane.b32.xlu1 %v1500_v34, %s4980_s19  ;;  %1531 = vrot.lane.b32.xlu0 %v1527_v30, %s4981_s20  ;;  %v1540_v34 = vstv %s3873_s27  ;;  %v662_v30 = vadd.f32 %v3548_v61, %v3478_v54  ;;  %v1176_v61 = vstv %s3887_s29  ;;  %s4042_s27 = sld [smem:[#allocation5 + $0x21]]  ;;  %s4106_s29 = sld [smem:[#allocation5 + $0x22]] }
 0x160   : > { %v703_v54 = vadd.f32 %v3732_v44, %v689_v19  ;;  %v1582_v44 = vstv %s3913_s26  ;;  %s4166_s26 = sld [smem:[#allocation5 + $0x34]] }
 0x161   : > { %v3915_v63 = vpop.permute.xlu1 %993  ;;  %v3917_v40 = vpop.permute.xlu0 %1019  ;;  %v676_v32 = vadd.f32 %v3747_v50, %v662_v30  ;;  %v1556_v50 = vmul.f32 %v1554_v53, %v3674_v36  ;;  %v1542_v30 = vmul.f32 %v1540_v34, %v3689_v18 }
 0x162   : > { %4999 = vst [vmem:[#allocation31_spill] sm:$0xff] %v3915_v63  ;;  %5000 = vst [vmem:[#allocation32_spill] sm:$0xff] %v3917_v40  ;;  %v829_v40 = vadd.f32 %v3635_v38, %v759_v15  ;;  %v1569_v63 = vmul.f32 %v1568_v20, %v3666_v60  ;;  %v773_v38 = vadd.f32 %v3603_v29, %v703_v54 }
 0x163   : > { %1519 = vrot.lane.b32.xlu1 %v1514_v5, %s4980_s19  ;;  %1559 = vrot.lane.b32.xlu0 %v1555_v14, %s4981_s20  ;;  %v1541_v14 = vmul.f32 %v1540_v34, %v3666_v60  ;;  %v4948_v5 = vstv %s3899_s5  ;;  %v746_v15 = vadd.f32 %v3588_v25, %v676_v32  ;;  %v1597_v34 = vmul.f32 %v1596_v17, %v3666_v60 }
 0x164   : > { %v843_v19 = vadd.f32 %v3796_v39, %v829_v40  ;;  %v3977_v25 = vmul.f32 %v1596_v17, %v3689_v18  ;;  %v717_v29 = vadd.f32 %v3577_v4, %v3509_v2  ;;  %v3988_v39 = vmul.f32 %v1164_v48, %v3689_v18 }
 0x165   : > { %v3938_v21 = vpop.permute.xlu1 %1007  ;;  %v3940_v23 = vpop.permute.xlu0 %1033  ;;  %v1583_v2 = vmul.f32 %v1582_v44, %v3651_v46  ;;  %v3995_v4 = vmul.f32 %v1176_v61, %v3666_v60  ;;  %v4006_v17 = vmul.f32 %v1652_v56, %v3734_v35  ;;  %v4013_v32 = vmul.f32 %v1176_v61, %v3689_v18 }
 0x166   : > { %5001 = vst [vmem:[#allocation33_spill] sm:$0xff] %v3940_v23  ;;  %v3955_v23 = vmul.f32 %v1568_v20, %v3689_v18  ;;  %v3974_v20 = vmul.f32 %v1164_v48, %v3666_v60  ;;  %v913_v48 = vadd.f32 %v3687_v1, %v843_v19  ;;  %v4021_v1 = vmul.f32 %v1624_v13, %v3761_v3  ;;  %v5020_v18 = vld [vmem:[#allocation26_spill] sm:$0xff] }
 0x167   : > { %1533 = vrot.lane.b32.xlu1 %v1528_v43, %s4981_s20  ;;  %1545 = vrot.lane.b32.xlu0 %v1541_v14, %s4981_s20  ;;  %v690_v43 = vadd.f32 %v3561_v45, %v3461_v51  ;;  %v787_v51 = vadd.f32 %v3773_v24, %v773_v38  ;;  %v760_v45 = vadd.f32 %v3783_v11, %v746_v15  ;;  %v5002_v19 = vstv %s3901_s22 }
 0x168   : > { %v731_v11 = vadd.f32 %v3749_v33, %v717_v29  ;;  %v4018_v33 = vmul.f32 %v4948_v5, %v3666_v60  ;;  %v5003_v61 = vstv %s3903_s23 }
 0x169   : > { %v3966_v14 = vpop.permute.xlu1 %1021  ;;  %v3968_v53 = vpop.permute.xlu0 %1047  ;;  %v704_v40 = vadd.f32 %v3757_v55, %v690_v43  ;;  %v4003_v55 = vmul.f32 %v1624_v13, %v3734_v35  ;;  %v857_v38 = vadd.f32 %v3648_v42, %v787_v51  ;;  %v830_v15 = vadd.f32 %v3633_v37, %v760_v45 }
 0x16a   : > { %v927_v43 = vadd.f32 %v3834_v58, %v913_v48  ;;  %v4034_v29 = vmul.f32 %v5003_v61, %v3826_v52  ;;  %v1610_v13 = vstv %s3957_s11  ;;  %v4045_v37 = vmul.f32 %v1652_v56, %v3761_v3  ;;  %s4180_s11 = sld [smem:[#allocation7 + $0x23]] }
 0x16b   : > { %1561 = vrot.lane.b32.xlu1 %v1556_v50, %s4981_s20  ;;  %1573 = vrot.lane.b32.xlu0 %v1569_v63, %s4981_s20  ;;  %v4026_v50 = vmul.f32 %v5002_v19, %v3734_v35  ;;  %v774_v60 = vadd.f32 %v3601_v27, %v704_v40  ;;  %v5004_v42 = vstv %s3905_s14  ;;  %v801_v27 = vadd.f32 %v3621_v16, %v731_v11 }
 0x16c   : > { %v4050_v58 = vmul.f32 %v5004_v42, %v3734_v35  ;;  %v844_v51 = vadd.f32 %v3821_v8, %v830_v15  ;;  %v997_v45 = vadd.f32 %v3869_v31, %v927_v43  ;;  %v718_v40 = vadd.f32 %v3575_v0, %v3473_v22 }
 0x16d   : > { %v4008_v63 = vpop.permute.xlu1 %1035  ;;  %v4010_v54 = vpop.permute.xlu0 %1061  ;;  %v1158_v19 = vstv %s3971_s13  ;;  %v5005_v61 = vstv %s3901_s22  ;;  %v815_v16 = vadd.f32 %v3785_v9, %v801_v27  ;;  %v1198_v8 = vstv %s3983_s16  ;;  %v5013_v5 = vld [vmem:[#allocation33_spill] sm:$0xff]  ;;  %s4149_s22 = sld [smem:[#allocation5 + $0x23]]  ;;  %s4231_s13 = sld [smem:[#allocation5 + $0x35]] }
 0x16e   : > { %v4065_v42 = vmul.f32 %v5005_v61, %v3761_v3  ;;  %v1638_v31 = vstv %s3985_s17  ;;  %v732_v11 = vadd.f32 %v3771_v57, %v718_v40  ;;  %v1584_v22 = vmul.f32 %v1582_v44, %v3674_v36  ;;  %v5008_v61 = vld [vmem:[#allocation24_spill] sm:$0xff]  ;;  %s4298_s16 = sld [smem:[#allocation7 + $0x3f]]  ;;  %s4309_s17 = sld [smem:[#allocation7 + $0x40]] }
 0x16f   : > { %1547 = vrot.lane.b32.xlu1 %v1542_v30, %s4981_s20  ;;  %1587 = vrot.lane.b32.xlu0 %v1583_v2, %s4981_s20  ;;  %v871_v30 = vadd.f32 %v3809_v7, %v857_v38  ;;  %v788_v2 = vadd.f32 %v3794_v26, %v774_v60  ;;  %v1011_v7 = vadd.f32 %v3897_v47, %v997_v45  ;;  %v5007_v45 = vld [vmem:[#allocation25_spill] sm:$0xff] }
 0x170   : > { %v1611_v0 = vmul.f32 %v3719_v12, %v1610_v13  ;;  %v914_v47 = vadd.f32 %v3685_v10, %v844_v51  ;;  %v1159_v57 = vmul.f32 %v1158_v19, %v3651_v46  ;;  %v1199_v44 = vmul.f32 %v3719_v12, %v1198_v8 }
 0x171   : > { %v4059_v56 = vpop.permute.xlu1 %1049  ;;  %v1076_v48 = vpop.permute.xlu0 %1075  ;;  %v941_v9 = vadd.f32 %v3703_v28, %v871_v30  ;;  %v858_v15 = vadd.f32 %v3646_v41, %v788_v2  ;;  %v1639_v43 = vmul.f32 %v3719_v12, %v1638_v31  ;;  %v4095_v10 = vmul.f32 %v4949_v49, %v3734_v35  ;;  %v5006_v30 = vld [vmem:[#allocation14_spill] sm:$0xff] }
 0x172   : > { %v1081_v38 = vadd.f32 %v1076_v48, %v1011_v7  ;;  %v885_v28 = vadd.f32 %v3664_v59, %v815_v16  ;;  %v928_v60 = vadd.f32 %v3858_v62, %v914_v47  ;;  %v802_v51 = vadd.f32 %v5006_v30, %v732_v11  ;;  %v5009_v59 = vld [vmem:[#allocation31_spill] sm:$0xff]  ;;  %v5011_v47 = vld [vmem:[#allocation22_spill] sm:$0xff] }
 0x173   : > { %1575 = vrot.lane.b32.xlu1 %v3955_v23, %s4981_s20  ;;  %1601 = vrot.lane.b32.xlu0 %v1597_v34, %s4981_s20  ;;  %v955_v41 = vadd.f32 %v3848_v6, %v941_v9  ;;  %v872_v40 = vadd.f32 %v5007_v45, %v858_v15  ;;  %v1170_v2 = vstv %s4040_s21  ;;  %v1238_v48 = vstv %s4042_s27  ;;  %v5010_v6 = vld [vmem:[#allocation32_spill] sm:$0xff]  ;;  %s4336_s21 = sld [smem:[#allocation7 + $0x41]]  ;;  %s4342_s27 = sld [smem:[#allocation5 + $0x42]] }
 0x174   : > { %v899_v7 = vadd.f32 %v5008_v61, %v885_v28  ;;  %v998_v16 = vadd.f32 %v5009_v59, %v928_v60  ;;  %v816_v11 = vadd.f32 %v5011_v47, %v802_v51  ;;  %v5014_v61 = vld [vmem:[#allocation17_spill] sm:$0xff]  ;;  %v5017_v59 = vld [vmem:[#allocation15_spill] sm:$0xff]  ;;  %v5019_v47 = vld [vmem:[#allocation28_spill] sm:$0xff] }
 0x175   : > { %v4084_v23 = vpop.permute.xlu1 %1063  ;;  %v1090_v34 = vpop.permute.xlu0 %1089  ;;  %v1025_v9 = vadd.f32 %v5010_v6, %v955_v41 }
 0x176   : > { %v1095_v27 = vadd.f32 %v1090_v34, %v1081_v38  ;;  %v5012_v34 = vld [vmem:[#allocation20_spill] sm:$0xff]  ;;  %v1012_v45 = vadd.f32 %v3938_v21, %v998_v16  ;;  %v5015_v21 = vld [vmem:[#allocation21_spill] sm:$0xff] }
 0x177   : > { %1589 = vrot.lane.b32.xlu1 %v1584_v22, %s4981_s20  ;;  %1615 = vrot.lane.b32.xlu0 %v1611_v0, %s4981_s20  ;;  %v1160_v22 = vmul.f32 %v1158_v19, %v3674_v36  ;;  %v1200_v0 = vmul.f32 %v5012_v34, %v1198_v8  ;;  %v1612_v30 = vmul.f32 %v5012_v34, %v1610_v13  ;;  %v1210_v13 = vstv %s4077_s12  ;;  %v5016_v8 = vld [vmem:[#allocation19_spill] sm:$0xff]  ;;  %v5018_v16 = vld [vmem:[#allocation29_spill] sm:$0xff]  ;;  %s4354_s12 = sld [smem:[#allocation5 + $0x43]] }
 0x178   : > { %v1161_v62 = vadd.f32 %v1159_v57, %v1095_v27  ;;  %v1039_v28 = vadd.f32 %v5013_v5, %v1025_v9  ;;  %v1640_v41 = vmul.f32 %v5012_v34, %v1638_v31  ;;  %v942_v57 = vadd.f32 %v5014_v61, %v872_v40 }
 0x179   : > { %v1078_v38 = vpop.permute.xlu1 %1077  ;;  %v1104_v15 = vpop.permute.xlu0 %1103  ;;  %v1171_v19 = vmul.f32 %v1170_v2, %v3651_v46  ;;  %v1239_v5 = vmul.f32 %v5015_v21, %v1238_v48  ;;  %v886_v40 = vadd.f32 %v5017_v59, %v816_v11  ;;  %v1250_v11 = vstv %s4106_s29  ;;  %s4393_s29 = sld [smem:[#allocation5 + $0x44]] }
 0x17a   : > { %v1167_v60 = vadd.f32 %v3974_v20, %v1161_v62  ;;  %v969_v20 = vadd.f32 %v5016_v8, %v899_v7  ;;  %v1082_v31 = vadd.f32 %v1078_v38, %v1012_v45  ;;  %v1109_v51 = vadd.f32 %v1104_v15, %v1039_v28  ;;  %v5021_v8 = vld [vmem:[#allocation23_spill] sm:$0xff] }
 0x17b   : > { %1603 = vrot.lane.b32.xlu1 %v3977_v25, %s4981_s20  ;;  %1643 = vrot.lane.b32.xlu0 %v1639_v43, %s4981_s20  ;;  %v956_v6 = vadd.f32 %v5018_v16, %v942_v57  ;;  %v1182_v43 = vstv %s4088_s0  ;;  %v1666_v62 = vstv %s4090_s3  ;;  %v900_v7 = vadd.f32 %v5020_v18, %v886_v40  ;;  %s4374_s0 = sld [smem:[#allocation7 + $0x42]]  ;;  %s4385_s3 = sld [smem:[#allocation7 + $0x43]] }
 0x17c   : > { %v1201_v27 = vadd.f32 %v1199_v44, %v1167_v60  ;;  %v983_v61 = vadd.f32 %v5019_v47, %v969_v20  ;;  %v1211_v38 = vmul.f32 %v3719_v12, %v1210_v13  ;;  %v1183_v57 = vmul.f32 %v1182_v43, %v3651_v46 }
 0x17d   : > { %v1092_v25 = vpop.permute.xlu1 %1091  ;;  %v1118_v9 = vpop.permute.xlu0 %1117  ;;  %v1026_v44 = vadd.f32 %v3966_v14, %v956_v6  ;;  %v1172_v14 = vmul.f32 %v1170_v2, %v3674_v36  ;;  %v1222_v46 = vstv %s4125_s1  ;;  %v5027_v40 = vstv %s3910_s25  ;;  %s4219_s25 = sld [smem:[#allocation7 + $0x34]] }
 0x17e   : > { %v1096_v26 = vadd.f32 %v1092_v25, %v1082_v31  ;;  %v1123_v49 = vadd.f32 %v1118_v9, %v1109_v51  ;;  %v1207_v24 = vadd.f32 %v4026_v50, %v1201_v27  ;;  %v1053_v15 = vadd.f32 %v3968_v53, %v983_v61  ;;  %v5024_v31 = vld [vmem:[#allocation27_spill] sm:$0xff]  ;;  %s4412_s1 = sld [smem:[#allocation7 + $0x44]] }
 0x17f   : > { %1617 = vrot.lane.b32.xlu1 %v1612_v30, %s4981_s20  ;;  %1629 = vrot.lane.b32.xlu0 %v4003_v55, %s4981_s20  ;;  %v1667_v30 = vmul.f32 %v3719_v12, %v1666_v62  ;;  %v1240_v55 = vmul.f32 %v5021_v8, %v1238_v48  ;;  %v1040_v20 = vadd.f32 %v4008_v63, %v1026_v44  ;;  %v1694_v44 = vstv %s4141_s2  ;;  %s4418_s2 = sld [smem:[#allocation5 + $0x45]] }
 0x180   : > { %v1162_v45 = vadd.f32 %v1160_v22, %v1096_v26  ;;  %v1173_v28 = vadd.f32 %v1171_v19, %v1123_v49  ;;  %v1241_v50 = vadd.f32 %v1239_v5, %v1207_v24  ;;  %v1067_v53 = vadd.f32 %v4010_v54, %v1053_v15  ;;  %v5022_v26 = vld [vmem:[#allocation18_spill] sm:$0xff] }
 0x181   : > { %v1106_v60 = vpop.permute.xlu1 %1105  ;;  %v1132_v18 = vpop.permute.xlu0 %1131  ;;  %v970_v2 = vadd.f32 %v5022_v26, %v900_v7  ;;  %v1251_v63 = vmul.f32 %v5015_v21, %v1250_v11  ;;  %v5023_v19 = vld [vmem:[#allocation30_spill] sm:$0xff]  ;;  %v1218_v16 = vmul.f32 %v5027_v40, %v3761_v3  ;;  %v1212_v61 = vmul.f32 %v5012_v34, %v1210_v13 }
 0x182   : > { %v1168_v49 = vadd.f32 %v3988_v39, %v1162_v45  ;;  %v1179_v24 = vadd.f32 %v3995_v4, %v1173_v28  ;;  %v4161_v48 = vadd.f32 %v4034_v29, %v1241_v50  ;;  %v1110_v54 = vadd.f32 %v1106_v60, %v1040_v20 }
 0x183   : > { %1645 = vrot.lane.b32.xlu1 %v1640_v41, %s4981_s20  ;;  %1657 = vrot.lane.b32.xlu0 %v4006_v17, %s4981_s20  ;;  %v1137_v22 = vadd.f32 %v1132_v18, %v1067_v53  ;;  %v984_v5 = vadd.f32 %v5023_v19, %v970_v2  ;;  %v5025_v17 = vstv %s3903_s23  ;;  %v5026_v29 = vstv %s3932_s10  ;;  %s4201_s23 = sld [smem:[#allocation7 + $0x33]]  ;;  %s4278_s10 = sld [smem:[#allocation5 + $0x40]] }
 0x184   : > { %v1202_v39 = vadd.f32 %v1200_v0, %v1168_v49  ;;  %v1213_v4 = vadd.f32 %v1211_v38, %v1179_v24  ;;  %v1246_v51 = vmul.f32 %v5025_v17, %v5024_v31  ;;  %v1257_v59 = vmul.f32 %v5026_v29, %v3826_v52  ;;  %v5029_v24 = vld [vmem:[#allocation16_spill] sm:$0xff] }
 0x185   : > { %v1120_v41 = vpop.permute.xlu1 %1119  ;;  %v1146_v27 = vpop.permute.xlu0 %1145  ;;  %v1054_v47 = vadd.f32 %v4059_v56, %v984_v5  ;;  %v1223_v7 = vmul.f32 %v3719_v12, %v1222_v46  ;;  %v1184_v56 = vmul.f32 %v1182_v43, %v3674_v36  ;;  %v1668_v13 = vmul.f32 %v5012_v34, %v1666_v62 }
 0x186   : > { %v1124_v6 = vadd.f32 %v1120_v41, %v1110_v54  ;;  %v1151_v25 = vadd.f32 %v1146_v27, %v1137_v22  ;;  %v1208_v0 = vadd.f32 %v4065_v42, %v1202_v39  ;;  %v1219_v9 = vadd.f32 %v4095_v10, %v1213_v4 }
 0x187   : > { %1631 = vrot.lane.b32.xlu1 %v4021_v1, %s4981_s20  ;;  %1671 = vrot.lane.b32.xlu0 %v1667_v30, %s4981_s20  ;;  %v5028_v12 = vstv %s3998_s18  ;;  %v1262_v1 = vstv %s4149_s22  ;;  %v1068_v60 = vadd.f32 %v4084_v23, %v1054_v47  ;;  %v1224_v4 = vmul.f32 %v5012_v34, %v1222_v46  ;;  %s4317_s18 = sld [smem:[#allocation5 + $0x41]]  ;;  %s4430_s22 = sld [smem:[#allocation5 + $0x46]] }
 0x188   : > { %v1174_v38 = vadd.f32 %v1172_v14, %v1124_v6  ;;  %v1185_v42 = vadd.f32 %v1183_v57, %v1151_v25  ;;  %v1242_v15 = vadd.f32 %v1240_v55, %v1208_v0  ;;  %v1253_v10 = vadd.f32 %v1251_v63, %v1219_v9 }
 0x189   : > { %v1134_v45 = vpop.permute.xlu1 %1133  ;;  %v4189_v28 = vpop.permute.xlu0 %1279  ;;  %v1229_v50 = vmul.f32 %v5028_v12, %v3734_v35  ;;  %v1695_v57 = vmul.f32 %v5015_v21, %v1694_v44  ;;  %v1722_v23 = vstv %s4166_s26  ;;  %v1263_v30 = vmul.f32 %v5015_v21, %v1262_v1  ;;  %s4450_s26 = sld [smem:[#allocation7 + $0x45]] }
 0x18a   : > { %v1180_v18 = vadd.f32 %v4013_v32, %v1174_v38  ;;  %v1191_v14 = vadd.f32 %v4018_v33, %v1185_v42  ;;  %v4207_v36 = vadd.f32 %v1246_v51, %v1242_v15  ;;  %v4209_v35 = vadd.f32 %v1257_v59, %v1253_v10 }
 0x18b   : > { %1659 = vrot.lane.b32.xlu1 %v4045_v37, %s4981_s20  ;;  %1685 = vrot.lane.b32.xlu0 %v4050_v58, %s4981_s20  ;;  %v1252_v32 = vmul.f32 %v5021_v8, %v1250_v11  ;;  %v1138_v62 = vadd.f32 %v1134_v45, %v1068_v60  ;;  %v1268_v53 = vstv %s4180_s11  ;;  %v5030_v26 = vstv %s3899_s5  ;;  %s4259_s5 = sld [smem:[#allocation7 + $0x35]]  ;;  %s4461_s11 = sld [smem:[#allocation7 + $0x46]] }
 0x18c   : > { %v1214_v33 = vadd.f32 %v1212_v61, %v1180_v18  ;;  %v1225_v43 = vadd.f32 %v1223_v7, %v1191_v14  ;;  %v1190_v11 = vmul.f32 %v5030_v26, %v5029_v24  ;;  %v1723_v2 = vmul.f32 %v5015_v21, %v1722_v23  ;;  %v4289_v14 = vld [vmem:[%s3175_s15 + $0x2] sm:$0xff] }
 0x18d   : > { %v1148_v55 = vpop.permute.xlu1 %1147  ;;  %v4216_v37 = vpop.permute.xlu0 %1293  ;;  %v5031_v63 = vmov %v5026_v29  ;;  %v5032_v27 = vstv %s3905_s14  ;;  %v1269_v51 = vmul.f32 %v1268_v53, %v3826_v52  ;;  %v1708_v59 = vstv %s4201_s23  ;;  %s4266_s14 = sld [smem:[#allocation5 + $0x3f]]  ;;  %v4324_v24 = vld [vmem:[#allocation2 + $0x2] sm:$0xff] }
 0x18e   : > { %v1152_v20 = vadd.f32 %v1148_v55, %v1138_v62  ;;  %v1220_v58 = vadd.f32 %v1218_v16, %v1214_v33  ;;  %v1231_v49 = vadd.f32 %v1229_v50, %v1225_v43  ;;  %v1258_v39 = vmul.f32 %v5031_v63, %v5024_v31  ;;  %s4469_s23 = sld [smem:[#allocation5 + $0x47]] }
 0x18f   : > { %1673 = vrot.lane.b32.xlu1 %v1668_v13, %s4981_s20  ;;  %1699 = vrot.lane.b32.xlu0 %v1695_v57, %s4981_s20  ;;  %v1682_v17 = vmul.f32 %v5032_v27, %v3761_v3  ;;  %v1696_v34 = vmul.f32 %v5021_v8, %v1694_v44  ;;  %v5033_v6 = vmov %v5028_v12  ;;  %v1264_v0 = vmul.f32 %v5021_v8, %v1262_v1 }
 0x190   : > { %v1186_v54 = vadd.f32 %v1184_v56, %v1152_v20  ;;  %v1254_v22 = vadd.f32 %v1252_v32, %v1220_v58  ;;  %v1265_v19 = vadd.f32 %v1263_v30, %v1231_v49  ;;  %v1230_v25 = vmul.f32 %v5033_v6, %v3761_v3  ;;  %v4315_v58 = vld [vmem:[%s3175_s15 + $0xa] sm:$0xff]  ;;  %v4365_v6 = vld [vmem:[%s3175_s15 + $0x1a] sm:$0xff] }
 0x191   : > { %v4233_v5 = vpop.permute.xlu1 %1281  ;;  %v4235_v41 = vpop.permute.xlu0 %1307  ;;  %v1709_v61 = vmul.f32 %v1708_v59, %v3826_v52  ;;  %v1736_v7 = vstv %s4219_s25  ;;  %v1724_v44 = vmul.f32 %v5021_v8, %v1722_v23  ;;  %v1750_v3 = vstv %s4231_s13  ;;  %5035 = vst [vmem:[#allocation25_spill] sm:$0xff] %v4365_v6  ;;  %s4493_s25 = sld [smem:[#allocation5 + $0x48]]  ;;  %s4511_s13 = sld [smem:[#allocation5 + $0x49]] }
 0x192   : > { %v1192_v29 = vadd.f32 %v1190_v11, %v1186_v54  ;;  %v4242_v40 = vadd.f32 %v1258_v39, %v1254_v22  ;;  %v4247_v46 = vadd.f32 %v1269_v51, %v1265_v19  ;;  %v1270_v42 = vmul.f32 %v1268_v53, %v5024_v31 }
 0x193   : > { %1687 = vrot.lane.b32.xlu1 %v1682_v17, %s4981_s20  ;;  %1727 = vrot.lane.b32.xlu0 %v1723_v2, %s4981_s20  ;;  %v1737_v56 = vmul.f32 %v1736_v7, %v3826_v52  ;;  %v1751_v12 = vmul.f32 %v5015_v21, %v1750_v3  ;;  %v1710_v60 = vmul.f32 %v1708_v59, %v5024_v31  ;;  %v1764_v18 = vstv %s4259_s5  ;;  %v4349_v17 = vld [vmem:[#allocation2 + $0xa] sm:$0xff]  ;;  %s4540_s5 = sld [smem:[#allocation7 + $0x48]] }
 0x194   : > { %v1226_v16 = vadd.f32 %v1224_v4, %v1192_v29  ;;  %v1898_v57 = vstv %s4266_s14  ;;  %v1738_v32 = vmul.f32 %v1736_v7, %v5024_v31  ;;  %v1765_v33 = vmul.f32 %v1764_v18, %v3826_v52  ;;  %5034 = vst [vmem:[#allocation14_spill] sm:$0xff] %v4349_v17  ;;  %s4558_s14 = sld [smem:[#allocation7 + $0x49]] }
 0x195   : > { %v4253_v9 = vpop.permute.xlu1 %1295  ;;  %v4255_v47 = vpop.permute.xlu0 %1321  ;;  %v1752_v43 = vmul.f32 %v5021_v8, %v1750_v3  ;;  %v1899_v62 = vmul.f32 %v1898_v57, %v4289_v14  ;;  %v1926_v30 = vstv %s4278_s10  ;;  %v1766_v49 = vmul.f32 %v1764_v18, %v5024_v31  ;;  %s4568_s10 = sld [smem:[#allocation5 + $0x4a]] }
 0x196   : > { %v1232_v38 = vadd.f32 %v1230_v25, %v1226_v16  ;;  %v1927_v52 = vmul.f32 %v1926_v30, %v4289_v14  ;;  %v1912_v26 = vstv %s4298_s16  ;;  %v1900_v11 = vmul.f32 %v1898_v57, %v4315_v58  ;;  %s4596_s16 = sld [smem:[#allocation5 + $0x4b]] }
 0x197   : > { %1701 = vrot.lane.b32.xlu1 %v1696_v34, %s4981_s20  ;;  %1713 = vrot.lane.b32.xlu0 %v1709_v61, %s4981_s20  ;;  %v1913_v39 = vmul.f32 %v1912_v26, %v4324_v24  ;;  %v1940_v4 = vstv %s4309_s17  ;;  %v1928_v31 = vmul.f32 %v1926_v30, %v4315_v58  ;;  %v1954_v54 = vstv %s4317_s18  ;;  %s4602_s17 = sld [smem:[#allocation7 + $0x36]]  ;;  %s4607_s18 = sld [smem:[#allocation7 + $0x37]] }
 0x198   : > { %v1266_v15 = vadd.f32 %v1264_v0, %v1232_v38  ;;  %v1941_v27 = vmul.f32 %v1940_v4, %v4324_v24  ;;  %v1955_v51 = vmul.f32 %v1954_v54, %v4289_v14  ;;  %v1914_v34 = vmul.f32 %v1912_v26, %v4349_v17 }
 0x199   : > { %v4268_v10 = vpop.permute.xlu1 %1309  ;;  %v4270_v45 = vpop.permute.xlu0 %1335  ;;  %v1968_v16 = vstv %s4336_s21  ;;  %v1982_v25 = vstv %s4342_s27  ;;  %v1942_v7 = vmul.f32 %v1940_v4, %v4349_v17  ;;  %v2024_v26 = vstv %s4385_s3  ;;  %s4609_s21 = sld [smem:[#allocation7 + $0x4b]]  ;;  %s4612_s27 = sld [smem:[#allocation5 + $0x4c]] }
 0x19a   : > { %v4273_v13 = vadd.f32 %v1270_v42, %v1266_v15  ;;  %v1969_v38 = vmul.f32 %v1968_v16, %v4324_v24  ;;  %v1983_v3 = vmul.f32 %v4365_v6, %v1982_v25  ;;  %v2010_v42 = vstv %s4354_s12  ;;  %s4614_s12 = sld [smem:[#allocation7 + $0x4c]]  ;;  %s4619_s3 = sld [smem:[#allocation7 + $0x38]] }
 0x19b   : > { %1729 = vrot.lane.b32.xlu1 %v1724_v44, %s4981_s20  ;;  %1741 = vrot.lane.b32.xlu0 %v1737_v56, %s4981_s20  ;;  %v1956_v44 = vmul.f32 %v1954_v54, %v4315_v58 }
 0x19d   : > { %v4280_v50 = vpop.permute.xlu1 %1323  ;;  %v4282_v1 = vpop.permute.xlu0 %1349 }
 0x19f   : > { %1715 = vrot.lane.b32.xlu1 %v1710_v60, %s4981_s20  ;;  %1755 = vrot.lane.b32.xlu0 %v1751_v12, %s4981_s20  ;;  %v2011_v12 = vmul.f32 %v4365_v6, %v2010_v42  ;;  %v4391_v60 = vld [vmem:[%s3175_s15 + $0x22] sm:$0xff] }
 0x1a0   : > { %5036 = vst [vmem:[#allocation24_spill] sm:$0xff] %v4391_v60 }
 0x1a1   : > { %v4292_v23 = vpop.permute.xlu1 %1337  ;;  %v4294_v21 = vpop.permute.xlu0 %1363 }
 0x1a3   : > { %1743 = vrot.lane.b32.xlu1 %v1738_v32, %s4981_s20  ;;  %1769 = vrot.lane.b32.xlu0 %v1765_v33, %s4981_s20  ;;  %v1970_v32 = vmul.f32 %v1968_v16, %v4349_v17  ;;  %v4400_v33 = vld [vmem:[#allocation2 + $0x1a] sm:$0xff]  ;;  %v2122_v17 = vstv %s4469_s23  ;;  %s4649_s23 = sld [smem:[#allocation7 + $0x3d]] }
 0x1a4   : > { %5037 = vst [vmem:[#allocation31_spill] sm:$0xff] %v4400_v33  ;;  %v2025_v54 = vmul.f32 %v2024_v26, %v4400_v33 }
 0x1a5   : > { %v4305_v55 = vpop.permute.xlu1 %1351  ;;  %v4307_v20 = vpop.permute.xlu0 %1377 }
 0x1a7   : > { %1757 = vrot.lane.b32.xlu1 %v1752_v43, %s4981_s20  ;;  %1903 = vrot.lane.b32.xlu0 %v1899_v62, %s4980_s19  ;;  %v1996_v43 = vstv %s4374_s0  ;;  %v1984_v62 = vmul.f32 %v4391_v60, %v1982_v25  ;;  %s4617_s0 = sld [smem:[#allocation5 + $0x36]] }
 0x1a9   : > { %v4319_v8 = vpop.permute.xlu1 %1365  ;;  %v4321_v53 = vpop.permute.xlu0 %1391 }
 0x1ab   : > { %1771 = vrot.lane.b32.xlu1 %v1766_v49, %s4981_s20  ;;  %1931 = vrot.lane.b32.xlu0 %v1927_v52, %s4980_s19  ;;  %v1997_v49 = vmul.f32 %v1996_v43, %v4400_v33 }
 0x1ad   : > { %v4330_v2 = vpop.permute.xlu1 %1379  ;;  %v4332_v63 = vpop.permute.xlu0 %1405 }
 0x1af   : > { %1905 = vrot.lane.b32.xlu1 %v1900_v11, %s4980_s19  ;;  %1917 = vrot.lane.b32.xlu0 %v1913_v39, %s4980_s19  ;;  %v2012_v11 = vmul.f32 %v4391_v60, %v2010_v42  ;;  %v2038_v39 = vstv %s4393_s29  ;;  %s4627_s29 = sld [smem:[#allocation7 + $0x39]] }
 0x1b1   : > { %v4344_v22 = vpop.permute.xlu1 %1393  ;;  %v4346_v19 = vpop.permute.xlu0 %1419 }
 0x1b3   : > { %1933 = vrot.lane.b32.xlu1 %v1928_v31, %s4980_s19  ;;  %1945 = vrot.lane.b32.xlu0 %v1941_v27, %s4980_s19  ;;  %v4425_v27 = vld [vmem:[#allocation2 + $0x22] sm:$0xff] }
 0x1b4   : > { %5038 = vst [vmem:[#allocation32_spill] sm:$0xff] %v4425_v27  ;;  %v1998_v25 = vmul.f32 %v1996_v43, %v4425_v27  ;;  %v2040_v43 = vmul.f32 %v4391_v60, %v2038_v39  ;;  %v2080_v60 = vstv %s4450_s26  ;;  %s4641_s26 = sld [smem:[#allocation5 + $0x39]] }
 0x1b5   : > { %v4356_v29 = vpop.permute.xlu1 %1407  ;;  %v4358_v59 = vpop.permute.xlu0 %1433 }
 0x1b7   : > { %1919 = vrot.lane.b32.xlu1 %v1914_v34, %s4980_s19  ;;  %1959 = vrot.lane.b32.xlu0 %v1955_v51, %s4980_s19  ;;  %v2039_v51 = vmul.f32 %v4365_v6, %v2038_v39 }
 0x1b9   : > { %v4368_v0 = vpop.permute.xlu1 %1421  ;;  %v4370_v61 = vpop.permute.xlu0 %1447 }
 0x1bb   : > { %1947 = vrot.lane.b32.xlu1 %v1942_v7, %s4980_s19  ;;  %1973 = vrot.lane.b32.xlu0 %v1969_v38, %s4980_s19  ;;  %v2052_v7 = vstv %s4412_s1  ;;  %v4441_v38 = vld [vmem:[%s3175_s15 + $0x32] sm:$0xff]  ;;  %s4629_s1 = sld [smem:[#allocation7 + $0x3c]] }
 0x1bd   : > { %v4381_v15 = vpop.permute.xlu1 %1435  ;;  %v4383_v56 = vpop.permute.xlu0 %1475 }
 0x1bf   : > { %1961 = vrot.lane.b32.xlu1 %v1956_v44, %s4980_s19  ;;  %1987 = vrot.lane.b32.xlu0 %v1983_v3, %s4980_s19  ;;  %v2066_v44 = vstv %s4418_s2  ;;  %s4633_s2 = sld [smem:[#allocation7 + $0x4d]] }
 0x1c1   : > { %v4395_v18 = vpop.permute.xlu1 %1449  ;;  %v4397_v57 = vpop.permute.xlu0 %1461 }
 0x1c3   : > { %1975 = vrot.lane.b32.xlu1 %v1970_v32, %s4980_s19  ;;  %2015 = vrot.lane.b32.xlu0 %v2011_v12, %s4980_s19  ;;  %v2026_v12 = vmul.f32 %v2024_v26, %v4425_v27  ;;  %v2053_v32 = vmul.f32 %v2052_v7, %v4400_v33 }
 0x1c5   : > { %v4406_v30 = vpop.permute.xlu1 %1477  ;;  %v4408_v52 = vpop.permute.xlu0 %1489 }
 0x1c7   : > { %1989 = vrot.lane.b32.xlu1 %v1984_v62, %s4980_s19  ;;  %2001 = vrot.lane.b32.xlu0 %v1997_v49, %s4980_s19  ;;  %v2067_v62 = vmul.f32 %v4441_v38, %v2066_v44  ;;  %v2094_v49 = vstv %s4430_s22  ;;  %s4635_s22 = sld [smem:[#allocation7 + $0x3a]] }
 0x1c8   : > { %v2095_v26 = vmul.f32 %v4441_v38, %v2094_v49 }
 0x1c9   : > { %v4420_v4 = vpop.permute.xlu1 %1463  ;;  %v4422_v31 = vpop.permute.xlu0 %1503 }
 0x1cb   : > { %2017 = vrot.lane.b32.xlu1 %v2012_v11, %s4980_s19  ;;  %2029 = vrot.lane.b32.xlu0 %v2025_v54, %s4980_s19 }
 0x1cd   : > { %v4432_v34 = vpop.permute.xlu1 %1491  ;;  %v4434_v16 = vpop.permute.xlu0 %1517 }
 0x1cf   : > { %2003 = vrot.lane.b32.xlu1 %v1998_v25, %s4980_s19  ;;  %2043 = vrot.lane.b32.xlu0 %v2039_v51, %s4980_s19  ;;  %v4467_v51 = vld [vmem:[%s3175_s15 + $0x3a] sm:$0xff]  ;;  %s4485_s15 = sld [smem:[#allocation7 + $0x47]] }
 0x1d1   : > { %v4444_v3 = vpop.permute.xlu1 %1505  ;;  %v4446_v42 = vpop.permute.xlu0 %1531 }
 0x1d2   : > { %5039 = vst [vmem:[#allocation22_spill] sm:$0xff] %v4444_v3 }
 0x1d3   : > { %2031 = vrot.lane.b32.xlu1 %v2026_v12, %s4980_s19  ;;  %2057 = vrot.lane.b32.xlu0 %v2053_v32, %s4980_s19  ;;  %v2054_v12 = vmul.f32 %v2052_v7, %v4425_v27  ;;  %v4476_v32 = vld [vmem:[#allocation2 + $0x32] sm:$0xff]  ;;  %v1313_v7 = vadd.f32 %v4235_v41, %v4209_v35  ;;  %v2108_v27 = vstv %s4461_s11  ;;  %s4643_s11 = sld [smem:[#allocation5 + $0x37]] }
 0x1d4   : > { %v2081_v6 = vmul.f32 %v2080_v60, %v4476_v32  ;;  %v2109_v35 = vmul.f32 %v2108_v27, %v4476_v32 }
 0x1d5   : > { %v4457_v11 = vpop.permute.xlu1 %1519  ;;  %v4459_v54 = vpop.permute.xlu0 %1559 }
 0x1d6   : > { %5040 = vst [vmem:[#allocation20_spill] sm:$0xff] %v4457_v11 }
 0x1d7   : > { %2045 = vrot.lane.b32.xlu1 %v2040_v43, %s4980_s19  ;;  %2071 = vrot.lane.b32.xlu0 %v2067_v62, %s4980_s19  ;;  %v2068_v43 = vmul.f32 %v4467_v51, %v2066_v44  ;;  %v1285_v44 = vadd.f32 %v4189_v28, %v4161_v48  ;;  %v2123_v48 = vmul.f32 %v4441_v38, %v2122_v17 }
 0x1d9   : > { %v4471_v39 = vpop.permute.xlu1 %1533  ;;  %v4473_v25 = vpop.permute.xlu0 %1545  ;;  %v1299_v41 = vadd.f32 %v4216_v37, %v1285_v44 }
 0x1db   : > { %2059 = vrot.lane.b32.xlu1 %v2054_v12, %s4980_s19  ;;  %2099 = vrot.lane.b32.xlu0 %v2095_v26, %s4980_s19  ;;  %v2096_v12 = vmul.f32 %v4467_v51, %v2094_v49  ;;  %v1327_v26 = vadd.f32 %v4255_v47, %v1313_v7  ;;  %v1369_v37 = vadd.f32 %v4294_v21, %v1299_v41  ;;  %v2136_v7 = vstv %s4485_s15  ;;  %s4654_s15 = sld [smem:[#allocation5 + $0x3a]] }
 0x1dc   : > { %v2150_v21 = vstv %s4493_s25  ;;  %s4660_s25 = sld [smem:[#allocation5 + $0x3c]] }
 0x1dd   : > { %v4482_v62 = vpop.permute.xlu1 %1561  ;;  %v1574_v33 = vpop.permute.xlu0 %1573  ;;  %v1397_v49 = vadd.f32 %v4321_v53, %v1327_v26  ;;  %v1383_v44 = vadd.f32 %v4307_v20, %v1369_v37 }
 0x1df   : > { %2073 = vrot.lane.b32.xlu1 %v2068_v43, %s4980_s19  ;;  %2085 = vrot.lane.b32.xlu0 %v2081_v6, %s4980_s19  ;;  %v1286_v6 = vadd.f32 %v4233_v5, %v4207_v36  ;;  %v4506_v43 = vld [vmem:[#allocation2 + $0x3a] sm:$0xff]  ;;  %v1411_v47 = vadd.f32 %v4332_v63, %v1397_v49 }
 0x1e0   : > { %v2082_v53 = vmul.f32 %v2080_v60, %v4506_v43  ;;  %v1453_v60 = vadd.f32 %v4370_v61, %v1383_v44 }
 0x1e1   : > { %v1548_v11 = vpop.permute.xlu1 %1547  ;;  %v4499_v3 = vpop.permute.xlu0 %1587  ;;  %v1300_v28 = vadd.f32 %v4253_v9, %v1286_v6  ;;  %v1481_v9 = vadd.f32 %v4383_v56, %v1411_v47  ;;  %v2137_v56 = vmul.f32 %v2136_v7, %v4476_v32 }
 0x1e2   : > { %v1467_v61 = vadd.f32 %v4397_v57, %v1453_v60 }
 0x1e3   : > { %2101 = vrot.lane.b32.xlu1 %v2096_v12, %s4980_s19  ;;  %2113 = vrot.lane.b32.xlu0 %v2109_v35, %s4980_s19  ;;  %v1314_v12 = vadd.f32 %v4268_v10, %v4242_v40  ;;  %v1370_v26 = vadd.f32 %v4319_v8, %v1300_v28  ;;  %v1495_v41 = vadd.f32 %v4408_v52, %v1481_v9 }
 0x1e4   : > { %v1341_v40 = vadd.f32 %v4270_v45, %v4247_v46  ;;  %v2110_v8 = vmul.f32 %v2108_v27, %v4506_v43  ;;  %v2124_v46 = vmul.f32 %v4467_v51, %v2122_v17  ;;  %v2151_v45 = vmul.f32 %v2150_v21, %v4289_v14 }
 0x1e5   : > { %v4516_v36 = vpop.permute.xlu1 %1575  ;;  %v4518_v5 = vpop.permute.xlu0 %1601  ;;  %v1328_v63 = vadd.f32 %v4280_v50, %v1314_v12  ;;  %v1384_v35 = vadd.f32 %v4330_v2, %v1370_v26  ;;  %v1565_v52 = vadd.f32 %v4459_v54, %v1495_v41  ;;  %v2178_v27 = vstv %s4511_s13  ;;  %s4675_s13 = sld [smem:[#allocation7 + $0x3b]] }
 0x1e6   : > { %v1355_v6 = vadd.f32 %v4282_v1, %v1341_v40  ;;  %v2164_v12 = vstv %s4540_s5  ;;  %s4681_s5 = sld [smem:[#allocation5 + $0x4d]] }
 0x1e7   : > { %2087 = vrot.lane.b32.xlu1 %v2082_v53, %s4980_s19  ;;  %2127 = vrot.lane.b32.xlu0 %v2123_v48, %s4980_s19  ;;  %v1398_v50 = vadd.f32 %v4344_v22, %v1328_v63  ;;  %v1454_v2 = vadd.f32 %v4395_v18, %v1384_v35  ;;  %v1537_v18 = vadd.f32 %v4446_v42, %v1467_v61 }
 0x1e8   : > { %v1579_v57 = vadd.f32 %v1574_v33, %v1565_v52  ;;  %v1425_v54 = vadd.f32 %v4346_v19, %v1355_v6  ;;  %v2179_v33 = vmul.f32 %v2178_v27, %v4289_v14  ;;  %v2138_v53 = vmul.f32 %v2136_v7, %v4506_v43 }
 0x1e9   : > { %v4536_v10 = vpop.permute.xlu1 %1589  ;;  %v1616_v20 = vpop.permute.xlu0 %1615  ;;  %v1412_v49 = vadd.f32 %v4356_v29, %v1398_v50  ;;  %v1468_v22 = vadd.f32 %v4420_v4, %v1454_v2  ;;  %v1551_v37 = vadd.f32 %v4473_v25, %v1537_v18 }
 0x1ea   : > { %v1439_v19 = vadd.f32 %v4358_v59, %v1425_v54 }
 0x1eb   : > { %2115 = vrot.lane.b32.xlu1 %v2110_v8, %s4980_s19  ;;  %2141 = vrot.lane.b32.xlu0 %v2137_v56, %s4980_s19  ;;  %v1482_v28 = vadd.f32 %v4406_v30, %v1412_v49  ;;  %v1538_v17 = vadd.f32 %v4471_v39, %v1468_v22  ;;  %v1621_v47 = vadd.f32 %v1616_v20, %v1551_v37  ;;  %v5041_v8 = vld [vmem:[#allocation22_spill] sm:$0xff] }
 0x1ec   : > { %v1342_v30 = vadd.f32 %v4292_v23, %v4273_v13  ;;  %v1509_v44 = vadd.f32 %v4422_v31, %v1439_v19  ;;  %v2165_v31 = vmul.f32 %v2164_v12, %v4324_v24 }
 0x1ed   : > { %v4556_v48 = vpop.permute.xlu1 %1603  ;;  %v1644_v1 = vpop.permute.xlu0 %1643  ;;  %v1496_v4 = vadd.f32 %v4432_v34, %v1482_v28  ;;  %v1552_v42 = vadd.f32 %v1548_v11, %v1538_v17  ;;  %v2152_v34 = vmul.f32 %v2150_v21, %v4315_v58  ;;  %v2206_v21 = vstv %s4568_s10  ;;  %s4691_s10 = sld [smem:[#allocation5 + $0x3d]] }
 0x1ee   : > { %v1649_v29 = vadd.f32 %v1644_v1, %v1579_v57  ;;  %v1356_v13 = vadd.f32 %v4305_v55, %v1342_v30  ;;  %v1523_v23 = vadd.f32 %v4434_v16, %v1509_v44  ;;  %v2180_v55 = vmul.f32 %v2178_v27, %v4315_v58 }
 0x1ef   : > { %2129 = vrot.lane.b32.xlu1 %v2124_v46, %s4980_s19  ;;  %2155 = vrot.lane.b32.xlu0 %v2151_v45, %s4981_s20  ;;  %v1566_v26 = vadd.f32 %v4482_v62, %v1496_v4  ;;  %v2192_v62 = vstv %s4558_s14  ;;  %v5043_v46 = vld [vmem:[#allocation14_spill] sm:$0xff]  ;;  %v2234_v57 = vstv %s4596_s16  ;;  %s4689_s14 = sld [smem:[#allocation5 + $0x38]]  ;;  %s4743_s16 = sld [smem:[#allocation5 + $0x4e]] }
 0x1f0   : > { %v1426_v35 = vadd.f32 %v4368_v0, %v1356_v13  ;;  %v1593_v60 = vadd.f32 %v4499_v3, %v1523_v23  ;;  %v2193_v20 = vmul.f32 %v2192_v62, %v4324_v24  ;;  %v2166_v45 = vmul.f32 %v2164_v12, %v5043_v46 }
 0x1f1   : > { %v1618_v39 = vpop.permute.xlu1 %1617  ;;  %v1630_v25 = vpop.permute.xlu0 %1629  ;;  %v1580_v11 = vadd.f32 %v4516_v36, %v1566_v26  ;;  %v2194_v28 = vmul.f32 %v2192_v62, %v5043_v46  ;;  %v1788_v4 = vstv %s4602_s17  ;;  %v2276_v12 = vstv %s4614_s12  ;;  %s4753_s17 = sld [smem:[#allocation5 + $0x3e]]  ;;  %s4808_s12 = sld [smem:[#allocation7 + $0x4f]] }
 0x1f2   : > { %v1622_v59 = vadd.f32 %v1618_v39, %v1552_v42  ;;  %v1635_v9 = vadd.f32 %v1630_v25, %v1621_v47  ;;  %v1440_v16 = vadd.f32 %v4381_v15, %v1426_v35  ;;  %v1607_v36 = vadd.f32 %v4518_v5, %v1593_v60  ;;  %v5042_v5 = vld [vmem:[#allocation20_spill] sm:$0xff]  ;;  %v5045_v35 = vld [vmem:[#allocation31_spill] sm:$0xff] }
 0x1f3   : > { %2143 = vrot.lane.b32.xlu1 %v2138_v53, %s4980_s19  ;;  %2183 = vrot.lane.b32.xlu0 %v2179_v33, %s4981_s20  ;;  %s4588_s19 = sld [smem:[#allocation7 + $0x4a]]  ;;  %v2207_v15 = vmul.f32 %v2206_v21, %v4289_v14  ;;  %v5044_v33 = vld [vmem:[#allocation25_spill] sm:$0xff]  ;;  %v2262_v42 = vstv %s4612_s27  ;;  %v1800_v47 = vstv %s4607_s18  ;;  %v1789_v13 = vmul.f32 %v1788_v4, %v4324_v24  ;;  %s4762_s18 = sld [smem:[#allocation5 + $0x4f]] }
 0x1f4   : > { %v1510_v56 = vadd.f32 %v5041_v8, %v1440_v16  ;;  %v2235_v19 = vmul.f32 %v5044_v33, %v2234_v57  ;;  %v1782_v25 = vstv %s4617_s0  ;;  %v2248_v53 = vstv %s4609_s21  ;;  %s4773_s21 = sld [smem:[#allocation7 + $0x3e]]  ;;  %s4819_s0 = sld [smem:[#allocation5 + $0x50]] }
 0x1f5   : > { %v1646_v7 = vpop.permute.xlu1 %1645  ;;  %v1658_v63 = vpop.permute.xlu0 %1657  ;;  %v1812_v44 = vstv %s4619_s3  ;;  %v2263_v23 = vmul.f32 %v5044_v33, %v2262_v42  ;;  %v1801_v62 = vmul.f32 %v1800_v47, %v4324_v24  ;;  %v2249_v60 = vmul.f32 %v2248_v53, %v5045_v35  ;;  %s4787_s27 = sld [smem:[#allocation7 + $0x4e]]  ;;  %s4835_s3 = sld [smem:[#allocation7 + $0x50]] }
 0x1f6   : > { %v1650_v41 = vadd.f32 %v1646_v7, %v1580_v11  ;;  %v4586_v40 = vadd.f32 %v1658_v63, %v1649_v29  ;;  %v1524_v61 = vadd.f32 %v5042_v5, %v1510_v56  ;;  %v2304_v11 = vstv %s4633_s2  ;;  %v5046_v56 = vld [vmem:[#allocation24_spill] sm:$0xff]  ;;  %s4878_s2 = sld [smem:[#allocation8 + $0x1]] }
 0x1f7   : > { %2157 = vrot.lane.b32.xlu1 %v2152_v34, %s4981_s20  ;;  %2169 = vrot.lane.b32.xlu0 %v2165_v31, %s4981_s20  ;;  %v1868_v34 = vstv %s4629_s1  ;;  %v1840_v7 = vstv %s4635_s22  ;;  %v1783_v63 = vmul.f32 %v1782_v25, %v4289_v14  ;;  %v4700_v8 = vmul.f32 %v1812_v44, %v4324_v24  ;;  %s4874_s1 = sld [smem:[#allocation10 + $0x1]] }
 0x1f8   : > { %v1594_v27 = vadd.f32 %v4536_v10, %v1524_v61  ;;  %v1794_v16 = vstv %s4643_s11  ;;  %v1880_v61 = vstv %s4649_s23 }
 0x1f9   : > { %v1632_v0 = vpop.permute.xlu1 %1631  ;;  %v1672_v3 = vpop.permute.xlu0 %1671  ;;  %v2220_v18 = vstv %s4588_s19  ;;  %s4705_s19 = sld [smem:[#allocation5 + $0x3b]] }
 0x1fa   : > { %v4600_v50 = vadd.f32 %v1632_v0, %v1622_v59  ;;  %v1677_v2 = vadd.f32 %v1672_v3, %v1607_v36  ;;  %v1608_v10 = vadd.f32 %v4556_v48, %v1594_v27  ;;  %v2221_v17 = vmul.f32 %v2220_v18, %v4324_v24 }
 0x1fb   : > { %2185 = vrot.lane.b32.xlu1 %v2180_v55, %s4981_s20  ;;  %2197 = vrot.lane.b32.xlu0 %v2193_v20, %s4981_s20  ;;  %v2208_v48 = vmul.f32 %v2206_v21, %v4315_v58  ;;  %v2222_v31 = vmul.f32 %v2220_v18, %v5043_v46  ;;  %v4686_v36 = vmul.f32 %v1788_v4, %v5043_v46 }
 0x1fc   : > { %v2277_v21 = vmul.f32 %v2276_v12, %v5045_v35  ;;  %v4695_v20 = vmul.f32 %v1800_v47, %v5043_v46  ;;  %v2264_v4 = vmul.f32 %v5046_v56, %v2262_v42 }
 0x1fd   : > { %v1660_v52 = vpop.permute.xlu1 %1659  ;;  %v1686_v6 = vpop.permute.xlu0 %1685  ;;  %s2435_s11 = smul.f32 %s4874_s1, %s3167_s28 }
 0x1fe   : > { %v4622_v49 = vadd.f32 %v1660_v52, %v1650_v41  ;;  %v4624_v22 = vadd.f32 %v1686_v6, %v1677_v2  ;;  %v2236_v2 = vmul.f32 %v5046_v56, %v2234_v57  ;;  %v1795_v6 = vmul.f32 %v1794_v16, %v4289_v14 }
 0x1ff   : > { %2171 = vrot.lane.b32.xlu1 %v2166_v45, %s4981_s20  ;;  %2211 = vrot.lane.b32.xlu0 %v2207_v15, %s4981_s20  ;;  %v1834_v45 = vstv %s4654_s15  ;;  %v1869_v57 = vmul.f32 %v1868_v34, %v4476_v32 }
 0x201   : > { %v1674_v54 = vpop.permute.xlu1 %1673  ;;  %v1700_v1 = vpop.permute.xlu0 %1699 }
 0x202   : > { %v1678_v37 = vadd.f32 %v1674_v54, %v1608_v10  ;;  %v1705_v29 = vadd.f32 %v1700_v1, %v1635_v9  ;;  %v1828_v9 = vstv %s4627_s29  ;;  %v1862_v10 = vstv %s4660_s25  ;;  %s4872_s29 = sld [smem:[#allocation8]] }
 0x203   : > { %2199 = vrot.lane.b32.xlu1 %v2194_v28, %s4981_s20  ;;  %2225 = vrot.lane.b32.xlu0 %v2221_v17, %s4981_s20  ;;  %v1829_v5 = vmul.f32 %v1828_v9, %v5045_v35  ;;  %v4725_v1 = vmul.f32 %v2304_v11, %v5045_v35 }
 0x205   : > { %v1688_v30 = vpop.permute.xlu1 %1687  ;;  %v1728_v39 = vpop.permute.xlu0 %1727 }
 0x206   : > { %v4662_v26 = vadd.f32 %v1688_v30, %v1678_v37  ;;  %v1733_v59 = vadd.f32 %v1728_v39, %v4586_v40  ;;  %v1822_v40 = vstv %s4641_s26  ;;  %v2290_v39 = vstv %s4681_s5  ;;  %s2828_s26 = smul.u32 48, %s3159_s24  ;;  %s4894_s5 = sld [smem:[#allocation10 + $0x2]] }
 0x207   : > { %2213 = vrot.lane.b32.xlu1 %v2208_v48, %s4981_s20  ;;  %2239 = vrot.lane.b32.xlu0 %v2235_v19, %s4981_s20  ;;  %v1823_v52 = vmul.f32 %v5044_v33, %v1822_v40  ;;  %v1835_v48 = vmul.f32 %v5044_v33, %v1834_v45  ;;  %v1784_v19 = vmul.f32 %v1782_v25, %v4315_v58 }
 0x208   : > { %v1881_v25 = vmul.f32 %v1880_v61, %v4476_v32  ;;  %s4889_s25 = scalar_lea.vmem %s4929_s4, %s2828_s26 }
 0x209   : > { %v1702_v41 = vpop.permute.xlu1 %1701  ;;  %v1714_v55 = vpop.permute.xlu0 %1713 }
 0x20a   : > { %v1706_v0 = vadd.f32 %v1702_v41, %v4600_v50  ;;  %v1719_v3 = vadd.f32 %v1714_v55, %v1705_v29  ;;  %v5047_v50 = vld [vmem:[#allocation32_spill] sm:$0xff]  ;;  %v1841_v29 = vmul.f32 %v1840_v7, %v5045_v35  ;;  %v1824_v55 = vmul.f32 %v5046_v56, %v1822_v40 }
 0x20b   : > { %2227 = vrot.lane.b32.xlu1 %v2222_v31, %s4981_s20  ;;  %2267 = vrot.lane.b32.xlu0 %v2263_v23, %s4981_s20  ;;  %v2250_v15 = vmul.f32 %v2248_v53, %v5047_v50  ;;  %v4720_v54 = vmul.f32 %v2276_v12, %v5047_v50  ;;  %v1863_v53 = vmul.f32 %v4441_v38, %v1862_v10  ;;  %v1874_v23 = vstv %s4691_s10 }
 0x20c   : > { %v1785_v24 = vadd.f32 %v1783_v63, %v1719_v3  ;;  %v1830_v42 = vmul.f32 %v1828_v9, %v5047_v50  ;;  %v1796_v3 = vmul.f32 %v1794_v16, %v4315_v58  ;;  %v2291_v9 = vmul.f32 %v5044_v33, %v2290_v39 }
 0x20d   : > { %v1730_v27 = vpop.permute.xlu1 %1729  ;;  %v1742_v18 = vpop.permute.xlu0 %1741  ;;  %v1836_v40 = vmul.f32 %v5046_v56, %v1834_v45  ;;  %v1842_v16 = vmul.f32 %v1840_v7, %v5047_v50 }
 0x20e   : > { %v1791_v28 = vadd.f32 %v1789_v13, %v1785_v24  ;;  %v1734_v17 = vadd.f32 %v1730_v27, %v4622_v49  ;;  %v1747_v37 = vadd.f32 %v1742_v18, %v1733_v59  ;;  %v1852_v49 = vstv %s4675_s13  ;;  %s4892_s13 = sld [smem:[#allocation8 + $0x2]] }
 0x20f   : > { %2241 = vrot.lane.b32.xlu1 %v2236_v2, %s4981_s20  ;;  %2253 = vrot.lane.b32.xlu0 %v2249_v60, %s4981_s20  ;;  %v1806_v13 = vstv %s4689_s14  ;;  %v1846_v2 = vstv %s4705_s19  ;;  %s2464_s14 = smul.f32 %s4894_s5, %s3167_s28 }
 0x210   : > { %v1825_v47 = vadd.f32 %v1823_v52, %v1791_v28  ;;  %v1797_v30 = vadd.f32 %v1795_v6, %v1747_v37  ;;  %v1875_v6 = vmul.f32 %v4441_v38, %v1874_v23  ;;  %v1847_v45 = vmul.f32 %v5044_v33, %v1846_v2 }
 0x211   : > { %v1716_v12 = vpop.permute.xlu1 %1715  ;;  %v1756_v59 = vpop.permute.xlu0 %1755  ;;  %v1808_v7 = vmul.f32 %v1806_v13, %v4315_v58  ;;  %v1864_v33 = vmul.f32 %v4467_v51, %v1862_v10 }
 0x212   : > { %v1803_v63 = vadd.f32 %v1801_v62, %v1797_v30  ;;  %v1720_v31 = vadd.f32 %v1716_v12, %v1706_v0  ;;  %v1761_v60 = vadd.f32 %v1756_v59, %v4624_v22  ;;  %v1831_v41 = vadd.f32 %v1829_v5, %v1825_v47 }
 0x213   : > { %2269 = vrot.lane.b32.xlu1 %v2264_v4, %s4981_s20  ;;  %2281 = vrot.lane.b32.xlu0 %v2277_v21, %s4981_s20  ;;  %v1807_v22 = vmul.f32 %v1806_v13, %v4289_v14  ;;  %v1853_v21 = vmul.f32 %v1852_v49, %v5045_v35  ;;  %v2318_v4 = vstv %s4743_s16  ;;  %v2346_v59 = vstv %s4762_s18 }
 0x214   : > { %v1837_v62 = vadd.f32 %v1835_v48, %v1803_v63  ;;  %v1786_v0 = vadd.f32 %v1784_v19, %v1720_v31  ;;  %v1865_v5 = vadd.f32 %v1863_v53, %v1831_v41 }
 0x215   : > { %v1744_v52 = vpop.permute.xlu1 %1743  ;;  %v1770_v24 = vpop.permute.xlu0 %1769 }
 0x216   : > { %v1792_v27 = vadd.f32 %v4686_v36, %v1786_v0  ;;  %v1748_v18 = vadd.f32 %v1744_v52, %v1734_v17  ;;  %v1775_v14 = vadd.f32 %v1770_v24, %v1761_v60  ;;  %v1871_v28 = vadd.f32 %v1869_v57, %v1865_v5 }
 0x217   : > { %2255 = vrot.lane.b32.xlu1 %v2250_v15, %s4981_s20  ;;  %2295 = vrot.lane.b32.xlu0 %v2291_v9, %s4981_s20  ;;  %v1843_v37 = vadd.f32 %v1841_v29, %v1837_v62  ;;  %v2292_v57 = vmul.f32 %v5046_v56, %v2290_v39  ;;  %v1886_v15 = vstv %s4753_s17  ;;  %v2319_v39 = vmul.f32 %v4441_v38, %v2318_v4 }
 0x218   : > { %v1826_v35 = vadd.f32 %v1824_v55, %v1792_v27  ;;  %v1798_v48 = vadd.f32 %v1796_v3, %v1748_v18  ;;  %v1809_v19 = vadd.f32 %v1807_v22, %v1775_v14  ;;  %v1887_v63 = vmul.f32 %v4441_v38, %v1886_v15 }
 0x219   : > { %v1758_v36 = vpop.permute.xlu1 %1757  ;;  %v1904_v17 = vpop.permute.xlu0 %1903  ;;  %v1877_v47 = vadd.f32 %v1875_v6, %v1843_v37  ;;  %v1892_v60 = vstv %s4773_s21  ;;  %v1848_v3 = vmul.f32 %v5046_v56, %v1846_v2  ;;  %v2332_v52 = vstv %s4787_s27  ;;  %s452_s27 = scalar_lea.vmem %s4934_s9, %s3159_s24 }
 0x21a   : > { %v1804_v58 = vadd.f32 %v4695_v20, %v1798_v48  ;;  %v1815_v29 = vadd.f32 %v4700_v8, %v1809_v19  ;;  %v1762_v30 = vadd.f32 %v1758_v36, %v4662_v26  ;;  %v1909_v53 = vadd.f32 %v1904_v17, %v1871_v28 }
 0x21b   : > { %2283 = vrot.lane.b32.xlu1 %v4720_v54, %s4981_s20  ;;  %2309 = vrot.lane.b32.xlu0 %v4725_v1, %s4981_s20  ;;  %v1883_v10 = vadd.f32 %v1881_v25, %v1877_v47  ;;  %v1832_v12 = vadd.f32 %v1830_v42, %v1826_v35  ;;  %v1876_v8 = vmul.f32 %v4467_v51, %v1874_v23  ;;  %v2360_v35 = vstv %s4808_s12 }
 0x21c   : > { %v1838_v13 = vadd.f32 %v1836_v40, %v1804_v58  ;;  %v1849_v20 = vadd.f32 %v1847_v45, %v1815_v29  ;;  %v1814_v26 = vmul.f32 %v1812_v44, %v5043_v46  ;;  %v1870_v1 = vmul.f32 %v1868_v34, %v4506_v43 }
 0x21d   : > { %v1772_v54 = vpop.permute.xlu1 %1771  ;;  %v1932_v31 = vpop.permute.xlu0 %1931  ;;  %v1866_v25 = vadd.f32 %v1864_v33, %v1832_v12  ;;  %v2347_v44 = vmul.f32 %v4441_v38, %v2346_v59  ;;  %v1882_v34 = vmul.f32 %v1880_v61, %v4506_v43  ;;  %v2306_v40 = vmul.f32 %v2304_v11, %v5047_v50 }
 0x21e   : > { %v1776_v42 = vadd.f32 %v1772_v54, %v1762_v30  ;;  %v1937_v41 = vadd.f32 %v1932_v31, %v1883_v10  ;;  %v1844_v55 = vadd.f32 %v1842_v16, %v1838_v13  ;;  %v1855_v23 = vadd.f32 %v1853_v21, %v1849_v20 }
 0x21f   : > { %2297 = vrot.lane.b32.xlu1 %v2292_v57, %s4981_s20  ;;  %2323 = vrot.lane.b32.xlu0 %v2319_v39, %s4981_s20  ;;  %v1872_v46 = vadd.f32 %v1870_v1, %v1866_v25  ;;  %v1893_v24 = vmul.f32 %v1892_v60, %v4476_v32  ;;  %v2320_v56 = vmul.f32 %v4467_v51, %v2318_v4  ;;  %v2374_v4 = vstv %s4819_s0 }
 0x220   : > { %v1810_v9 = vadd.f32 %v1808_v7, %v1776_v42  ;;  %v1878_v62 = vadd.f32 %v1876_v8, %v1844_v55  ;;  %v1889_v0 = vadd.f32 %v1887_v63, %v1855_v23  ;;  %v1854_v11 = vmul.f32 %v1852_v49, %v5047_v50 }
 0x221   : > { %v1906_v22 = vpop.permute.xlu1 %1905  ;;  %v1918_v5 = vpop.permute.xlu0 %1917  ;;  %v1888_v18 = vmul.f32 %v4467_v51, %v1886_v15  ;;  %v2333_v45 = vmul.f32 %v2332_v52, %v4476_v32  ;;  %v2348_v19 = vmul.f32 %v4467_v51, %v2346_v59  ;;  %v1894_v50 = vmul.f32 %v1892_v60, %v4506_v43 }
 0x222   : > { %v1816_v6 = vadd.f32 %v1814_v26, %v1810_v9  ;;  %v1910_v61 = vadd.f32 %v1906_v22, %v1872_v46  ;;  %v1923_v16 = vadd.f32 %v1918_v5, %v1909_v53  ;;  %v1884_v21 = vadd.f32 %v1882_v34, %v1878_v62 }
 0x223   : > { %2311 = vrot.lane.b32.xlu1 %v2306_v40, %s4981_s20  ;;  %2351 = vrot.lane.b32.xlu0 %v2347_v44, %s4981_s20  ;;  %v1895_v2 = vadd.f32 %v1893_v24, %v1889_v0  ;;  %v2361_v47 = vmul.f32 %v2360_v35, %v4476_v32  ;;  %v2375_v58 = vmul.f32 %v4441_v38, %v2374_v4  ;;  %v2388_v12 = vstv %s4835_s3 }
 0x224   : > { %v1850_v27 = vadd.f32 %v1848_v3, %v1816_v6  ;;  %v2334_v53 = vmul.f32 %v2332_v52, %v4506_v43  ;;  %v2362_v20 = vmul.f32 %v2360_v35, %v4506_v43  ;;  %v2389_v8 = vmul.f32 %v2388_v12, %v4476_v32 }
 0x225   : > { %v1934_v14 = vpop.permute.xlu1 %1933  ;;  %v1946_v28 = vpop.permute.xlu0 %1945  ;;  %v2376_v38 = vmul.f32 %v4467_v51, %v2374_v4 }
 0x226   : > { %v1938_v7 = vadd.f32 %v1934_v14, %v1884_v21  ;;  %v1951_v37 = vadd.f32 %v1946_v28, %v1937_v41  ;;  %v1856_v48 = vadd.f32 %v1854_v11, %v1850_v27  ;;  %v2390_v41 = vmul.f32 %v2388_v12, %v4506_v43 }
 0x227   : > { %2325 = vrot.lane.b32.xlu1 %v2320_v56, %s4981_s20  ;;  %2337 = vrot.lane.b32.xlu0 %v2333_v45, %s4981_s20 }
 0x228   : > { %v1890_v49 = vadd.f32 %v1888_v18, %v1856_v48 }
 0x229   : > { %v1920_v36 = vpop.permute.xlu1 %1919  ;;  %v1960_v17 = vpop.permute.xlu0 %1959 }
 0x22a   : > { %v1924_v57 = vadd.f32 %v1920_v36, %v1910_v61  ;;  %v1965_v33 = vadd.f32 %v1960_v17, %v1895_v2  ;;  %v1896_v15 = vadd.f32 %v1894_v50, %v1890_v49 }
 0x22b   : > { %2353 = vrot.lane.b32.xlu1 %v2348_v19, %s4981_s20  ;;  %2365 = vrot.lane.b32.xlu0 %v2361_v47, %s4981_s20 }
 0x22d   : > { %v1948_v29 = vpop.permute.xlu1 %1947  ;;  %v1974_v30 = vpop.permute.xlu0 %1973 }
 0x22e   : > { %v1952_v10 = vadd.f32 %v1948_v29, %v1938_v7  ;;  %v1979_v39 = vadd.f32 %v1974_v30, %v1965_v33 }
 0x22f   : > { %2339 = vrot.lane.b32.xlu1 %v2334_v53, %s4981_s20  ;;  %2379 = vrot.lane.b32.xlu0 %v2375_v58, %s4981_s20 }
 0x231   : > { %v1962_v59 = vpop.permute.xlu1 %1961  ;;  %v1988_v13 = vpop.permute.xlu0 %1987 }
 0x232   : > { %v1966_v63 = vadd.f32 %v1962_v59, %v1896_v15  ;;  %v1993_v26 = vadd.f32 %v1988_v13, %v1923_v16 }
 0x233   : > { %2367 = vrot.lane.b32.xlu1 %v2362_v20, %s4981_s20  ;;  %2393 = vrot.lane.b32.xlu0 %v2389_v8, %s4981_s20 }
 0x235   : > { %v1976_v54 = vpop.permute.xlu1 %1975  ;;  %v2016_v31 = vpop.permute.xlu0 %2015 }
 0x236   : > { %v1980_v1 = vadd.f32 %v1976_v54, %v1966_v63  ;;  %v2021_v25 = vadd.f32 %v2016_v31, %v1951_v37 }
 0x237   : > { %2381 = vrot.lane.b32.xlu1 %v2376_v38, %s4981_s20 }
 0x239   : > { %v1990_v60 = vpop.permute.xlu1 %1989  ;;  %v2002_v42 = vpop.permute.xlu0 %2001 }
 0x23a   : > { %v1994_v55 = vadd.f32 %v1990_v60, %v1924_v57  ;;  %v2007_v32 = vadd.f32 %v2002_v42, %v1993_v26 }
 0x23b   : > { %2395 = vrot.lane.b32.xlu1 %v2390_v41, %s4981_s20  ;;  %s4868_s20 = sld [smem:[#allocation10]] }
 0x23d   : > { %v2018_v23 = vpop.permute.xlu1 %2017  ;;  %v2030_v46 = vpop.permute.xlu0 %2029 }
 0x23e   : > { %v2022_v44 = vadd.f32 %v2018_v23, %v1952_v10  ;;  %v2035_v34 = vadd.f32 %v2030_v46, %v2021_v25 }
 0x241   : > { %v2004_v3 = vpop.permute.xlu1 %2003  ;;  %v2044_v51 = vpop.permute.xlu0 %2043  ;;  %s2406_s22 = smul.f32 %s4868_s20, %s3167_s28 }
 0x242   : > { %v2008_v9 = vadd.f32 %v2004_v3, %v1994_v55  ;;  %v2049_v62 = vadd.f32 %v2044_v51, %v1979_v39 }
 0x245   : > { %v2032_v0 = vpop.permute.xlu1 %2031  ;;  %v2058_v22 = vpop.permute.xlu0 %2057 }
 0x246   : > { %v2036_v5 = vadd.f32 %v2032_v0, %v2022_v44  ;;  %v2063_v40 = vadd.f32 %v2058_v22, %v2049_v62  ;;  %v2402_v22 = vstv %s4872_s29 }
 0x249   : > { %v2046_v52 = vpop.permute.xlu1 %2045  ;;  %v2072_v24 = vpop.permute.xlu0 %2071 }
 0x24a   : > { %v2050_v6 = vadd.f32 %v2046_v52, %v1980_v1  ;;  %v2077_v43 = vadd.f32 %v2072_v24, %v2007_v32 }
 0x24d   : > { %v2060_v61 = vpop.permute.xlu1 %2059  ;;  %v2100_v16 = vpop.permute.xlu0 %2099 }
 0x24e   : > { %v4858_v21 = vadd.f32 %v2060_v61, %v2050_v6  ;;  %v2105_v56 = vadd.f32 %v2100_v16, %v2035_v34  ;;  %v2407_v16 = vstv %s2406_s22 }
 0x251   : > { %v2074_v2 = vpop.permute.xlu1 %2073  ;;  %v2086_v27 = vpop.permute.xlu0 %2085 }
 0x252   : > { %v2078_v11 = vadd.f32 %v2074_v2, %v2008_v9  ;;  %v2091_v38 = vadd.f32 %v2086_v27, %v2077_v43 }
 0x255   : > { %v2102_v18 = vpop.permute.xlu1 %2101  ;;  %v2114_v14 = vpop.permute.xlu0 %2113 }
 0x256   : > { %v2106_v28 = vadd.f32 %v2102_v18, %v2036_v5  ;;  %v2119_v25 = vadd.f32 %v2114_v14, %v2105_v56  ;;  %v2431_v18 = vstv %s4878_s2 }
 0x259   : > { %v2088_v45 = vpop.permute.xlu1 %2087  ;;  %v2128_v7 = vpop.permute.xlu0 %2127 }
 0x25a   : > { %v2092_v23 = vadd.f32 %v2088_v45, %v2078_v11  ;;  %v2133_v34 = vadd.f32 %v2128_v7, %v2063_v40 }
 0x25d   : > { %v2116_v37 = vpop.permute.xlu1 %2115  ;;  %v2142_v35 = vpop.permute.xlu0 %2141 }
 0x25e   : > { %v2120_v62 = vadd.f32 %v2116_v37, %v2106_v28  ;;  %v2147_v52 = vadd.f32 %v2142_v35, %v2133_v34  ;;  %v2465_v34 = vstv %s2464_s14 }
 0x261   : > { %v4860_v48 = vpop.permute.xlu1 %2129  ;;  %v2156_v19 = vpop.permute.xlu0 %2155 }
 0x262   : > { %v2161_v54 = vadd.f32 %v2156_v19, %v2091_v38  ;;  %v2134_v35 = vadd.f32 %v4860_v48, %v4858_v21  ;;  %v2411_v38 = vld [vmem:[%s4889_s25 + $0x8] sm:$0xff] }
 0x265   : > { %v4862_v4 = vpop.permute.xlu1 %2143  ;;  %v2184_v50 = vpop.permute.xlu0 %2183 }
 0x266   : > { %v2189_v42 = vadd.f32 %v2184_v50, %v2119_v25  ;;  %v2436_v50 = vstv %s2435_s11 }
 0x269   : > { %v2158_v49 = vpop.permute.xlu1 %2157  ;;  %v2170_v36 = vpop.permute.xlu0 %2169 }
 0x26a   : > { %v2175_v60 = vadd.f32 %v2170_v36, %v2161_v54  ;;  %v2162_v3 = vadd.f32 %v2158_v49, %v2092_v23 }
 0x26d   : > { %v2186_v17 = vpop.permute.xlu1 %2185  ;;  %v2198_v47 = vpop.permute.xlu0 %2197 }
 0x26e   : > { %v2203_v46 = vadd.f32 %v2198_v47, %v2189_v42  ;;  %v2190_v61 = vadd.f32 %v2186_v17, %v2120_v62  ;;  %v2410_v47 = vld [vmem:[%s4889_s25] sm:$0xff] }
 0x271   : > { %v2172_v57 = vpop.permute.xlu1 %2171  ;;  %v2212_v33 = vpop.permute.xlu0 %2211 }
 0x272   : > { %v2176_v24 = vadd.f32 %v2172_v57, %v2162_v3  ;;  %v2217_v56 = vadd.f32 %v2212_v33, %v2147_v52 }
 0x275   : > { %v2200_v15 = vpop.permute.xlu1 %2199  ;;  %v2226_v58 = vpop.permute.xlu0 %2225 }
 0x276   : > { %v2204_v28 = vadd.f32 %v2200_v15, %v2190_v61  ;;  %v2231_v45 = vadd.f32 %v2226_v58, %v2217_v56  ;;  %v2148_v58 = vadd.f32 %v4862_v4, %v2134_v35 }
 0x279   : > { %v4864_v29 = vpop.permute.xlu1 %2213  ;;  %v2240_v30 = vpop.permute.xlu0 %2239 }
 0x27a   : > { %v2245_v41 = vadd.f32 %v2240_v30, %v2175_v60 }
 0x27d   : > { %v4866_v53 = vpop.permute.xlu1 %2227  ;;  %v2268_v10 = vpop.permute.xlu0 %2267 }
 0x27e   : > { %v2273_v51 = vadd.f32 %v2268_v10, %v2203_v46 }
 0x281   : > { %v2242_v39 = vpop.permute.xlu1 %2241  ;;  %v2254_v12 = vpop.permute.xlu0 %2253 }
 0x282   : > { %v2259_v44 = vadd.f32 %v2254_v12, %v2245_v41  ;;  %v2246_v2 = vadd.f32 %v2242_v39, %v2176_v24  ;;  %v2218_v12 = vadd.f32 %v4864_v29, %v2148_v58  ;;  %v2823_v24 = vld [vmem:[%s4889_s25 + $0x20] sm:$0xff] }
 0x284   : > { %v2232_v60 = vadd.f32 %v4866_v53, %v2218_v12 }
 0x285   : > { %v2270_v59 = vpop.permute.xlu1 %2269  ;;  %v2282_v13 = vpop.permute.xlu0 %2281 }
 0x286   : > { %v2287_v6 = vadd.f32 %v2282_v13, %v2273_v51  ;;  %v2274_v49 = vadd.f32 %v2270_v59, %v2204_v28  ;;  %v2819_v13 = vld [vmem:[%s4889_s25 + $0x10] sm:$0xff] }
 0x289   : > { %v2256_v20 = vpop.permute.xlu1 %2255  ;;  %v2296_v8 = vpop.permute.xlu0 %2295 }
 0x28a   : > { %v2260_v7 = vadd.f32 %v2256_v20, %v2246_v2  ;;  %v2301_v36 = vadd.f32 %v2296_v8, %v2231_v45 }
 0x28d   : > { %v2284_v63 = vpop.permute.xlu1 %2283  ;;  %v2310_v26 = vpop.permute.xlu0 %2309 }
 0x28e   : > { %v2288_v30 = vadd.f32 %v2284_v63, %v2274_v49  ;;  %v2315_v10 = vadd.f32 %v2310_v26, %v2301_v36 }
 0x291   : > { %v4870_v31 = vpop.permute.xlu1 %2297  ;;  %v2324_v1 = vpop.permute.xlu0 %2323 }
 0x292   : > { %v2329_v9 = vadd.f32 %v2324_v1, %v2259_v44  ;;  %v2460_v1 = vstv %s4892_s13  ;;  %v2302_v29 = vadd.f32 %v4870_v31, %v2232_v60  ;;  %v2820_v44 = vld [vmem:[%s4889_s25 + $0x18] sm:$0xff] }
 0x295   : > { %v4876_v55 = vpop.permute.xlu1 %2311  ;;  %v2352_v32 = vpop.permute.xlu0 %2351 }
 0x296   : > { %v2357_v27 = vadd.f32 %v2352_v32, %v2287_v6  ;;  %v2316_v51 = vadd.f32 %v4876_v55, %v2302_v29 }
 0x299   : > { %v2326_v0 = vpop.permute.xlu1 %2325  ;;  %v2338_v5 = vpop.permute.xlu0 %2337 }
 0x29a   : > { %v2343_v43 = vadd.f32 %v2338_v5, %v2329_v9  ;;  %v2330_v17 = vadd.f32 %v2326_v0, %v2260_v7 }
 0x29c   : > { %v2403_v40 = vadd.f32 %v2402_v22, %v2343_v43 }
 0x29d   : > { %v2354_v11 = vpop.permute.xlu1 %2353  ;;  %v2366_v14 = vpop.permute.xlu0 %2365 }
 0x29e   : > { %v2371_v37 = vadd.f32 %v2366_v14, %v2357_v27  ;;  %v2408_v19 = vadd.f32 %v2407_v16, %v2403_v40  ;;  %v2358_v59 = vadd.f32 %v2354_v11, %v2288_v30  ;;  %v2824_v40 = vld [vmem:[%s4889_s25 + $0x28] sm:$0xff] }
 0x2a0   : > { %v2432_v57 = vadd.f32 %v2431_v18, %v2371_v37  ;;  %v2412_v21 = vsub.f32 %v2410_v47, %v2408_v19 }
 0x2a1   : > { %v2340_v33 = vpop.permute.xlu1 %2339  ;;  %v2380_v15 = vpop.permute.xlu0 %2379 }
 0x2a2   : > { %v2344_v39 = vadd.f32 %v2340_v33, %v2330_v17  ;;  %v2437_v48 = vadd.f32 %v2436_v50, %v2432_v57  ;;  %v2385_v8 = vadd.f32 %v2380_v15, %v2315_v10  ;;  %v2414_v41 = vmul.f32 %v2412_v21, %v2412_v21 }
 0x2a4   : > { %v2404_v20 = vadd.f32 %v2402_v22, %v2344_v39  ;;  %v2442_v42 = vsub.f32 %v2819_v13, %v2437_v48  ;;  %v2417_v53 = vsel %vm2416_vm4, %v2414_v41, 0.0 }
 0x2a5   : > { %v2368_v54 = vpop.permute.xlu1 %2367  ;;  %v2394_v25 = vpop.permute.xlu0 %2393 }
 0x2a6   : > { %v2409_v4 = vadd.f32 %v2407_v16, %v2404_v20  ;;  %v2372_v63 = vadd.f32 %v2368_v54, %v2358_v59  ;;  %v2399_v26 = vadd.f32 %v2394_v25, %v2385_v8  ;;  %v2444_v0 = vmul.f32 %v2442_v42, %v2442_v42 }
 0x2a8   : > { %v2413_v32 = vsub.f32 %v2411_v38, %v2409_v4  ;;  %v2433_v23 = vadd.f32 %v2431_v18, %v2372_v63  ;;  %v2461_v46 = vadd.f32 %v2460_v1, %v2399_v26  ;;  %v2446_v55 = vsel %vm2416_vm4, %v2444_v0, 0.0 }
 0x2a9   : > { %v2382_v3 = vpop.permute.xlu1 %2381 }
 0x2aa   : > { %v2438_v9 = vadd.f32 %v2436_v50, %v2433_v23  ;;  %v2415_v62 = vmul.f32 %v2413_v32, %v2413_v32  ;;  %v2466_v5 = vadd.f32 %v2465_v34, %v2461_v46  ;;  %v2386_v52 = vadd.f32 %v2382_v3, %v2316_v51 }
 0x2ac   : > { %v2443_v22 = vsub.f32 %v2820_v44, %v2438_v9  ;;  %v2418_v31 = vsel %vm2416_vm4, %v2415_v62, 0.0  ;;  %v2471_v56 = vsub.f32 %v2823_v24, %v2466_v5 }
 0x2ad   : > { %v2396_v6 = vpop.permute.xlu1 %2395  ;;  %v2419_v43 = vadd.f32 %v2418_v31, %v2417_v53 }
 0x2ae   : > { %v2400_v61 = vadd.f32 %v2396_v6, %v2386_v52  ;;  %v2445_v16 = vmul.f32 %v2443_v22, %v2443_v22  ;;  %v2473_v28 = vmul.f32 %v2471_v56, %v2471_v56 }
 0x2af   : > { %2420 = vadd.xlane.f32.xlu0 %v2419_v43 }
 0x2b0   : > { %v2462_v2 = vadd.f32 %v2460_v1, %v2400_v61  ;;  %v2447_v27 = vsel %vm2416_vm4, %v2445_v16, 0.0  ;;  %v2475_v7 = vsel %vm2416_vm4, %v2473_v28, 0.0 }
 0x2b1   : > { %v2448_v11 = vadd.f32 %v2447_v27, %v2446_v55 }
 0x2b2   : > { %v2467_v18 = vadd.f32 %v2465_v34, %v2462_v2 }
 0x2b3   : > { %2449 = vadd.xlane.f32.xlu1 %v2448_v11 }
 0x2b4   : > { %v2472_v14 = vsub.f32 %v2824_v40, %v2467_v18 }
 0x2b6   : > { %v2474_v45 = vmul.f32 %v2472_v14, %v2472_v14 }
 0x2b8   : > { %v2476_v37 = vsel %vm2416_vm4, %v2474_v45, 0.0 }
 0x2b9   : > { %v2477_v35 = vadd.f32 %v2476_v37, %v2475_v7 }
 0x2bb   : > { %2478 = vadd.xlane.f32.xlu0 %v2477_v35 }
 0x33c   : > { %v2421_v19 = vpop.xlane.xlu0 %2420 }
 0x33d   : > { %v2422_v50 = vrot.slane %v2421_v19, 4 }
 0x33f   : > { %v2423_v49 = vadd.f32 %v2422_v50, %v2421_v19 }
 0x340   : > { %v2450_v36 = vpop.xlane.xlu1 %2449 }
 0x341   : > { %v2424_v17 = vrot.slane %v2423_v49, 2  ;;  %v2451_v47 = vrot.slane %v2450_v36, 4 }
 0x343   : > { %v2452_v57 = vadd.f32 %v2451_v47, %v2450_v36  ;;  %v2425_v33 = vadd.f32 %v2424_v17, %v2423_v49 }
 0x345   : > { %v2453_v15 = vrot.slane %v2452_v57, 2  ;;  %v2426_v58 = vrot.slane %v2425_v33, 1 }
 0x347   : > { %v2454_v30 = vadd.f32 %v2453_v15, %v2452_v57  ;;  %v2427_v10 = vadd.f32 %v2426_v58, %v2425_v33 }
 0x348   : > { %v2479_v39 = vpop.xlane.xlu0 %2478 }
 0x349   : > { %v2480_v21 = vrot.slane %v2479_v39, 4  ;;  %2831 = vpush %v2427_v10  ;;  %v2455_v48 = vrot.slane %v2454_v30, 1 }
 0x34b   : > { %v2481_v12 = vadd.f32 %v2480_v21, %v2479_v39  ;;  %v2456_v59 = vadd.f32 %v2455_v48, %v2454_v30 }
 0x34d   : > { %v2482_v13 = vrot.slane %v2481_v12, 2  ;;  %2833 = vpush %v2456_v59 }
 0x34f   : > { %v2483_v20 = vadd.f32 %v2482_v13, %v2481_v12 }
 0x351   : > { %v2484_v8 = vrot.slane %v2483_v20, 1 }
 0x353   : > { %v2485_v38 = vadd.f32 %v2484_v8, %v2483_v20 }
 0x355   : > { %2835 = vpush %v2485_v38 }
 0x37a   : > { %s2832_s28 = spop %2831 }
 0x37e   : > { %s2834_s10 = spop %2833 }
 0x37f   : > { %s2458_s19 = sadd.f32 %s2834_s10, %s2832_s28 }
 0x386   : > { %s2836_s16 = spop %2835 }
 0x387   : > { %s2487_s17 = sadd.f32 %s2836_s16, %s2458_s19 }
 0x389   : > { %s2488_s12 = smul.f32 0.0006510417, %s2487_s17 }
 0x38b   : > { %v2489_v54 = vstv %s2488_s12 }
 0x38c   : > { %2491 = vst [vmem:[%s452_s27] sm:$0x1] %v2489_v54 }
 0x38d PF: > { %s22_s30 = sadd.s32 1, %s2994_s30  }
 0x38e   : > { %p19_p13 = scmp.ge.s32.totalorder %s22_s30, 4  }
 0x390   :  { %21 = sbr.rel (!%p19_p13) target bundleno = 9 (0x9), region = 122 }
 0x397   :  { %2509 = vsyncpa [#allocation4], 1 }
 0x398   :  { %2511 = vsyncpa [#allocation4 + $0x1], 1 }
 0x399   :  { %2512 = vsyncpa [#allocation6], 1 }
 0x39a   :  { %2513 = vsyncpa [#allocation9], 1 }

</bundles_post_ra>
